<compile_context>
chip_gen: v7x
topology: tpu7x:2x2x1
jax: 0.10.0
libtpu: 0.0.40
codegen_flags: <defaults>
</compile_context>

<pallas_src>
import jax
import jax.numpy as jnp
from jax.experimental import pallas as pl
from jax.experimental.pallas import tpu as pltpu

# ----------------------------- model config ---------------------------------
N_BATCH = 2
N_PART = 8          # decoder sequence length (n_part)
T_ENC = 8           # encoder sequence length
D_IN = 16           # raw part feature dim (tokenizer input)
D_MODEL = 32
N_HEADS = 4
D_HEAD = D_MODEL // N_HEADS
D_FF = 64
D_OUT = 16          # untokenizer output dim
N_LAYER = 2
LANE_PAD = 128      # lane-dense output width (final store is a full vst)
NEG_INF = -1e9
LN_EPS = 1e-5


def generate_mask(n_part):
    """Matches ParallelDecoder.generate_mask (tril of ones, int16).

    Kept for spec parity; the same mask is regenerated inside the fused kernel
    with broadcasted_iota so it never touches HBM."""
    return jnp.tril(jnp.ones((n_part, n_part), dtype=jnp.int16))


# ----------------------------- fused kernel ----------------------------------
def _fused_decoder_kernel(
    raw_ref, kpm_ref, enc_ref,
    tok_w_ref, tok_b_ref, pos_ref,
    untok_w_ref, untok_b_ref,
    wqkv_s_ref, bqkv_s_ref, wo_s_ref, bo_s_ref,
    wqkv_c_ref, bqkv_c_ref, wo_c_ref, bo_c_ref,
    wff1_ref, bff1_ref, wff2_ref, bff2_ref,
    ln_g_ref, ln_b_ref,
    o_ref,
):
    f32 = jnp.float32
    D = D_MODEL

    # ---- tokenizer linear + fused positional-embedding add ----
    x = jnp.dot(raw_ref[...], tok_w_ref[...], preferred_element_type=f32)
    x = x + tok_b_ref[...]
    pe = pos_ref[...]                                         # (S, D)
    x = x + jnp.concatenate([pe] * N_BATCH, axis=0)           # (B*S, D)

    # ---- masks built in-kernel (no HBM-materialized (B,S,S) tensors) ----
    row = jax.lax.broadcasted_iota(jnp.int32, (N_PART, N_PART), 0)
    col = jax.lax.broadcasted_iota(jnp.int32, (N_PART, N_PART), 1)
    causal_add = jnp.where(col > row, NEG_INF, 0.0).astype(f32)   # mask==0 -> blocked
    kpm = kpm_ref[...]                                        # (B, S) int32; nonzero -> blocked key

    enc = enc_ref[...]                                        # (B*T, D)
    scale = 1.0 / float(D_HEAD) ** 0.5

    def layer_norm(h, l, idx):
        g = ln_g_ref[l][idx:idx + 1, :]                       # (1, D)
        b = ln_b_ref[l][idx:idx + 1, :]
        mu = jnp.mean(h, axis=-1, keepdims=True)
        var = jnp.mean(jnp.square(h - mu), axis=-1, keepdims=True)
        return (h - mu) * jax.lax.rsqrt(var + LN_EPS) * g + b

    def mha(xq, xkv, wqkv, bqkv, wo, bo, self_attn):
        """Multi-head attention with fused QKV projection and fused output proj."""
        Sq = xq.shape[0] // N_BATCH
        Sk = xkv.shape[0] // N_BATCH
        if self_attn:
            # single (B*S, D) x (D, 3D) matmul for q, k, v
            qkv = jnp.dot(xq, wqkv, preferred_element_type=f32) + bqkv
            q_all = qkv[:, :D]
            k_all = qkv[:, D:2 * D]
            v_all = qkv[:, 2 * D:]
        else:
            q_all = jnp.dot(xq, wqkv[:, :D], preferred_element_type=f32) + bqkv[:, :D]
            kv = jnp.dot(xkv, wqkv[:, D:], preferred_element_type=f32) + bqkv[:, D:]
            k_all = kv[:, :D]
            v_all = kv[:, D:]

        outs = []
        for b in range(N_BATCH):                               # static, unrolled
            qb = q_all[b * Sq:(b + 1) * Sq, :]
            kb = k_all[b * Sk:(b + 1) * Sk, :]
            vb = v_all[b * Sk:(b + 1) * Sk, :]
            if self_attn:
                pad_add = jnp.where(kpm[b:b + 1, :] != 0, NEG_INF, 0.0).astype(f32)
                mask_b = causal_add + pad_add                  # (S, S)
            else:
                mask_b = None                                  # cross-attn: no mask
            acc = None
            for h in range(N_HEADS):                           # static, unrolled
                qh = qb[:, h * D_HEAD:(h + 1) * D_HEAD]
                kh = kb[:, h * D_HEAD:(h + 1) * D_HEAD]
                vh = vb[:, h * D_HEAD:(h + 1) * D_HEAD]
                s = jnp.dot(qh, kh.T, preferred_element_type=f32) * scale
                if mask_b is not None:
                    s = s + mask_b
                m = jnp.max(s, axis=-1, keepdims=True)
                p = jnp.exp(s - m)
                denom = jnp.sum(p, axis=-1, keepdims=True)
                p = p * pl.reciprocal(denom, approx=True)      # EUP slot
                oh = jnp.dot(p, vh, preferred_element_type=f32)
                # fold output projection into the per-head epilogue
                contrib = jnp.dot(oh, wo[h * D_HEAD:(h + 1) * D_HEAD, :],
                                  preferred_element_type=f32)
                acc = contrib if acc is None else acc + contrib
            outs.append(acc)
        return jnp.concatenate(outs, axis=0) + bo              # (B*Sq, D)

    # ---- decoder layers (post-LN), statically unrolled ----
    for l in range(N_LAYER):
        sa = mha(x, x, wqkv_s_ref[l], bqkv_s_ref[l:l + 1, :],
                 wo_s_ref[l], bo_s_ref[l:l + 1, :], self_attn=True)
        x = layer_norm(x + sa, l, 0)
        ca = mha(x, enc, wqkv_c_ref[l], bqkv_c_ref[l:l + 1, :],
                 wo_c_ref[l], bo_c_ref[l:l + 1, :], self_attn=False)
        x = layer_norm(x + ca, l, 1)
        h1 = jnp.dot(x, wff1_ref[l], preferred_element_type=f32) + bff1_ref[l:l + 1, :]
        h1 = jnp.maximum(h1, 0.0)
        ff = jnp.dot(h1, wff2_ref[l], preferred_element_type=f32) + bff2_ref[l:l + 1, :]
        x = layer_norm(x + ff, l, 2)

    # ---- untokenizer (weights zero-padded to 128 lanes -> dense, unmasked store) ----
    out = jnp.dot(x, untok_w_ref[...], preferred_element_type=f32) + untok_b_ref[...]
    o_ref[...] = out.astype(o_ref.dtype)


# ----------------------------- model (glue) ----------------------------------
def parallel_decoder_forward(params, index, raw_parts, key_padding_mask, enc_data):
    del index  # unused in the reference forward
    B, S, d_in = raw_parts.shape
    T = enc_data.shape[1]

    out = pl.pallas_call(
        _fused_decoder_kernel,
        out_shape=jax.ShapeDtypeStruct((B * S, LANE_PAD), jnp.float32),
        compiler_params=pltpu.CompilerParams(vmem_limit_bytes=32 * 1024 * 1024),
    )(
        raw_parts.reshape(B * S, d_in).astype(jnp.float32),
        key_padding_mask.astype(jnp.int32),          # nonzero -> padded (blocked) key
        enc_data.reshape(B * T, D_MODEL).astype(jnp.float32),
        params["tok_w"], params["tok_b"], params["pos_emb"],
        params["untok_w"], params["untok_b"],
        params["wqkv_self"], params["bqkv_self"], params["wo_self"], params["bo_self"],
        params["wqkv_cross"], params["bqkv_cross"], params["wo_cross"], params["bo_cross"],
        params["w_ff1"], params["b_ff1"], params["w_ff2"], params["b_ff2"],
        params["ln_g"], params["ln_b"],
    )
    part_info = out[:, :D_OUT].reshape(B, S, D_OUT)
    return part_info, None


# ----------------------------- parameter init --------------------------------
def _dense(key, shape, scale=0.05):
    return (scale * jax.random.normal(key, shape)).astype(jnp.float32)


def init_params(key):
    keys = jax.random.split(key, 3 + 6 * N_LAYER)

    untok_w = jnp.zeros((D_MODEL, LANE_PAD), jnp.float32)
    untok_w = untok_w.at[:, :D_OUT].set(_dense(keys[2], (D_MODEL, D_OUT)))

    def stack(offset):
        return jnp.stack([_dense(keys[3 + 6 * l + offset], None) for l in range(N_LAYER)])

    params = {
        "tok_w": _dense(keys[0], (D_IN, D_MODEL)),
        "tok_b": jnp.zeros((1, D_MODEL), jnp.float32),
        "pos_emb": _dense(keys[1], (N_PART, D_MODEL)),
        "untok_w": untok_w,                                    # lane-padded to 128
        "untok_b": jnp.zeros((1, LANE_PAD), jnp.float32),
        # per-layer weights stacked along a leading N_LAYER axis (kept VMEM-resident)
        "wqkv_self": jnp.stack([_dense(keys[3 + 6 * l + 0], (D_MODEL, 3 * D_MODEL))
                                for l in range(N_LAYER)]),
        "bqkv_self": jnp.zeros((N_LAYER, 3 * D_MODEL), jnp.float32),
        "wo_self": jnp.stack([_dense(keys[3 + 6 * l + 1], (D_MODEL, D_MODEL))
                              for l in range(N_LAYER)]),
        "bo_self": jnp.zeros((N_LAYER, D_MODEL), jnp.float32),
        "wqkv_cross": jnp.stack([_dense(keys[3 + 6 * l + 2], (D_MODEL, 3 * D_MODEL))
                                 for l in range(N_LAYER)]),
        "bqkv_cross": jnp.zeros((N_LAYER, 3 * D_MODEL), jnp.float32),
        "wo_cross": jnp.stack([_dense(keys[3 + 6 * l + 3], (D_MODEL, D_MODEL))
                               for l in range(N_LAYER)]),
        "bo_cross": jnp.zeros((N_LAYER, D_MODEL), jnp.float32),
        "w_ff1": jnp.stack([_dense(keys[3 + 6 * l + 4], (D_MODEL, D_FF))
                            for l in range(N_LAYER)]),
        "b_ff1": jnp.zeros((N_LAYER, D_FF), jnp.float32),
        "w_ff2": jnp.stack([_dense(keys[3 + 6 * l + 5], (D_FF, D_MODEL))
                            for l in range(N_LAYER)]),
        "b_ff2": jnp.zeros((N_LAYER, D_MODEL), jnp.float32),
        # LayerNorm params: index 0 = after self-attn, 1 = after cross-attn, 2 = after FFN
        "ln_g": jnp.ones((N_LAYER, 3, D_MODEL), jnp.float32),
        "ln_b": jnp.zeros((N_LAYER, 3, D_MODEL), jnp.float32),
    }
    return params


# ----------------------------------- main ------------------------------------
if __name__ == "__main__":
    root = jax.random.PRNGKey(0)
    k_param, k_raw, k_enc = jax.random.split(root, 3)

    params = init_params(k_param)

    index = jnp.arange(N_BATCH, dtype=jnp.int32)
    raw_parts = jax.random.normal(k_raw, (N_BATCH, N_PART, D_IN), dtype=jnp.float32)
    enc_data = jax.random.normal(k_enc, (N_BATCH, T_ENC, D_MODEL), dtype=jnp.float32)
    # True -> padded key position (blocked); keep at least one valid key per batch.
    key_padding_mask = jnp.zeros((N_BATCH, N_PART), dtype=bool).at[1, -1].set(True)

    fwd = jax.jit(parallel_decoder_forward)
    part_info, aux = fwd(params, index, raw_parts, key_padding_mask, enc_data)
    part_info = jax.block_until_ready(part_info)

    assert part_info.shape == (N_BATCH, N_PART, D_OUT)
    assert aux is None
    assert bool(jnp.all(jnp.isfinite(part_info)))
    print("KERNEL_OK")
</pallas_src>

<mosaic_0001>
module attributes {stable_mosaic.version = 11 : i64} {
  func.func @_fused_decoder_kernel(%arg0: memref<16x16xf32, #tpu.memory_space<vmem>>, %arg1: memref<2x8xi32, #tpu.memory_space<vmem>>, %arg2: memref<16x32xf32, #tpu.memory_space<vmem>>, %arg3: memref<16x32xf32, #tpu.memory_space<vmem>>, %arg4: memref<1x32xf32, #tpu.memory_space<vmem>>, %arg5: memref<8x32xf32, #tpu.memory_space<vmem>>, %arg6: memref<32x128xf32, #tpu.memory_space<vmem>>, %arg7: memref<1x128xf32, #tpu.memory_space<vmem>>, %arg8: memref<2x32x96xf32, #tpu.memory_space<vmem>>, %arg9: memref<2x96xf32, #tpu.memory_space<vmem>>, %arg10: memref<2x32x32xf32, #tpu.memory_space<vmem>>, %arg11: memref<2x32xf32, #tpu.memory_space<vmem>>, %arg12: memref<2x32x96xf32, #tpu.memory_space<vmem>>, %arg13: memref<2x96xf32, #tpu.memory_space<vmem>>, %arg14: memref<2x32x32xf32, #tpu.memory_space<vmem>>, %arg15: memref<2x32xf32, #tpu.memory_space<vmem>>, %arg16: memref<2x32x64xf32, #tpu.memory_space<vmem>>, %arg17: memref<2x64xf32, #tpu.memory_space<vmem>>, %arg18: memref<2x64x32xf32, #tpu.memory_space<vmem>>, %arg19: memref<2x32xf32, #tpu.memory_space<vmem>>, %arg20: memref<2x3x32xf32, #tpu.memory_space<vmem>>, %arg21: memref<2x3x32xf32, #tpu.memory_space<vmem>>, %arg22: memref<16x128xf32, #tpu.memory_space<vmem>>) attributes {dimension_semantics = [], scalar_prefetch = 0 : i64, scratch_operands = 0 : i64, tpu.core_type = #tpu.core_type<tc>} {
    %c0 = arith.constant 0 : index
    %c0_0 = arith.constant 0 : index
    %0 = vector.load %arg0[%c0, %c0_0] : memref<16x16xf32, #tpu.memory_space<vmem>>, vector<16x16xf32>
    %c0_1 = arith.constant 0 : index
    %c0_2 = arith.constant 0 : index
    %1 = vector.load %arg3[%c0_1, %c0_2] : memref<16x32xf32, #tpu.memory_space<vmem>>, vector<16x32xf32>
    %cst = arith.constant dense<0.000000e+00> : vector<16x32xf32>
    %2 = tpu.matmul %0, %1, %cst {dimension_numbers = #tpu.dot_dimension_numbers<[1], [0], [0], [1], [0, 0, 1, 1], [], []>} : vector<16x16xf32>, vector<16x32xf32>, vector<16x32xf32> -> vector<16x32xf32>
    %c0_3 = arith.constant 0 : index
    %c0_4 = arith.constant 0 : index
    %3 = vector.load %arg4[%c0_3, %c0_4] : memref<1x32xf32, #tpu.memory_space<vmem>>, vector<1x32xf32>
    %4 = vector.broadcast %3 : vector<1x32xf32> to vector<16x32xf32>
    %5 = arith.addf %2, %4 : vector<16x32xf32>
    %c0_5 = arith.constant 0 : index
    %c0_6 = arith.constant 0 : index
    %6 = vector.load %arg5[%c0_5, %c0_6] : memref<8x32xf32, #tpu.memory_space<vmem>>, vector<8x32xf32>
    %7 = tpu.concatenate %6, %6 in 0 : vector<8x32xf32>, vector<8x32xf32> -> vector<16x32xf32>
    %8 = arith.addf %5, %7 : vector<16x32xf32>
    %9 = tpu.iota {dimensions = array<i32: 0>} : vector<8x8xi32>
    %10 = tpu.iota {dimensions = array<i32: 1>} : vector<8x8xi32>
    %11 = arith.cmpi sgt, %10, %9 : vector<8x8xi32>
    %cst_7 = arith.constant -1.000000e+09 : f32
    %cst_8 = arith.constant 0.000000e+00 : f32
    %12 = vector.broadcast %cst_7 : f32 to vector<8x8xf32>
    %13 = vector.broadcast %cst_8 : f32 to vector<8x8xf32>
    %14 = arith.select %11, %12, %13 : vector<8x8xi1>, vector<8x8xf32>
    %c0_9 = arith.constant 0 : index
    %c0_10 = arith.constant 0 : index
    %15 = vector.load %arg1[%c0_9, %c0_10] : memref<2x8xi32, #tpu.memory_space<vmem>>, vector<2x8xi32>
    %c0_11 = arith.constant 0 : index
    %c0_12 = arith.constant 0 : index
    %16 = vector.load %arg2[%c0_11, %c0_12] : memref<16x32xf32, #tpu.memory_space<vmem>>, vector<16x32xf32>
    %c0_13 = arith.constant 0 : index
    %c0_14 = arith.constant 0 : index
    %c0_15 = arith.constant 0 : index
    %17 = vector.load %arg8[%c0_13, %c0_14, %c0_15] : memref<2x32x96xf32, #tpu.memory_space<vmem>>, vector<1x32x96xf32>
    %18 = vector.shape_cast %17 : vector<1x32x96xf32> to vector<32x96xf32>
    %c0_16 = arith.constant 0 : index
    %c0_17 = arith.constant 0 : index
    %19 = vector.load %arg9[%c0_16, %c0_17] : memref<2x96xf32, #tpu.memory_space<vmem>>, vector<1x96xf32>
    %c0_18 = arith.constant 0 : index
    %c0_19 = arith.constant 0 : index
    %c0_20 = arith.constant 0 : index
    %20 = vector.load %arg10[%c0_18, %c0_19, %c0_20] : memref<2x32x32xf32, #tpu.memory_space<vmem>>, vector<1x32x32xf32>
    %21 = vector.shape_cast %20 : vector<1x32x32xf32> to vector<32x32xf32>
    %c0_21 = arith.constant 0 : index
    %c0_22 = arith.constant 0 : index
    %22 = vector.load %arg11[%c0_21, %c0_22] : memref<2x32xf32, #tpu.memory_space<vmem>>, vector<1x32xf32>
    %cst_23 = arith.constant dense<0.000000e+00> : vector<16x96xf32>
    %23 = tpu.matmul %8, %18, %cst_23 {dimension_numbers = #tpu.dot_dimension_numbers<[1], [0], [0], [1], [0, 0, 1, 1], [], []>} : vector<16x32xf32>, vector<32x96xf32>, vector<16x96xf32> -> vector<16x96xf32>
    %24 = vector.broadcast %19 : vector<1x96xf32> to vector<16x96xf32>
    %25 = arith.addf %23, %24 : vector<16x96xf32>
    %26 = vector.extract_strided_slice %25 {offsets = [0, 0], sizes = [16, 32], strides = [1, 1]} : vector<16x96xf32> to vector<16x32xf32>
    %27 = vector.extract_strided_slice %25 {offsets = [0, 32], sizes = [16, 32], strides = [1, 1]} : vector<16x96xf32> to vector<16x32xf32>
    %28 = vector.extract_strided_slice %25 {offsets = [0, 64], sizes = [16, 32], strides = [1, 1]} : vector<16x96xf32> to vector<16x32xf32>
    %29 = vector.extract_strided_slice %26 {offsets = [0, 0], sizes = [8, 32], strides = [1, 1]} : vector<16x32xf32> to vector<8x32xf32>
    %30 = vector.extract_strided_slice %27 {offsets = [0, 0], sizes = [8, 32], strides = [1, 1]} : vector<16x32xf32> to vector<8x32xf32>
    %31 = vector.extract_strided_slice %28 {offsets = [0, 0], sizes = [8, 32], strides = [1, 1]} : vector<16x32xf32> to vector<8x32xf32>
    %32 = vector.extract_strided_slice %15 {offsets = [0, 0], sizes = [1, 8], strides = [1, 1]} : vector<2x8xi32> to vector<1x8xi32>
    %c0_i32 = arith.constant 0 : i32
    %33 = vector.broadcast %c0_i32 : i32 to vector<1x8xi32>
    %34 = arith.cmpi ne, %32, %33 : vector<1x8xi32>
    %cst_24 = arith.constant -1.000000e+09 : f32
    %cst_25 = arith.constant 0.000000e+00 : f32
    %35 = vector.broadcast %cst_24 : f32 to vector<1x8xf32>
    %36 = vector.broadcast %cst_25 : f32 to vector<1x8xf32>
    %37 = arith.select %34, %35, %36 : vector<1x8xi1>, vector<1x8xf32>
    %38 = vector.broadcast %37 : vector<1x8xf32> to vector<8x8xf32>
    %39 = arith.addf %14, %38 : vector<8x8xf32>
    %40 = vector.extract_strided_slice %29 {offsets = [0, 0], sizes = [8, 8], strides = [1, 1]} : vector<8x32xf32> to vector<8x8xf32>
    %41 = vector.extract_strided_slice %30 {offsets = [0, 0], sizes = [8, 8], strides = [1, 1]} : vector<8x32xf32> to vector<8x8xf32>
    %42 = vector.extract_strided_slice %31 {offsets = [0, 0], sizes = [8, 8], strides = [1, 1]} : vector<8x32xf32> to vector<8x8xf32>
    %43 = tpu.transpose %41, [1, 0] : vector<8x8xf32> -> vector<8x8xf32>
    %cst_26 = arith.constant dense<0.000000e+00> : vector<8x8xf32>
    %44 = tpu.matmul %40, %43, %cst_26 {dimension_numbers = #tpu.dot_dimension_numbers<[1], [0], [0], [1], [0, 0, 1, 1], [], []>} : vector<8x8xf32>, vector<8x8xf32>, vector<8x8xf32> -> vector<8x8xf32>
    %cst_27 = arith.constant 0.353553385 : f32
    %45 = vector.broadcast %cst_27 : f32 to vector<8x8xf32>
    %46 = arith.mulf %44, %45 : vector<8x8xf32>
    %47 = arith.addf %46, %39 : vector<8x8xf32>
    %cst_28 = arith.constant dense<0xFF800000> : vector<8xf32>
    %48 = vector.multi_reduction <maximumf>, %47, %cst_28 [1] : vector<8x8xf32> to vector<8xf32>
    %49 = vector.shape_cast %48 : vector<8xf32> to vector<8x1xf32>
    %50 = vector.broadcast %49 : vector<8x1xf32> to vector<8x8xf32>
    %51 = arith.subf %47, %50 : vector<8x8xf32>
    %52 = math.exp %51 : vector<8x8xf32>
    %cst_29 = arith.constant dense<0.000000e+00> : vector<8xf32>
    %53 = vector.multi_reduction <add>, %52, %cst_29 [1] : vector<8x8xf32> to vector<8xf32>
    %54 = vector.shape_cast %53 : vector<8xf32> to vector<8x1xf32>
    %55 = tpu.reciprocal %54 {approx = true} : vector<8x1xf32> -> vector<8x1xf32>
    %56 = vector.broadcast %55 : vector<8x1xf32> to vector<8x8xf32>
    %57 = arith.mulf %52, %56 : vector<8x8xf32>
    %cst_30 = arith.constant dense<0.000000e+00> : vector<8x8xf32>
    %58 = tpu.matmul %57, %42, %cst_30 {dimension_numbers = #tpu.dot_dimension_numbers<[1], [0], [0], [1], [0, 0, 1, 1], [], []>} : vector<8x8xf32>, vector<8x8xf32>, vector<8x8xf32> -> vector<8x8xf32>
    %59 = vector.extract_strided_slice %21 {offsets = [0, 0], sizes = [8, 32], strides = [1, 1]} : vector<32x32xf32> to vector<8x32xf32>
    %cst_31 = arith.constant dense<0.000000e+00> : vector<8x32xf32>
    %60 = tpu.matmul %58, %59, %cst_31 {dimension_numbers = #tpu.dot_dimension_numbers<[1], [0], [0], [1], [0, 0, 1, 1], [], []>} : vector<8x8xf32>, vector<8x32xf32>, vector<8x32xf32> -> vector<8x32xf32>
    %61 = vector.extract_strided_slice %29 {offsets = [0, 8], sizes = [8, 8], strides = [1, 1]} : vector<8x32xf32> to vector<8x8xf32>
    %62 = vector.extract_strided_slice %30 {offsets = [0, 8], sizes = [8, 8], strides = [1, 1]} : vector<8x32xf32> to vector<8x8xf32>
    %63 = vector.extract_strided_slice %31 {offsets = [0, 8], sizes = [8, 8], strides = [1, 1]} : vector<8x32xf32> to vector<8x8xf32>
    %64 = tpu.transpose %62, [1, 0] : vector<8x8xf32> -> vector<8x8xf32>
    %cst_32 = arith.constant dense<0.000000e+00> : vector<8x8xf32>
    %65 = tpu.matmul %61, %64, %cst_32 {dimension_numbers = #tpu.dot_dimension_numbers<[1], [0], [0], [1], [0, 0, 1, 1], [], []>} : vector<8x8xf32>, vector<8x8xf32>, vector<8x8xf32> -> vector<8x8xf32>
    %cst_33 = arith.constant 0.353553385 : f32
    %66 = vector.broadcast %cst_33 : f32 to vector<8x8xf32>
    %67 = arith.mulf %65, %66 : vector<8x8xf32>
    %68 = arith.addf %67, %39 : vector<8x8xf32>
    %cst_34 = arith.constant dense<0xFF800000> : vector<8xf32>
    %69 = vector.multi_reduction <maximumf>, %68, %cst_34 [1] : vector<8x8xf32> to vector<8xf32>
    %70 = vector.shape_cast %69 : vector<8xf32> to vector<8x1xf32>
    %71 = vector.broadcast %70 : vector<8x1xf32> to vector<8x8xf32>
    %72 = arith.subf %68, %71 : vector<8x8xf32>
    %73 = math.exp %72 : vector<8x8xf32>
    %cst_35 = arith.constant dense<0.000000e+00> : vector<8xf32>
    %74 = vector.multi_reduction <add>, %73, %cst_35 [1] : vector<8x8xf32> to vector<8xf32>
    %75 = vector.shape_cast %74 : vector<8xf32> to vector<8x1xf32>
    %76 = tpu.reciprocal %75 {approx = true} : vector<8x1xf32> -> vector<8x1xf32>
    %77 = vector.broadcast %76 : vector<8x1xf32> to vector<8x8xf32>
    %78 = arith.mulf %73, %77 : vector<8x8xf32>
    %cst_36 = arith.constant dense<0.000000e+00> : vector<8x8xf32>
    %79 = tpu.matmul %78, %63, %cst_36 {dimension_numbers = #tpu.dot_dimension_numbers<[1], [0], [0], [1], [0, 0, 1, 1], [], []>} : vector<8x8xf32>, vector<8x8xf32>, vector<8x8xf32> -> vector<8x8xf32>
    %80 = vector.extract_strided_slice %21 {offsets = [8, 0], sizes = [8, 32], strides = [1, 1]} : vector<32x32xf32> to vector<8x32xf32>
    %cst_37 = arith.constant dense<0.000000e+00> : vector<8x32xf32>
    %81 = tpu.matmul %79, %80, %cst_37 {dimension_numbers = #tpu.dot_dimension_numbers<[1], [0], [0], [1], [0, 0, 1, 1], [], []>} : vector<8x8xf32>, vector<8x32xf32>, vector<8x32xf32> -> vector<8x32xf32>
    %82 = arith.addf %60, %81 : vector<8x32xf32>
    %83 = vector.extract_strided_slice %29 {offsets = [0, 16], sizes = [8, 8], strides = [1, 1]} : vector<8x32xf32> to vector<8x8xf32>
    %84 = vector.extract_strided_slice %30 {offsets = [0, 16], sizes = [8, 8], strides = [1, 1]} : vector<8x32xf32> to vector<8x8xf32>
    %85 = vector.extract_strided_slice %31 {offsets = [0, 16], sizes = [8, 8], strides = [1, 1]} : vector<8x32xf32> to vector<8x8xf32>
    %86 = tpu.transpose %84, [1, 0] : vector<8x8xf32> -> vector<8x8xf32>
    %cst_38 = arith.constant dense<0.000000e+00> : vector<8x8xf32>
    %87 = tpu.matmul %83, %86, %cst_38 {dimension_numbers = #tpu.dot_dimension_numbers<[1], [0], [0], [1], [0, 0, 1, 1], [], []>} : vector<8x8xf32>, vector<8x8xf32>, vector<8x8xf32> -> vector<8x8xf32>
    %cst_39 = arith.constant 0.353553385 : f32
    %88 = vector.broadcast %cst_39 : f32 to vector<8x8xf32>
    %89 = arith.mulf %87, %88 : vector<8x8xf32>
    %90 = arith.addf %89, %39 : vector<8x8xf32>
    %cst_40 = arith.constant dense<0xFF800000> : vector<8xf32>
    %91 = vector.multi_reduction <maximumf>, %90, %cst_40 [1] : vector<8x8xf32> to vector<8xf32>
    %92 = vector.shape_cast %91 : vector<8xf32> to vector<8x1xf32>
    %93 = vector.broadcast %92 : vector<8x1xf32> to vector<8x8xf32>
    %94 = arith.subf %90, %93 : vector<8x8xf32>
    %95 = math.exp %94 : vector<8x8xf32>
    %cst_41 = arith.constant dense<0.000000e+00> : vector<8xf32>
    %96 = vector.multi_reduction <add>, %95, %cst_41 [1] : vector<8x8xf32> to vector<8xf32>
    %97 = vector.shape_cast %96 : vector<8xf32> to vector<8x1xf32>
    %98 = tpu.reciprocal %97 {approx = true} : vector<8x1xf32> -> vector<8x1xf32>
    %99 = vector.broadcast %98 : vector<8x1xf32> to vector<8x8xf32>
    %100 = arith.mulf %95, %99 : vector<8x8xf32>
    %cst_42 = arith.constant dense<0.000000e+00> : vector<8x8xf32>
    %101 = tpu.matmul %100, %85, %cst_42 {dimension_numbers = #tpu.dot_dimension_numbers<[1], [0], [0], [1], [0, 0, 1, 1], [], []>} : vector<8x8xf32>, vector<8x8xf32>, vector<8x8xf32> -> vector<8x8xf32>
    %102 = vector.extract_strided_slice %21 {offsets = [16, 0], sizes = [8, 32], strides = [1, 1]} : vector<32x32xf32> to vector<8x32xf32>
    %cst_43 = arith.constant dense<0.000000e+00> : vector<8x32xf32>
    %103 = tpu.matmul %101, %102, %cst_43 {dimension_numbers = #tpu.dot_dimension_numbers<[1], [0], [0], [1], [0, 0, 1, 1], [], []>} : vector<8x8xf32>, vector<8x32xf32>, vector<8x32xf32> -> vector<8x32xf32>
    %104 = arith.addf %82, %103 : vector<8x32xf32>
    %105 = vector.extract_strided_slice %29 {offsets = [0, 24], sizes = [8, 8], strides = [1, 1]} : vector<8x32xf32> to vector<8x8xf32>
    %106 = vector.extract_strided_slice %30 {offsets = [0, 24], sizes = [8, 8], strides = [1, 1]} : vector<8x32xf32> to vector<8x8xf32>
    %107 = vector.extract_strided_slice %31 {offsets = [0, 24], sizes = [8, 8], strides = [1, 1]} : vector<8x32xf32> to vector<8x8xf32>
    %108 = tpu.transpose %106, [1, 0] : vector<8x8xf32> -> vector<8x8xf32>
    %cst_44 = arith.constant dense<0.000000e+00> : vector<8x8xf32>
    %109 = tpu.matmul %105, %108, %cst_44 {dimension_numbers = #tpu.dot_dimension_numbers<[1], [0], [0], [1], [0, 0, 1, 1], [], []>} : vector<8x8xf32>, vector<8x8xf32>, vector<8x8xf32> -> vector<8x8xf32>
    %cst_45 = arith.constant 0.353553385 : f32
    %110 = vector.broadcast %cst_45 : f32 to vector<8x8xf32>
    %111 = arith.mulf %109, %110 : vector<8x8xf32>
    %112 = arith.addf %111, %39 : vector<8x8xf32>
    %cst_46 = arith.constant dense<0xFF800000> : vector<8xf32>
    %113 = vector.multi_reduction <maximumf>, %112, %cst_46 [1] : vector<8x8xf32> to vector<8xf32>
    %114 = vector.shape_cast %113 : vector<8xf32> to vector<8x1xf32>
    %115 = vector.broadcast %114 : vector<8x1xf32> to vector<8x8xf32>
    %116 = arith.subf %112, %115 : vector<8x8xf32>
    %117 = math.exp %116 : vector<8x8xf32>
    %cst_47 = arith.constant dense<0.000000e+00> : vector<8xf32>
    %118 = vector.multi_reduction <add>, %117, %cst_47 [1] : vector<8x8xf32> to vector<8xf32>
    %119 = vector.shape_cast %118 : vector<8xf32> to vector<8x1xf32>
    %120 = tpu.reciprocal %119 {approx = true} : vector<8x1xf32> -> vector<8x1xf32>
    %121 = vector.broadcast %120 : vector<8x1xf32> to vector<8x8xf32>
    %122 = arith.mulf %117, %121 : vector<8x8xf32>
    %cst_48 = arith.constant dense<0.000000e+00> : vector<8x8xf32>
    %123 = tpu.matmul %122, %107, %cst_48 {dimension_numbers = #tpu.dot_dimension_numbers<[1], [0], [0], [1], [0, 0, 1, 1], [], []>} : vector<8x8xf32>, vector<8x8xf32>, vector<8x8xf32> -> vector<8x8xf32>
    %124 = vector.extract_strided_slice %21 {offsets = [24, 0], sizes = [8, 32], strides = [1, 1]} : vector<32x32xf32> to vector<8x32xf32>
    %cst_49 = arith.constant dense<0.000000e+00> : vector<8x32xf32>
    %125 = tpu.matmul %123, %124, %cst_49 {dimension_numbers = #tpu.dot_dimension_numbers<[1], [0], [0], [1], [0, 0, 1, 1], [], []>} : vector<8x8xf32>, vector<8x32xf32>, vector<8x32xf32> -> vector<8x32xf32>
    %126 = arith.addf %104, %125 : vector<8x32xf32>
    %127 = vector.extract_strided_slice %26 {offsets = [8, 0], sizes = [8, 32], strides = [1, 1]} : vector<16x32xf32> to vector<8x32xf32>
    %128 = vector.extract_strided_slice %27 {offsets = [8, 0], sizes = [8, 32], strides = [1, 1]} : vector<16x32xf32> to vector<8x32xf32>
    %129 = vector.extract_strided_slice %28 {offsets = [8, 0], sizes = [8, 32], strides = [1, 1]} : vector<16x32xf32> to vector<8x32xf32>
    %130 = vector.extract_strided_slice %15 {offsets = [1, 0], sizes = [1, 8], strides = [1, 1]} : vector<2x8xi32> to vector<1x8xi32>
    %c0_i32_50 = arith.constant 0 : i32
    %131 = vector.broadcast %c0_i32_50 : i32 to vector<1x8xi32>
    %132 = arith.cmpi ne, %130, %131 : vector<1x8xi32>
    %cst_51 = arith.constant -1.000000e+09 : f32
    %cst_52 = arith.constant 0.000000e+00 : f32
    %133 = vector.broadcast %cst_51 : f32 to vector<1x8xf32>
    %134 = vector.broadcast %cst_52 : f32 to vector<1x8xf32>
    %135 = arith.select %132, %133, %134 : vector<1x8xi1>, vector<1x8xf32>
    %136 = vector.broadcast %135 : vector<1x8xf32> to vector<8x8xf32>
    %137 = arith.addf %14, %136 : vector<8x8xf32>
    %138 = vector.extract_strided_slice %127 {offsets = [0, 0], sizes = [8, 8], strides = [1, 1]} : vector<8x32xf32> to vector<8x8xf32>
    %139 = vector.extract_strided_slice %128 {offsets = [0, 0], sizes = [8, 8], strides = [1, 1]} : vector<8x32xf32> to vector<8x8xf32>
    %140 = vector.extract_strided_slice %129 {offsets = [0, 0], sizes = [8, 8], strides = [1, 1]} : vector<8x32xf32> to vector<8x8xf32>
    %141 = tpu.transpose %139, [1, 0] : vector<8x8xf32> -> vector<8x8xf32>
    %cst_53 = arith.constant dense<0.000000e+00> : vector<8x8xf32>
    %142 = tpu.matmul %138, %141, %cst_53 {dimension_numbers = #tpu.dot_dimension_numbers<[1], [0], [0], [1], [0, 0, 1, 1], [], []>} : vector<8x8xf32>, vector<8x8xf32>, vector<8x8xf32> -> vector<8x8xf32>
    %cst_54 = arith.constant 0.353553385 : f32
    %143 = vector.broadcast %cst_54 : f32 to vector<8x8xf32>
    %144 = arith.mulf %142, %143 : vector<8x8xf32>
    %145 = arith.addf %144, %137 : vector<8x8xf32>
    %cst_55 = arith.constant dense<0xFF800000> : vector<8xf32>
    %146 = vector.multi_reduction <maximumf>, %145, %cst_55 [1] : vector<8x8xf32> to vector<8xf32>
    %147 = vector.shape_cast %146 : vector<8xf32> to vector<8x1xf32>
    %148 = vector.broadcast %147 : vector<8x1xf32> to vector<8x8xf32>
    %149 = arith.subf %145, %148 : vector<8x8xf32>
    %150 = math.exp %149 : vector<8x8xf32>
    %cst_56 = arith.constant dense<0.000000e+00> : vector<8xf32>
    %151 = vector.multi_reduction <add>, %150, %cst_56 [1] : vector<8x8xf32> to vector<8xf32>
    %152 = vector.shape_cast %151 : vector<8xf32> to vector<8x1xf32>
    %153 = tpu.reciprocal %152 {approx = true} : vector<8x1xf32> -> vector<8x1xf32>
    %154 = vector.broadcast %153 : vector<8x1xf32> to vector<8x8xf32>
    %155 = arith.mulf %150, %154 : vector<8x8xf32>
    %cst_57 = arith.constant dense<0.000000e+00> : vector<8x8xf32>
    %156 = tpu.matmul %155, %140, %cst_57 {dimension_numbers = #tpu.dot_dimension_numbers<[1], [0], [0], [1], [0, 0, 1, 1], [], []>} : vector<8x8xf32>, vector<8x8xf32>, vector<8x8xf32> -> vector<8x8xf32>
    %157 = vector.extract_strided_slice %21 {offsets = [0, 0], sizes = [8, 32], strides = [1, 1]} : vector<32x32xf32> to vector<8x32xf32>
    %cst_58 = arith.constant dense<0.000000e+00> : vector<8x32xf32>
    %158 = tpu.matmul %156, %157, %cst_58 {dimension_numbers = #tpu.dot_dimension_numbers<[1], [0], [0], [1], [0, 0, 1, 1], [], []>} : vector<8x8xf32>, vector<8x32xf32>, vector<8x32xf32> -> vector<8x32xf32>
    %159 = vector.extract_strided_slice %127 {offsets = [0, 8], sizes = [8, 8], strides = [1, 1]} : vector<8x32xf32> to vector<8x8xf32>
    %160 = vector.extract_strided_slice %128 {offsets = [0, 8], sizes = [8, 8], strides = [1, 1]} : vector<8x32xf32> to vector<8x8xf32>
    %161 = vector.extract_strided_slice %129 {offsets = [0, 8], sizes = [8, 8], strides = [1, 1]} : vector<8x32xf32> to vector<8x8xf32>
    %162 = tpu.transpose %160, [1, 0] : vector<8x8xf32> -> vector<8x8xf32>
    %cst_59 = arith.constant dense<0.000000e+00> : vector<8x8xf32>
    %163 = tpu.matmul %159, %162, %cst_59 {dimension_numbers = #tpu.dot_dimension_numbers<[1], [0], [0], [1], [0, 0, 1, 1], [], []>} : vector<8x8xf32>, vector<8x8xf32>, vector<8x8xf32> -> vector<8x8xf32>
    %cst_60 = arith.constant 0.353553385 : f32
    %164 = vector.broadcast %cst_60 : f32 to vector<8x8xf32>
    %165 = arith.mulf %163, %164 : vector<8x8xf32>
    %166 = arith.addf %165, %137 : vector<8x8xf32>
    %cst_61 = arith.constant dense<0xFF800000> : vector<8xf32>
    %167 = vector.multi_reduction <maximumf>, %166, %cst_61 [1] : vector<8x8xf32> to vector<8xf32>
    %168 = vector.shape_cast %167 : vector<8xf32> to vector<8x1xf32>
    %169 = vector.broadcast %168 : vector<8x1xf32> to vector<8x8xf32>
    %170 = arith.subf %166, %169 : vector<8x8xf32>
    %171 = math.exp %170 : vector<8x8xf32>
    %cst_62 = arith.constant dense<0.000000e+00> : vector<8xf32>
    %172 = vector.multi_reduction <add>, %171, %cst_62 [1] : vector<8x8xf32> to vector<8xf32>
    %173 = vector.shape_cast %172 : vector<8xf32> to vector<8x1xf32>
    %174 = tpu.reciprocal %173 {approx = true} : vector<8x1xf32> -> vector<8x1xf32>
    %175 = vector.broadcast %174 : vector<8x1xf32> to vector<8x8xf32>
    %176 = arith.mulf %171, %175 : vector<8x8xf32>
    %cst_63 = arith.constant dense<0.000000e+00> : vector<8x8xf32>
    %177 = tpu.matmul %176, %161, %cst_63 {dimension_numbers = #tpu.dot_dimension_numbers<[1], [0], [0], [1], [0, 0, 1, 1], [], []>} : vector<8x8xf32>, vector<8x8xf32>, vector<8x8xf32> -> vector<8x8xf32>
    %178 = vector.extract_strided_slice %21 {offsets = [8, 0], sizes = [8, 32], strides = [1, 1]} : vector<32x32xf32> to vector<8x32xf32>
    %cst_64 = arith.constant dense<0.000000e+00> : vector<8x32xf32>
    %179 = tpu.matmul %177, %178, %cst_64 {dimension_numbers = #tpu.dot_dimension_numbers<[1], [0], [0], [1], [0, 0, 1, 1], [], []>} : vector<8x8xf32>, vector<8x32xf32>, vector<8x32xf32> -> vector<8x32xf32>
    %180 = arith.addf %158, %179 : vector<8x32xf32>
    %181 = vector.extract_strided_slice %127 {offsets = [0, 16], sizes = [8, 8], strides = [1, 1]} : vector<8x32xf32> to vector<8x8xf32>
    %182 = vector.extract_strided_slice %128 {offsets = [0, 16], sizes = [8, 8], strides = [1, 1]} : vector<8x32xf32> to vector<8x8xf32>
    %183 = vector.extract_strided_slice %129 {offsets = [0, 16], sizes = [8, 8], strides = [1, 1]} : vector<8x32xf32> to vector<8x8xf32>
    %184 = tpu.transpose %182, [1, 0] : vector<8x8xf32> -> vector<8x8xf32>
    %cst_65 = arith.constant dense<0.000000e+00> : vector<8x8xf32>
    %185 = tpu.matmul %181, %184, %cst_65 {dimension_numbers = #tpu.dot_dimension_numbers<[1], [0], [0], [1], [0, 0, 1, 1], [], []>} : vector<8x8xf32>, vector<8x8xf32>, vector<8x8xf32> -> vector<8x8xf32>
    %cst_66 = arith.constant 0.353553385 : f32
    %186 = vector.broadcast %cst_66 : f32 to vector<8x8xf32>
    %187 = arith.mulf %185, %186 : vector<8x8xf32>
    %188 = arith.addf %187, %137 : vector<8x8xf32>
    %cst_67 = arith.constant dense<0xFF800000> : vector<8xf32>
    %189 = vector.multi_reduction <maximumf>, %188, %cst_67 [1] : vector<8x8xf32> to vector<8xf32>
    %190 = vector.shape_cast %189 : vector<8xf32> to vector<8x1xf32>
    %191 = vector.broadcast %190 : vector<8x1xf32> to vector<8x8xf32>
    %192 = arith.subf %188, %191 : vector<8x8xf32>
    %193 = math.exp %192 : vector<8x8xf32>
    %cst_68 = arith.constant dense<0.000000e+00> : vector<8xf32>
    %194 = vector.multi_reduction <add>, %193, %cst_68 [1] : vector<8x8xf32> to vector<8xf32>
    %195 = vector.shape_cast %194 : vector<8xf32> to vector<8x1xf32>
    %196 = tpu.reciprocal %195 {approx = true} : vector<8x1xf32> -> vector<8x1xf32>
    %197 = vector.broadcast %196 : vector<8x1xf32> to vector<8x8xf32>
    %198 = arith.mulf %193, %197 : vector<8x8xf32>
    %cst_69 = arith.constant dense<0.000000e+00> : vector<8x8xf32>
    %199 = tpu.matmul %198, %183, %cst_69 {dimension_numbers = #tpu.dot_dimension_numbers<[1], [0], [0], [1], [0, 0, 1, 1], [], []>} : vector<8x8xf32>, vector<8x8xf32>, vector<8x8xf32> -> vector<8x8xf32>
    %200 = vector.extract_strided_slice %21 {offsets = [16, 0], sizes = [8, 32], strides = [1, 1]} : vector<32x32xf32> to vector<8x32xf32>
    %cst_70 = arith.constant dense<0.000000e+00> : vector<8x32xf32>
    %201 = tpu.matmul %199, %200, %cst_70 {dimension_numbers = #tpu.dot_dimension_numbers<[1], [0], [0], [1], [0, 0, 1, 1], [], []>} : vector<8x8xf32>, vector<8x32xf32>, vector<8x32xf32> -> vector<8x32xf32>
    %202 = arith.addf %180, %201 : vector<8x32xf32>
    %203 = vector.extract_strided_slice %127 {offsets = [0, 24], sizes = [8, 8], strides = [1, 1]} : vector<8x32xf32> to vector<8x8xf32>
    %204 = vector.extract_strided_slice %128 {offsets = [0, 24], sizes = [8, 8], strides = [1, 1]} : vector<8x32xf32> to vector<8x8xf32>
    %205 = vector.extract_strided_slice %129 {offsets = [0, 24], sizes = [8, 8], strides = [1, 1]} : vector<8x32xf32> to vector<8x8xf32>
    %206 = tpu.transpose %204, [1, 0] : vector<8x8xf32> -> vector<8x8xf32>
    %cst_71 = arith.constant dense<0.000000e+00> : vector<8x8xf32>
    %207 = tpu.matmul %203, %206, %cst_71 {dimension_numbers = #tpu.dot_dimension_numbers<[1], [0], [0], [1], [0, 0, 1, 1], [], []>} : vector<8x8xf32>, vector<8x8xf32>, vector<8x8xf32> -> vector<8x8xf32>
    %cst_72 = arith.constant 0.353553385 : f32
    %208 = vector.broadcast %cst_72 : f32 to vector<8x8xf32>
    %209 = arith.mulf %207, %208 : vector<8x8xf32>
    %210 = arith.addf %209, %137 : vector<8x8xf32>
    %cst_73 = arith.constant dense<0xFF800000> : vector<8xf32>
    %211 = vector.multi_reduction <maximumf>, %210, %cst_73 [1] : vector<8x8xf32> to vector<8xf32>
    %212 = vector.shape_cast %211 : vector<8xf32> to vector<8x1xf32>
    %213 = vector.broadcast %212 : vector<8x1xf32> to vector<8x8xf32>
    %214 = arith.subf %210, %213 : vector<8x8xf32>
    %215 = math.exp %214 : vector<8x8xf32>
    %cst_74 = arith.constant dense<0.000000e+00> : vector<8xf32>
    %216 = vector.multi_reduction <add>, %215, %cst_74 [1] : vector<8x8xf32> to vector<8xf32>
    %217 = vector.shape_cast %216 : vector<8xf32> to vector<8x1xf32>
    %218 = tpu.reciprocal %217 {approx = true} : vector<8x1xf32> -> vector<8x1xf32>
    %219 = vector.broadcast %218 : vector<8x1xf32> to vector<8x8xf32>
    %220 = arith.mulf %215, %219 : vector<8x8xf32>
    %cst_75 = arith.constant dense<0.000000e+00> : vector<8x8xf32>
    %221 = tpu.matmul %220, %205, %cst_75 {dimension_numbers = #tpu.dot_dimension_numbers<[1], [0], [0], [1], [0, 0, 1, 1], [], []>} : vector<8x8xf32>, vector<8x8xf32>, vector<8x8xf32> -> vector<8x8xf32>
    %222 = vector.extract_strided_slice %21 {offsets = [24, 0], sizes = [8, 32], strides = [1, 1]} : vector<32x32xf32> to vector<8x32xf32>
    %cst_76 = arith.constant dense<0.000000e+00> : vector<8x32xf32>
    %223 = tpu.matmul %221, %222, %cst_76 {dimension_numbers = #tpu.dot_dimension_numbers<[1], [0], [0], [1], [0, 0, 1, 1], [], []>} : vector<8x8xf32>, vector<8x32xf32>, vector<8x32xf32> -> vector<8x32xf32>
    %224 = arith.addf %202, %223 : vector<8x32xf32>
    %225 = tpu.concatenate %126, %224 in 0 : vector<8x32xf32>, vector<8x32xf32> -> vector<16x32xf32>
    %226 = vector.broadcast %22 : vector<1x32xf32> to vector<16x32xf32>
    %227 = arith.addf %225, %226 : vector<16x32xf32>
    %228 = arith.addf %8, %227 : vector<16x32xf32>
    %c0_77 = arith.constant 0 : index
    %c0_78 = arith.constant 0 : index
    %c0_79 = arith.constant 0 : index
    %229 = vector.load %arg20[%c0_77, %c0_78, %c0_79] : memref<2x3x32xf32, #tpu.memory_space<vmem>>, vector<1x3x32xf32>
    %230 = vector.shape_cast %229 : vector<1x3x32xf32> to vector<3x32xf32>
    %231 = vector.extract_strided_slice %230 {offsets = [0, 0], sizes = [1, 32], strides = [1, 1]} : vector<3x32xf32> to vector<1x32xf32>
    %c0_80 = arith.constant 0 : index
    %c0_81 = arith.constant 0 : index
    %c0_82 = arith.constant 0 : index
    %232 = vector.load %arg21[%c0_80, %c0_81, %c0_82] : memref<2x3x32xf32, #tpu.memory_space<vmem>>, vector<1x3x32xf32>
    %233 = vector.shape_cast %232 : vector<1x3x32xf32> to vector<3x32xf32>
    %234 = vector.extract_strided_slice %233 {offsets = [0, 0], sizes = [1, 32], strides = [1, 1]} : vector<3x32xf32> to vector<1x32xf32>
    %cst_83 = arith.constant dense<0.000000e+00> : vector<16xf32>
    %235 = vector.multi_reduction <add>, %228, %cst_83 [1] : vector<16x32xf32> to vector<16xf32>
    %236 = vector.shape_cast %235 : vector<16xf32> to vector<16x1xf32>
    %cst_84 = arith.constant 3.200000e+01 : f32
    %237 = vector.broadcast %cst_84 : f32 to vector<16x1xf32>
    %238 = arith.divf %236, %237 : vector<16x1xf32>
    %239 = vector.broadcast %238 : vector<16x1xf32> to vector<16x32xf32>
    %240 = arith.subf %228, %239 : vector<16x32xf32>
    %241 = arith.mulf %240, %240 : vector<16x32xf32>
    %cst_85 = arith.constant dense<0.000000e+00> : vector<16xf32>
    %242 = vector.multi_reduction <add>, %241, %cst_85 [1] : vector<16x32xf32> to vector<16xf32>
    %243 = vector.shape_cast %242 : vector<16xf32> to vector<16x1xf32>
    %cst_86 = arith.constant 3.200000e+01 : f32
    %244 = vector.broadcast %cst_86 : f32 to vector<16x1xf32>
    %245 = arith.divf %243, %244 : vector<16x1xf32>
    %246 = vector.broadcast %238 : vector<16x1xf32> to vector<16x32xf32>
    %247 = arith.subf %228, %246 : vector<16x32xf32>
    %cst_87 = arith.constant 9.99999974E-6 : f32
    %248 = vector.broadcast %cst_87 : f32 to vector<16x1xf32>
    %249 = arith.addf %245, %248 : vector<16x1xf32>
    %250 = math.rsqrt %249 : vector<16x1xf32>
    %251 = vector.broadcast %250 : vector<16x1xf32> to vector<16x32xf32>
    %252 = arith.mulf %247, %251 : vector<16x32xf32>
    %253 = vector.broadcast %231 : vector<1x32xf32> to vector<16x32xf32>
    %254 = arith.mulf %252, %253 : vector<16x32xf32>
    %255 = vector.broadcast %234 : vector<1x32xf32> to vector<16x32xf32>
    %256 = arith.addf %254, %255 : vector<16x32xf32>
    %c0_88 = arith.constant 0 : index
    %c0_89 = arith.constant 0 : index
    %c0_90 = arith.constant 0 : index
    %257 = vector.load %arg12[%c0_88, %c0_89, %c0_90] : memref<2x32x96xf32, #tpu.memory_space<vmem>>, vector<1x32x96xf32>
    %258 = vector.shape_cast %257 : vector<1x32x96xf32> to vector<32x96xf32>
    %c0_91 = arith.constant 0 : index
    %c0_92 = arith.constant 0 : index
    %259 = vector.load %arg13[%c0_91, %c0_92] : memref<2x96xf32, #tpu.memory_space<vmem>>, vector<1x96xf32>
    %c0_93 = arith.constant 0 : index
    %c0_94 = arith.constant 0 : index
    %c0_95 = arith.constant 0 : index
    %260 = vector.load %arg14[%c0_93, %c0_94, %c0_95] : memref<2x32x32xf32, #tpu.memory_space<vmem>>, vector<1x32x32xf32>
    %261 = vector.shape_cast %260 : vector<1x32x32xf32> to vector<32x32xf32>
    %c0_96 = arith.constant 0 : index
    %c0_97 = arith.constant 0 : index
    %262 = vector.load %arg15[%c0_96, %c0_97] : memref<2x32xf32, #tpu.memory_space<vmem>>, vector<1x32xf32>
    %263 = vector.extract_strided_slice %258 {offsets = [0, 0], sizes = [32, 32], strides = [1, 1]} : vector<32x96xf32> to vector<32x32xf32>
    %cst_98 = arith.constant dense<0.000000e+00> : vector<16x32xf32>
    %264 = tpu.matmul %256, %263, %cst_98 {dimension_numbers = #tpu.dot_dimension_numbers<[1], [0], [0], [1], [0, 0, 1, 1], [], []>} : vector<16x32xf32>, vector<32x32xf32>, vector<16x32xf32> -> vector<16x32xf32>
    %265 = vector.extract_strided_slice %259 {offsets = [0, 0], sizes = [1, 32], strides = [1, 1]} : vector<1x96xf32> to vector<1x32xf32>
    %266 = vector.broadcast %265 : vector<1x32xf32> to vector<16x32xf32>
    %267 = arith.addf %264, %266 : vector<16x32xf32>
    %268 = vector.extract_strided_slice %258 {offsets = [0, 32], sizes = [32, 64], strides = [1, 1]} : vector<32x96xf32> to vector<32x64xf32>
    %cst_99 = arith.constant dense<0.000000e+00> : vector<16x64xf32>
    %269 = tpu.matmul %16, %268, %cst_99 {dimension_numbers = #tpu.dot_dimension_numbers<[1], [0], [0], [1], [0, 0, 1, 1], [], []>} : vector<16x32xf32>, vector<32x64xf32>, vector<16x64xf32> -> vector<16x64xf32>
    %270 = vector.extract_strided_slice %259 {offsets = [0, 32], sizes = [1, 64], strides = [1, 1]} : vector<1x96xf32> to vector<1x64xf32>
    %271 = vector.broadcast %270 : vector<1x64xf32> to vector<16x64xf32>
    %272 = arith.addf %269, %271 : vector<16x64xf32>
    %273 = vector.extract_strided_slice %272 {offsets = [0, 0], sizes = [16, 32], strides = [1, 1]} : vector<16x64xf32> to vector<16x32xf32>
    %274 = vector.extract_strided_slice %272 {offsets = [0, 32], sizes = [16, 32], strides = [1, 1]} : vector<16x64xf32> to vector<16x32xf32>
    %275 = vector.extract_strided_slice %267 {offsets = [0, 0], sizes = [8, 32], strides = [1, 1]} : vector<16x32xf32> to vector<8x32xf32>
    %276 = vector.extract_strided_slice %273 {offsets = [0, 0], sizes = [8, 32], strides = [1, 1]} : vector<16x32xf32> to vector<8x32xf32>
    %277 = vector.extract_strided_slice %274 {offsets = [0, 0], sizes = [8, 32], strides = [1, 1]} : vector<16x32xf32> to vector<8x32xf32>
    %278 = vector.extract_strided_slice %275 {offsets = [0, 0], sizes = [8, 8], strides = [1, 1]} : vector<8x32xf32> to vector<8x8xf32>
    %279 = vector.extract_strided_slice %276 {offsets = [0, 0], sizes = [8, 8], strides = [1, 1]} : vector<8x32xf32> to vector<8x8xf32>
    %280 = vector.extract_strided_slice %277 {offsets = [0, 0], sizes = [8, 8], strides = [1, 1]} : vector<8x32xf32> to vector<8x8xf32>
    %281 = tpu.transpose %279, [1, 0] : vector<8x8xf32> -> vector<8x8xf32>
    %cst_100 = arith.constant dense<0.000000e+00> : vector<8x8xf32>
    %282 = tpu.matmul %278, %281, %cst_100 {dimension_numbers = #tpu.dot_dimension_numbers<[1], [0], [0], [1], [0, 0, 1, 1], [], []>} : vector<8x8xf32>, vector<8x8xf32>, vector<8x8xf32> -> vector<8x8xf32>
    %cst_101 = arith.constant 0.353553385 : f32
    %283 = vector.broadcast %cst_101 : f32 to vector<8x8xf32>
    %284 = arith.mulf %282, %283 : vector<8x8xf32>
    %cst_102 = arith.constant dense<0xFF800000> : vector<8xf32>
    %285 = vector.multi_reduction <maximumf>, %284, %cst_102 [1] : vector<8x8xf32> to vector<8xf32>
    %286 = vector.shape_cast %285 : vector<8xf32> to vector<8x1xf32>
    %287 = vector.broadcast %286 : vector<8x1xf32> to vector<8x8xf32>
    %288 = arith.subf %284, %287 : vector<8x8xf32>
    %289 = math.exp %288 : vector<8x8xf32>
    %cst_103 = arith.constant dense<0.000000e+00> : vector<8xf32>
    %290 = vector.multi_reduction <add>, %289, %cst_103 [1] : vector<8x8xf32> to vector<8xf32>
    %291 = vector.shape_cast %290 : vector<8xf32> to vector<8x1xf32>
    %292 = tpu.reciprocal %291 {approx = true} : vector<8x1xf32> -> vector<8x1xf32>
    %293 = vector.broadcast %292 : vector<8x1xf32> to vector<8x8xf32>
    %294 = arith.mulf %289, %293 : vector<8x8xf32>
    %cst_104 = arith.constant dense<0.000000e+00> : vector<8x8xf32>
    %295 = tpu.matmul %294, %280, %cst_104 {dimension_numbers = #tpu.dot_dimension_numbers<[1], [0], [0], [1], [0, 0, 1, 1], [], []>} : vector<8x8xf32>, vector<8x8xf32>, vector<8x8xf32> -> vector<8x8xf32>
    %296 = vector.extract_strided_slice %261 {offsets = [0, 0], sizes = [8, 32], strides = [1, 1]} : vector<32x32xf32> to vector<8x32xf32>
    %cst_105 = arith.constant dense<0.000000e+00> : vector<8x32xf32>
    %297 = tpu.matmul %295, %296, %cst_105 {dimension_numbers = #tpu.dot_dimension_numbers<[1], [0], [0], [1], [0, 0, 1, 1], [], []>} : vector<8x8xf32>, vector<8x32xf32>, vector<8x32xf32> -> vector<8x32xf32>
    %298 = vector.extract_strided_slice %275 {offsets = [0, 8], sizes = [8, 8], strides = [1, 1]} : vector<8x32xf32> to vector<8x8xf32>
    %299 = vector.extract_strided_slice %276 {offsets = [0, 8], sizes = [8, 8], strides = [1, 1]} : vector<8x32xf32> to vector<8x8xf32>
    %300 = vector.extract_strided_slice %277 {offsets = [0, 8], sizes = [8, 8], strides = [1, 1]} : vector<8x32xf32> to vector<8x8xf32>
    %301 = tpu.transpose %299, [1, 0] : vector<8x8xf32> -> vector<8x8xf32>
    %cst_106 = arith.constant dense<0.000000e+00> : vector<8x8xf32>
    %302 = tpu.matmul %298, %301, %cst_106 {dimension_numbers = #tpu.dot_dimension_numbers<[1], [0], [0], [1], [0, 0, 1, 1], [], []>} : vector<8x8xf32>, vector<8x8xf32>, vector<8x8xf32> -> vector<8x8xf32>
    %cst_107 = arith.constant 0.353553385 : f32
    %303 = vector.broadcast %cst_107 : f32 to vector<8x8xf32>
    %304 = arith.mulf %302, %303 : vector<8x8xf32>
    %cst_108 = arith.constant dense<0xFF800000> : vector<8xf32>
    %305 = vector.multi_reduction <maximumf>, %304, %cst_108 [1] : vector<8x8xf32> to vector<8xf32>
    %306 = vector.shape_cast %305 : vector<8xf32> to vector<8x1xf32>
    %307 = vector.broadcast %306 : vector<8x1xf32> to vector<8x8xf32>
    %308 = arith.subf %304, %307 : vector<8x8xf32>
    %309 = math.exp %308 : vector<8x8xf32>
    %cst_109 = arith.constant dense<0.000000e+00> : vector<8xf32>
    %310 = vector.multi_reduction <add>, %309, %cst_109 [1] : vector<8x8xf32> to vector<8xf32>
    %311 = vector.shape_cast %310 : vector<8xf32> to vector<8x1xf32>
    %312 = tpu.reciprocal %311 {approx = true} : vector<8x1xf32> -> vector<8x1xf32>
    %313 = vector.broadcast %312 : vector<8x1xf32> to vector<8x8xf32>
    %314 = arith.mulf %309, %313 : vector<8x8xf32>
    %cst_110 = arith.constant dense<0.000000e+00> : vector<8x8xf32>
    %315 = tpu.matmul %314, %300, %cst_110 {dimension_numbers = #tpu.dot_dimension_numbers<[1], [0], [0], [1], [0, 0, 1, 1], [], []>} : vector<8x8xf32>, vector<8x8xf32>, vector<8x8xf32> -> vector<8x8xf32>
    %316 = vector.extract_strided_slice %261 {offsets = [8, 0], sizes = [8, 32], strides = [1, 1]} : vector<32x32xf32> to vector<8x32xf32>
    %cst_111 = arith.constant dense<0.000000e+00> : vector<8x32xf32>
    %317 = tpu.matmul %315, %316, %cst_111 {dimension_numbers = #tpu.dot_dimension_numbers<[1], [0], [0], [1], [0, 0, 1, 1], [], []>} : vector<8x8xf32>, vector<8x32xf32>, vector<8x32xf32> -> vector<8x32xf32>
    %318 = arith.addf %297, %317 : vector<8x32xf32>
    %319 = vector.extract_strided_slice %275 {offsets = [0, 16], sizes = [8, 8], strides = [1, 1]} : vector<8x32xf32> to vector<8x8xf32>
    %320 = vector.extract_strided_slice %276 {offsets = [0, 16], sizes = [8, 8], strides = [1, 1]} : vector<8x32xf32> to vector<8x8xf32>
    %321 = vector.extract_strided_slice %277 {offsets = [0, 16], sizes = [8, 8], strides = [1, 1]} : vector<8x32xf32> to vector<8x8xf32>
    %322 = tpu.transpose %320, [1, 0] : vector<8x8xf32> -> vector<8x8xf32>
    %cst_112 = arith.constant dense<0.000000e+00> : vector<8x8xf32>
    %323 = tpu.matmul %319, %322, %cst_112 {dimension_numbers = #tpu.dot_dimension_numbers<[1], [0], [0], [1], [0, 0, 1, 1], [], []>} : vector<8x8xf32>, vector<8x8xf32>, vector<8x8xf32> -> vector<8x8xf32>
    %cst_113 = arith.constant 0.353553385 : f32
    %324 = vector.broadcast %cst_113 : f32 to vector<8x8xf32>
    %325 = arith.mulf %323, %324 : vector<8x8xf32>
    %cst_114 = arith.constant dense<0xFF800000> : vector<8xf32>
    %326 = vector.multi_reduction <maximumf>, %325, %cst_114 [1] : vector<8x8xf32> to vector<8xf32>
    %327 = vector.shape_cast %326 : vector<8xf32> to vector<8x1xf32>
    %328 = vector.broadcast %327 : vector<8x1xf32> to vector<8x8xf32>
    %329 = arith.subf %325, %328 : vector<8x8xf32>
    %330 = math.exp %329 : vector<8x8xf32>
    %cst_115 = arith.constant dense<0.000000e+00> : vector<8xf32>
    %331 = vector.multi_reduction <add>, %330, %cst_115 [1] : vector<8x8xf32> to vector<8xf32>
    %332 = vector.shape_cast %331 : vector<8xf32> to vector<8x1xf32>
    %333 = tpu.reciprocal %332 {approx = true} : vector<8x1xf32> -> vector<8x1xf32>
    %334 = vector.broadcast %333 : vector<8x1xf32> to vector<8x8xf32>
    %335 = arith.mulf %330, %334 : vector<8x8xf32>
    %cst_116 = arith.constant dense<0.000000e+00> : vector<8x8xf32>
    %336 = tpu.matmul %335, %321, %cst_116 {dimension_numbers = #tpu.dot_dimension_numbers<[1], [0], [0], [1], [0, 0, 1, 1], [], []>} : vector<8x8xf32>, vector<8x8xf32>, vector<8x8xf32> -> vector<8x8xf32>
    %337 = vector.extract_strided_slice %261 {offsets = [16, 0], sizes = [8, 32], strides = [1, 1]} : vector<32x32xf32> to vector<8x32xf32>
    %cst_117 = arith.constant dense<0.000000e+00> : vector<8x32xf32>
    %338 = tpu.matmul %336, %337, %cst_117 {dimension_numbers = #tpu.dot_dimension_numbers<[1], [0], [0], [1], [0, 0, 1, 1], [], []>} : vector<8x8xf32>, vector<8x32xf32>, vector<8x32xf32> -> vector<8x32xf32>
    %339 = arith.addf %318, %338 : vector<8x32xf32>
    %340 = vector.extract_strided_slice %275 {offsets = [0, 24], sizes = [8, 8], strides = [1, 1]} : vector<8x32xf32> to vector<8x8xf32>
    %341 = vector.extract_strided_slice %276 {offsets = [0, 24], sizes = [8, 8], strides = [1, 1]} : vector<8x32xf32> to vector<8x8xf32>
    %342 = vector.extract_strided_slice %277 {offsets = [0, 24], sizes = [8, 8], strides = [1, 1]} : vector<8x32xf32> to vector<8x8xf32>
    %343 = tpu.transpose %341, [1, 0] : vector<8x8xf32> -> vector<8x8xf32>
    %cst_118 = arith.constant dense<0.000000e+00> : vector<8x8xf32>
    %344 = tpu.matmul %340, %343, %cst_118 {dimension_numbers = #tpu.dot_dimension_numbers<[1], [0], [0], [1], [0, 0, 1, 1], [], []>} : vector<8x8xf32>, vector<8x8xf32>, vector<8x8xf32> -> vector<8x8xf32>
    %cst_119 = arith.constant 0.353553385 : f32
    %345 = vector.broadcast %cst_119 : f32 to vector<8x8xf32>
    %346 = arith.mulf %344, %345 : vector<8x8xf32>
    %cst_120 = arith.constant dense<0xFF800000> : vector<8xf32>
    %347 = vector.multi_reduction <maximumf>, %346, %cst_120 [1] : vector<8x8xf32> to vector<8xf32>
    %348 = vector.shape_cast %347 : vector<8xf32> to vector<8x1xf32>
    %349 = vector.broadcast %348 : vector<8x1xf32> to vector<8x8xf32>
    %350 = arith.subf %346, %349 : vector<8x8xf32>
    %351 = math.exp %350 : vector<8x8xf32>
    %cst_121 = arith.constant dense<0.000000e+00> : vector<8xf32>
    %352 = vector.multi_reduction <add>, %351, %cst_121 [1] : vector<8x8xf32> to vector<8xf32>
    %353 = vector.shape_cast %352 : vector<8xf32> to vector<8x1xf32>
    %354 = tpu.reciprocal %353 {approx = true} : vector<8x1xf32> -> vector<8x1xf32>
    %355 = vector.broadcast %354 : vector<8x1xf32> to vector<8x8xf32>
    %356 = arith.mulf %351, %355 : vector<8x8xf32>
    %cst_122 = arith.constant dense<0.000000e+00> : vector<8x8xf32>
    %357 = tpu.matmul %356, %342, %cst_122 {dimension_numbers = #tpu.dot_dimension_numbers<[1], [0], [0], [1], [0, 0, 1, 1], [], []>} : vector<8x8xf32>, vector<8x8xf32>, vector<8x8xf32> -> vector<8x8xf32>
    %358 = vector.extract_strided_slice %261 {offsets = [24, 0], sizes = [8, 32], strides = [1, 1]} : vector<32x32xf32> to vector<8x32xf32>
    %cst_123 = arith.constant dense<0.000000e+00> : vector<8x32xf32>
    %359 = tpu.matmul %357, %358, %cst_123 {dimension_numbers = #tpu.dot_dimension_numbers<[1], [0], [0], [1], [0, 0, 1, 1], [], []>} : vector<8x8xf32>, vector<8x32xf32>, vector<8x32xf32> -> vector<8x32xf32>
    %360 = arith.addf %339, %359 : vector<8x32xf32>
    %361 = vector.extract_strided_slice %267 {offsets = [8, 0], sizes = [8, 32], strides = [1, 1]} : vector<16x32xf32> to vector<8x32xf32>
    %362 = vector.extract_strided_slice %273 {offsets = [8, 0], sizes = [8, 32], strides = [1, 1]} : vector<16x32xf32> to vector<8x32xf32>
    %363 = vector.extract_strided_slice %274 {offsets = [8, 0], sizes = [8, 32], strides = [1, 1]} : vector<16x32xf32> to vector<8x32xf32>
    %364 = vector.extract_strided_slice %361 {offsets = [0, 0], sizes = [8, 8], strides = [1, 1]} : vector<8x32xf32> to vector<8x8xf32>
    %365 = vector.extract_strided_slice %362 {offsets = [0, 0], sizes = [8, 8], strides = [1, 1]} : vector<8x32xf32> to vector<8x8xf32>
    %366 = vector.extract_strided_slice %363 {offsets = [0, 0], sizes = [8, 8], strides = [1, 1]} : vector<8x32xf32> to vector<8x8xf32>
    %367 = tpu.transpose %365, [1, 0] : vector<8x8xf32> -> vector<8x8xf32>
    %cst_124 = arith.constant dense<0.000000e+00> : vector<8x8xf32>
    %368 = tpu.matmul %364, %367, %cst_124 {dimension_numbers = #tpu.dot_dimension_numbers<[1], [0], [0], [1], [0, 0, 1, 1], [], []>} : vector<8x8xf32>, vector<8x8xf32>, vector<8x8xf32> -> vector<8x8xf32>
    %cst_125 = arith.constant 0.353553385 : f32
    %369 = vector.broadcast %cst_125 : f32 to vector<8x8xf32>
    %370 = arith.mulf %368, %369 : vector<8x8xf32>
    %cst_126 = arith.constant dense<0xFF800000> : vector<8xf32>
    %371 = vector.multi_reduction <maximumf>, %370, %cst_126 [1] : vector<8x8xf32> to vector<8xf32>
    %372 = vector.shape_cast %371 : vector<8xf32> to vector<8x1xf32>
    %373 = vector.broadcast %372 : vector<8x1xf32> to vector<8x8xf32>
    %374 = arith.subf %370, %373 : vector<8x8xf32>
    %375 = math.exp %374 : vector<8x8xf32>
    %cst_127 = arith.constant dense<0.000000e+00> : vector<8xf32>
    %376 = vector.multi_reduction <add>, %375, %cst_127 [1] : vector<8x8xf32> to vector<8xf32>
    %377 = vector.shape_cast %376 : vector<8xf32> to vector<8x1xf32>
    %378 = tpu.reciprocal %377 {approx = true} : vector<8x1xf32> -> vector<8x1xf32>
    %379 = vector.broadcast %378 : vector<8x1xf32> to vector<8x8xf32>
    %380 = arith.mulf %375, %379 : vector<8x8xf32>
    %cst_128 = arith.constant dense<0.000000e+00> : vector<8x8xf32>
    %381 = tpu.matmul %380, %366, %cst_128 {dimension_numbers = #tpu.dot_dimension_numbers<[1], [0], [0], [1], [0, 0, 1, 1], [], []>} : vector<8x8xf32>, vector<8x8xf32>, vector<8x8xf32> -> vector<8x8xf32>
    %382 = vector.extract_strided_slice %261 {offsets = [0, 0], sizes = [8, 32], strides = [1, 1]} : vector<32x32xf32> to vector<8x32xf32>
    %cst_129 = arith.constant dense<0.000000e+00> : vector<8x32xf32>
    %383 = tpu.matmul %381, %382, %cst_129 {dimension_numbers = #tpu.dot_dimension_numbers<[1], [0], [0], [1], [0, 0, 1, 1], [], []>} : vector<8x8xf32>, vector<8x32xf32>, vector<8x32xf32> -> vector<8x32xf32>
    %384 = vector.extract_strided_slice %361 {offsets = [0, 8], sizes = [8, 8], strides = [1, 1]} : vector<8x32xf32> to vector<8x8xf32>
    %385 = vector.extract_strided_slice %362 {offsets = [0, 8], sizes = [8, 8], strides = [1, 1]} : vector<8x32xf32> to vector<8x8xf32>
    %386 = vector.extract_strided_slice %363 {offsets = [0, 8], sizes = [8, 8], strides = [1, 1]} : vector<8x32xf32> to vector<8x8xf32>
    %387 = tpu.transpose %385, [1, 0] : vector<8x8xf32> -> vector<8x8xf32>
    %cst_130 = arith.constant dense<0.000000e+00> : vector<8x8xf32>
    %388 = tpu.matmul %384, %387, %cst_130 {dimension_numbers = #tpu.dot_dimension_numbers<[1], [0], [0], [1], [0, 0, 1, 1], [], []>} : vector<8x8xf32>, vector<8x8xf32>, vector<8x8xf32> -> vector<8x8xf32>
    %cst_131 = arith.constant 0.353553385 : f32
    %389 = vector.broadcast %cst_131 : f32 to vector<8x8xf32>
    %390 = arith.mulf %388, %389 : vector<8x8xf32>
    %cst_132 = arith.constant dense<0xFF800000> : vector<8xf32>
    %391 = vector.multi_reduction <maximumf>, %390, %cst_132 [1] : vector<8x8xf32> to vector<8xf32>
    %392 = vector.shape_cast %391 : vector<8xf32> to vector<8x1xf32>
    %393 = vector.broadcast %392 : vector<8x1xf32> to vector<8x8xf32>
    %394 = arith.subf %390, %393 : vector<8x8xf32>
    %395 = math.exp %394 : vector<8x8xf32>
    %cst_133 = arith.constant dense<0.000000e+00> : vector<8xf32>
    %396 = vector.multi_reduction <add>, %395, %cst_133 [1] : vector<8x8xf32> to vector<8xf32>
    %397 = vector.shape_cast %396 : vector<8xf32> to vector<8x1xf32>
    %398 = tpu.reciprocal %397 {approx = true} : vector<8x1xf32> -> vector<8x1xf32>
    %399 = vector.broadcast %398 : vector<8x1xf32> to vector<8x8xf32>
    %400 = arith.mulf %395, %399 : vector<8x8xf32>
    %cst_134 = arith.constant dense<0.000000e+00> : vector<8x8xf32>
    %401 = tpu.matmul %400, %386, %cst_134 {dimension_numbers = #tpu.dot_dimension_numbers<[1], [0], [0], [1], [0, 0, 1, 1], [], []>} : vector<8x8xf32>, vector<8x8xf32>, vector<8x8xf32> -> vector<8x8xf32>
    %402 = vector.extract_strided_slice %261 {offsets = [8, 0], sizes = [8, 32], strides = [1, 1]} : vector<32x32xf32> to vector<8x32xf32>
    %cst_135 = arith.constant dense<0.000000e+00> : vector<8x32xf32>
    %403 = tpu.matmul %401, %402, %cst_135 {dimension_numbers = #tpu.dot_dimension_numbers<[1], [0], [0], [1], [0, 0, 1, 1], [], []>} : vector<8x8xf32>, vector<8x32xf32>, vector<8x32xf32> -> vector<8x32xf32>
    %404 = arith.addf %383, %403 : vector<8x32xf32>
    %405 = vector.extract_strided_slice %361 {offsets = [0, 16], sizes = [8, 8], strides = [1, 1]} : vector<8x32xf32> to vector<8x8xf32>
    %406 = vector.extract_strided_slice %362 {offsets = [0, 16], sizes = [8, 8], strides = [1, 1]} : vector<8x32xf32> to vector<8x8xf32>
    %407 = vector.extract_strided_slice %363 {offsets = [0, 16], sizes = [8, 8], strides = [1, 1]} : vector<8x32xf32> to vector<8x8xf32>
    %408 = tpu.transpose %406, [1, 0] : vector<8x8xf32> -> vector<8x8xf32>
    %cst_136 = arith.constant dense<0.000000e+00> : vector<8x8xf32>
    %409 = tpu.matmul %405, %408, %cst_136 {dimension_numbers = #tpu.dot_dimension_numbers<[1], [0], [0], [1], [0, 0, 1, 1], [], []>} : vector<8x8xf32>, vector<8x8xf32>, vector<8x8xf32> -> vector<8x8xf32>
    %cst_137 = arith.constant 0.353553385 : f32
    %410 = vector.broadcast %cst_137 : f32 to vector<8x8xf32>
    %411 = arith.mulf %409, %410 : vector<8x8xf32>
    %cst_138 = arith.constant dense<0xFF800000> : vector<8xf32>
    %412 = vector.multi_reduction <maximumf>, %411, %cst_138 [1] : vector<8x8xf32> to vector<8xf32>
    %413 = vector.shape_cast %412 : vector<8xf32> to vector<8x1xf32>
    %414 = vector.broadcast %413 : vector<8x1xf32> to vector<8x8xf32>
    %415 = arith.subf %411, %414 : vector<8x8xf32>
    %416 = math.exp %415 : vector<8x8xf32>
    %cst_139 = arith.constant dense<0.000000e+00> : vector<8xf32>
    %417 = vector.multi_reduction <add>, %416, %cst_139 [1] : vector<8x8xf32> to vector<8xf32>
    %418 = vector.shape_cast %417 : vector<8xf32> to vector<8x1xf32>
    %419 = tpu.reciprocal %418 {approx = true} : vector<8x1xf32> -> vector<8x1xf32>
    %420 = vector.broadcast %419 : vector<8x1xf32> to vector<8x8xf32>
    %421 = arith.mulf %416, %420 : vector<8x8xf32>
    %cst_140 = arith.constant dense<0.000000e+00> : vector<8x8xf32>
    %422 = tpu.matmul %421, %407, %cst_140 {dimension_numbers = #tpu.dot_dimension_numbers<[1], [0], [0], [1], [0, 0, 1, 1], [], []>} : vector<8x8xf32>, vector<8x8xf32>, vector<8x8xf32> -> vector<8x8xf32>
    %423 = vector.extract_strided_slice %261 {offsets = [16, 0], sizes = [8, 32], strides = [1, 1]} : vector<32x32xf32> to vector<8x32xf32>
    %cst_141 = arith.constant dense<0.000000e+00> : vector<8x32xf32>
    %424 = tpu.matmul %422, %423, %cst_141 {dimension_numbers = #tpu.dot_dimension_numbers<[1], [0], [0], [1], [0, 0, 1, 1], [], []>} : vector<8x8xf32>, vector<8x32xf32>, vector<8x32xf32> -> vector<8x32xf32>
    %425 = arith.addf %404, %424 : vector<8x32xf32>
    %426 = vector.extract_strided_slice %361 {offsets = [0, 24], sizes = [8, 8], strides = [1, 1]} : vector<8x32xf32> to vector<8x8xf32>
    %427 = vector.extract_strided_slice %362 {offsets = [0, 24], sizes = [8, 8], strides = [1, 1]} : vector<8x32xf32> to vector<8x8xf32>
    %428 = vector.extract_strided_slice %363 {offsets = [0, 24], sizes = [8, 8], strides = [1, 1]} : vector<8x32xf32> to vector<8x8xf32>
    %429 = tpu.transpose %427, [1, 0] : vector<8x8xf32> -> vector<8x8xf32>
    %cst_142 = arith.constant dense<0.000000e+00> : vector<8x8xf32>
    %430 = tpu.matmul %426, %429, %cst_142 {dimension_numbers = #tpu.dot_dimension_numbers<[1], [0], [0], [1], [0, 0, 1, 1], [], []>} : vector<8x8xf32>, vector<8x8xf32>, vector<8x8xf32> -> vector<8x8xf32>
    %cst_143 = arith.constant 0.353553385 : f32
    %431 = vector.broadcast %cst_143 : f32 to vector<8x8xf32>
    %432 = arith.mulf %430, %431 : vector<8x8xf32>
    %cst_144 = arith.constant dense<0xFF800000> : vector<8xf32>
    %433 = vector.multi_reduction <maximumf>, %432, %cst_144 [1] : vector<8x8xf32> to vector<8xf32>
    %434 = vector.shape_cast %433 : vector<8xf32> to vector<8x1xf32>
    %435 = vector.broadcast %434 : vector<8x1xf32> to vector<8x8xf32>
    %436 = arith.subf %432, %435 : vector<8x8xf32>
    %437 = math.exp %436 : vector<8x8xf32>
    %cst_145 = arith.constant dense<0.000000e+00> : vector<8xf32>
    %438 = vector.multi_reduction <add>, %437, %cst_145 [1] : vector<8x8xf32> to vector<8xf32>
    %439 = vector.shape_cast %438 : vector<8xf32> to vector<8x1xf32>
    %440 = tpu.reciprocal %439 {approx = true} : vector<8x1xf32> -> vector<8x1xf32>
    %441 = vector.broadcast %440 : vector<8x1xf32> to vector<8x8xf32>
    %442 = arith.mulf %437, %441 : vector<8x8xf32>
    %cst_146 = arith.constant dense<0.000000e+00> : vector<8x8xf32>
    %443 = tpu.matmul %442, %428, %cst_146 {dimension_numbers = #tpu.dot_dimension_numbers<[1], [0], [0], [1], [0, 0, 1, 1], [], []>} : vector<8x8xf32>, vector<8x8xf32>, vector<8x8xf32> -> vector<8x8xf32>
    %444 = vector.extract_strided_slice %261 {offsets = [24, 0], sizes = [8, 32], strides = [1, 1]} : vector<32x32xf32> to vector<8x32xf32>
    %cst_147 = arith.constant dense<0.000000e+00> : vector<8x32xf32>
    %445 = tpu.matmul %443, %444, %cst_147 {dimension_numbers = #tpu.dot_dimension_numbers<[1], [0], [0], [1], [0, 0, 1, 1], [], []>} : vector<8x8xf32>, vector<8x32xf32>, vector<8x32xf32> -> vector<8x32xf32>
    %446 = arith.addf %425, %445 : vector<8x32xf32>
    %447 = tpu.concatenate %360, %446 in 0 : vector<8x32xf32>, vector<8x32xf32> -> vector<16x32xf32>
    %448 = vector.broadcast %262 : vector<1x32xf32> to vector<16x32xf32>
    %449 = arith.addf %447, %448 : vector<16x32xf32>
    %450 = arith.addf %256, %449 : vector<16x32xf32>
    %c0_148 = arith.constant 0 : index
    %c0_149 = arith.constant 0 : index
    %c0_150 = arith.constant 0 : index
    %451 = vector.load %arg20[%c0_148, %c0_149, %c0_150] : memref<2x3x32xf32, #tpu.memory_space<vmem>>, vector<1x3x32xf32>
    %452 = vector.shape_cast %451 : vector<1x3x32xf32> to vector<3x32xf32>
    %453 = vector.extract_strided_slice %452 {offsets = [1, 0], sizes = [1, 32], strides = [1, 1]} : vector<3x32xf32> to vector<1x32xf32>
    %c0_151 = arith.constant 0 : index
    %c0_152 = arith.constant 0 : index
    %c0_153 = arith.constant 0 : index
    %454 = vector.load %arg21[%c0_151, %c0_152, %c0_153] : memref<2x3x32xf32, #tpu.memory_space<vmem>>, vector<1x3x32xf32>
    %455 = vector.shape_cast %454 : vector<1x3x32xf32> to vector<3x32xf32>
    %456 = vector.extract_strided_slice %455 {offsets = [1, 0], sizes = [1, 32], strides = [1, 1]} : vector<3x32xf32> to vector<1x32xf32>
    %cst_154 = arith.constant dense<0.000000e+00> : vector<16xf32>
    %457 = vector.multi_reduction <add>, %450, %cst_154 [1] : vector<16x32xf32> to vector<16xf32>
    %458 = vector.shape_cast %457 : vector<16xf32> to vector<16x1xf32>
    %cst_155 = arith.constant 3.200000e+01 : f32
    %459 = vector.broadcast %cst_155 : f32 to vector<16x1xf32>
    %460 = arith.divf %458, %459 : vector<16x1xf32>
    %461 = vector.broadcast %460 : vector<16x1xf32> to vector<16x32xf32>
    %462 = arith.subf %450, %461 : vector<16x32xf32>
    %463 = arith.mulf %462, %462 : vector<16x32xf32>
    %cst_156 = arith.constant dense<0.000000e+00> : vector<16xf32>
    %464 = vector.multi_reduction <add>, %463, %cst_156 [1] : vector<16x32xf32> to vector<16xf32>
    %465 = vector.shape_cast %464 : vector<16xf32> to vector<16x1xf32>
    %cst_157 = arith.constant 3.200000e+01 : f32
    %466 = vector.broadcast %cst_157 : f32 to vector<16x1xf32>
    %467 = arith.divf %465, %466 : vector<16x1xf32>
    %468 = vector.broadcast %460 : vector<16x1xf32> to vector<16x32xf32>
    %469 = arith.subf %450, %468 : vector<16x32xf32>
    %cst_158 = arith.constant 9.99999974E-6 : f32
    %470 = vector.broadcast %cst_158 : f32 to vector<16x1xf32>
    %471 = arith.addf %467, %470 : vector<16x1xf32>
    %472 = math.rsqrt %471 : vector<16x1xf32>
    %473 = vector.broadcast %472 : vector<16x1xf32> to vector<16x32xf32>
    %474 = arith.mulf %469, %473 : vector<16x32xf32>
    %475 = vector.broadcast %453 : vector<1x32xf32> to vector<16x32xf32>
    %476 = arith.mulf %474, %475 : vector<16x32xf32>
    %477 = vector.broadcast %456 : vector<1x32xf32> to vector<16x32xf32>
    %478 = arith.addf %476, %477 : vector<16x32xf32>
    %c0_159 = arith.constant 0 : index
    %c0_160 = arith.constant 0 : index
    %c0_161 = arith.constant 0 : index
    %479 = vector.load %arg16[%c0_159, %c0_160, %c0_161] : memref<2x32x64xf32, #tpu.memory_space<vmem>>, vector<1x32x64xf32>
    %480 = vector.shape_cast %479 : vector<1x32x64xf32> to vector<32x64xf32>
    %cst_162 = arith.constant dense<0.000000e+00> : vector<16x64xf32>
    %481 = tpu.matmul %478, %480, %cst_162 {dimension_numbers = #tpu.dot_dimension_numbers<[1], [0], [0], [1], [0, 0, 1, 1], [], []>} : vector<16x32xf32>, vector<32x64xf32>, vector<16x64xf32> -> vector<16x64xf32>
    %c0_163 = arith.constant 0 : index
    %c0_164 = arith.constant 0 : index
    %482 = vector.load %arg17[%c0_163, %c0_164] : memref<2x64xf32, #tpu.memory_space<vmem>>, vector<1x64xf32>
    %483 = vector.broadcast %482 : vector<1x64xf32> to vector<16x64xf32>
    %484 = arith.addf %481, %483 : vector<16x64xf32>
    %cst_165 = arith.constant 0.000000e+00 : f32
    %485 = vector.broadcast %cst_165 : f32 to vector<16x64xf32>
    %486 = arith.maximumf %484, %485 : vector<16x64xf32>
    %c0_166 = arith.constant 0 : index
    %c0_167 = arith.constant 0 : index
    %c0_168 = arith.constant 0 : index
    %487 = vector.load %arg18[%c0_166, %c0_167, %c0_168] : memref<2x64x32xf32, #tpu.memory_space<vmem>>, vector<1x64x32xf32>
    %488 = vector.shape_cast %487 : vector<1x64x32xf32> to vector<64x32xf32>
    %cst_169 = arith.constant dense<0.000000e+00> : vector<16x32xf32>
    %489 = tpu.matmul %486, %488, %cst_169 {dimension_numbers = #tpu.dot_dimension_numbers<[1], [0], [0], [1], [0, 0, 1, 1], [], []>} : vector<16x64xf32>, vector<64x32xf32>, vector<16x32xf32> -> vector<16x32xf32>
    %c0_170 = arith.constant 0 : index
    %c0_171 = arith.constant 0 : index
    %490 = vector.load %arg19[%c0_170, %c0_171] : memref<2x32xf32, #tpu.memory_space<vmem>>, vector<1x32xf32>
    %491 = vector.broadcast %490 : vector<1x32xf32> to vector<16x32xf32>
    %492 = arith.addf %489, %491 : vector<16x32xf32>
    %493 = arith.addf %478, %492 : vector<16x32xf32>
    %c0_172 = arith.constant 0 : index
    %c0_173 = arith.constant 0 : index
    %c0_174 = arith.constant 0 : index
    %494 = vector.load %arg20[%c0_172, %c0_173, %c0_174] : memref<2x3x32xf32, #tpu.memory_space<vmem>>, vector<1x3x32xf32>
    %495 = vector.shape_cast %494 : vector<1x3x32xf32> to vector<3x32xf32>
    %496 = vector.extract_strided_slice %495 {offsets = [2, 0], sizes = [1, 32], strides = [1, 1]} : vector<3x32xf32> to vector<1x32xf32>
    %c0_175 = arith.constant 0 : index
    %c0_176 = arith.constant 0 : index
    %c0_177 = arith.constant 0 : index
    %497 = vector.load %arg21[%c0_175, %c0_176, %c0_177] : memref<2x3x32xf32, #tpu.memory_space<vmem>>, vector<1x3x32xf32>
    %498 = vector.shape_cast %497 : vector<1x3x32xf32> to vector<3x32xf32>
    %499 = vector.extract_strided_slice %498 {offsets = [2, 0], sizes = [1, 32], strides = [1, 1]} : vector<3x32xf32> to vector<1x32xf32>
    %cst_178 = arith.constant dense<0.000000e+00> : vector<16xf32>
    %500 = vector.multi_reduction <add>, %493, %cst_178 [1] : vector<16x32xf32> to vector<16xf32>
    %501 = vector.shape_cast %500 : vector<16xf32> to vector<16x1xf32>
    %cst_179 = arith.constant 3.200000e+01 : f32
    %502 = vector.broadcast %cst_179 : f32 to vector<16x1xf32>
    %503 = arith.divf %501, %502 : vector<16x1xf32>
    %504 = vector.broadcast %503 : vector<16x1xf32> to vector<16x32xf32>
    %505 = arith.subf %493, %504 : vector<16x32xf32>
    %506 = arith.mulf %505, %505 : vector<16x32xf32>
    %cst_180 = arith.constant dense<0.000000e+00> : vector<16xf32>
    %507 = vector.multi_reduction <add>, %506, %cst_180 [1] : vector<16x32xf32> to vector<16xf32>
    %508 = vector.shape_cast %507 : vector<16xf32> to vector<16x1xf32>
    %cst_181 = arith.constant 3.200000e+01 : f32
    %509 = vector.broadcast %cst_181 : f32 to vector<16x1xf32>
    %510 = arith.divf %508, %509 : vector<16x1xf32>
    %511 = vector.broadcast %503 : vector<16x1xf32> to vector<16x32xf32>
    %512 = arith.subf %493, %511 : vector<16x32xf32>
    %cst_182 = arith.constant 9.99999974E-6 : f32
    %513 = vector.broadcast %cst_182 : f32 to vector<16x1xf32>
    %514 = arith.addf %510, %513 : vector<16x1xf32>
    %515 = math.rsqrt %514 : vector<16x1xf32>
    %516 = vector.broadcast %515 : vector<16x1xf32> to vector<16x32xf32>
    %517 = arith.mulf %512, %516 : vector<16x32xf32>
    %518 = vector.broadcast %496 : vector<1x32xf32> to vector<16x32xf32>
    %519 = arith.mulf %517, %518 : vector<16x32xf32>
    %520 = vector.broadcast %499 : vector<1x32xf32> to vector<16x32xf32>
    %521 = arith.addf %519, %520 : vector<16x32xf32>
    %c1 = arith.constant 1 : index
    %c0_183 = arith.constant 0 : index
    %c0_184 = arith.constant 0 : index
    %522 = vector.load %arg8[%c1, %c0_183, %c0_184] : memref<2x32x96xf32, #tpu.memory_space<vmem>>, vector<1x32x96xf32>
    %523 = vector.shape_cast %522 : vector<1x32x96xf32> to vector<32x96xf32>
    %c1_185 = arith.constant 1 : index
    %c0_186 = arith.constant 0 : index
    %524 = vector.load %arg9[%c1_185, %c0_186] : memref<2x96xf32, #tpu.memory_space<vmem>>, vector<1x96xf32>
    %c1_187 = arith.constant 1 : index
    %c0_188 = arith.constant 0 : index
    %c0_189 = arith.constant 0 : index
    %525 = vector.load %arg10[%c1_187, %c0_188, %c0_189] : memref<2x32x32xf32, #tpu.memory_space<vmem>>, vector<1x32x32xf32>
    %526 = vector.shape_cast %525 : vector<1x32x32xf32> to vector<32x32xf32>
    %c1_190 = arith.constant 1 : index
    %c0_191 = arith.constant 0 : index
    %527 = vector.load %arg11[%c1_190, %c0_191] : memref<2x32xf32, #tpu.memory_space<vmem>>, vector<1x32xf32>
    %cst_192 = arith.constant dense<0.000000e+00> : vector<16x96xf32>
    %528 = tpu.matmul %521, %523, %cst_192 {dimension_numbers = #tpu.dot_dimension_numbers<[1], [0], [0], [1], [0, 0, 1, 1], [], []>} : vector<16x32xf32>, vector<32x96xf32>, vector<16x96xf32> -> vector<16x96xf32>
    %529 = vector.broadcast %524 : vector<1x96xf32> to vector<16x96xf32>
    %530 = arith.addf %528, %529 : vector<16x96xf32>
    %531 = vector.extract_strided_slice %530 {offsets = [0, 0], sizes = [16, 32], strides = [1, 1]} : vector<16x96xf32> to vector<16x32xf32>
    %532 = vector.extract_strided_slice %530 {offsets = [0, 32], sizes = [16, 32], strides = [1, 1]} : vector<16x96xf32> to vector<16x32xf32>
    %533 = vector.extract_strided_slice %530 {offsets = [0, 64], sizes = [16, 32], strides = [1, 1]} : vector<16x96xf32> to vector<16x32xf32>
    %534 = vector.extract_strided_slice %531 {offsets = [0, 0], sizes = [8, 32], strides = [1, 1]} : vector<16x32xf32> to vector<8x32xf32>
    %535 = vector.extract_strided_slice %532 {offsets = [0, 0], sizes = [8, 32], strides = [1, 1]} : vector<16x32xf32> to vector<8x32xf32>
    %536 = vector.extract_strided_slice %533 {offsets = [0, 0], sizes = [8, 32], strides = [1, 1]} : vector<16x32xf32> to vector<8x32xf32>
    %537 = vector.extract_strided_slice %15 {offsets = [0, 0], sizes = [1, 8], strides = [1, 1]} : vector<2x8xi32> to vector<1x8xi32>
    %c0_i32_193 = arith.constant 0 : i32
    %538 = vector.broadcast %c0_i32_193 : i32 to vector<1x8xi32>
    %539 = arith.cmpi ne, %537, %538 : vector<1x8xi32>
    %cst_194 = arith.constant -1.000000e+09 : f32
    %cst_195 = arith.constant 0.000000e+00 : f32
    %540 = vector.broadcast %cst_194 : f32 to vector<1x8xf32>
    %541 = vector.broadcast %cst_195 : f32 to vector<1x8xf32>
    %542 = arith.select %539, %540, %541 : vector<1x8xi1>, vector<1x8xf32>
    %543 = vector.broadcast %542 : vector<1x8xf32> to vector<8x8xf32>
    %544 = arith.addf %14, %543 : vector<8x8xf32>
    %545 = vector.extract_strided_slice %534 {offsets = [0, 0], sizes = [8, 8], strides = [1, 1]} : vector<8x32xf32> to vector<8x8xf32>
    %546 = vector.extract_strided_slice %535 {offsets = [0, 0], sizes = [8, 8], strides = [1, 1]} : vector<8x32xf32> to vector<8x8xf32>
    %547 = vector.extract_strided_slice %536 {offsets = [0, 0], sizes = [8, 8], strides = [1, 1]} : vector<8x32xf32> to vector<8x8xf32>
    %548 = tpu.transpose %546, [1, 0] : vector<8x8xf32> -> vector<8x8xf32>
    %cst_196 = arith.constant dense<0.000000e+00> : vector<8x8xf32>
    %549 = tpu.matmul %545, %548, %cst_196 {dimension_numbers = #tpu.dot_dimension_numbers<[1], [0], [0], [1], [0, 0, 1, 1], [], []>} : vector<8x8xf32>, vector<8x8xf32>, vector<8x8xf32> -> vector<8x8xf32>
    %cst_197 = arith.constant 0.353553385 : f32
    %550 = vector.broadcast %cst_197 : f32 to vector<8x8xf32>
    %551 = arith.mulf %549, %550 : vector<8x8xf32>
    %552 = arith.addf %551, %544 : vector<8x8xf32>
    %cst_198 = arith.constant dense<0xFF800000> : vector<8xf32>
    %553 = vector.multi_reduction <maximumf>, %552, %cst_198 [1] : vector<8x8xf32> to vector<8xf32>
    %554 = vector.shape_cast %553 : vector<8xf32> to vector<8x1xf32>
    %555 = vector.broadcast %554 : vector<8x1xf32> to vector<8x8xf32>
    %556 = arith.subf %552, %555 : vector<8x8xf32>
    %557 = math.exp %556 : vector<8x8xf32>
    %cst_199 = arith.constant dense<0.000000e+00> : vector<8xf32>
    %558 = vector.multi_reduction <add>, %557, %cst_199 [1] : vector<8x8xf32> to vector<8xf32>
    %559 = vector.shape_cast %558 : vector<8xf32> to vector<8x1xf32>
    %560 = tpu.reciprocal %559 {approx = true} : vector<8x1xf32> -> vector<8x1xf32>
    %561 = vector.broadcast %560 : vector<8x1xf32> to vector<8x8xf32>
    %562 = arith.mulf %557, %561 : vector<8x8xf32>
    %cst_200 = arith.constant dense<0.000000e+00> : vector<8x8xf32>
    %563 = tpu.matmul %562, %547, %cst_200 {dimension_numbers = #tpu.dot_dimension_numbers<[1], [0], [0], [1], [0, 0, 1, 1], [], []>} : vector<8x8xf32>, vector<8x8xf32>, vector<8x8xf32> -> vector<8x8xf32>
    %564 = vector.extract_strided_slice %526 {offsets = [0, 0], sizes = [8, 32], strides = [1, 1]} : vector<32x32xf32> to vector<8x32xf32>
    %cst_201 = arith.constant dense<0.000000e+00> : vector<8x32xf32>
    %565 = tpu.matmul %563, %564, %cst_201 {dimension_numbers = #tpu.dot_dimension_numbers<[1], [0], [0], [1], [0, 0, 1, 1], [], []>} : vector<8x8xf32>, vector<8x32xf32>, vector<8x32xf32> -> vector<8x32xf32>
    %566 = vector.extract_strided_slice %534 {offsets = [0, 8], sizes = [8, 8], strides = [1, 1]} : vector<8x32xf32> to vector<8x8xf32>
    %567 = vector.extract_strided_slice %535 {offsets = [0, 8], sizes = [8, 8], strides = [1, 1]} : vector<8x32xf32> to vector<8x8xf32>
    %568 = vector.extract_strided_slice %536 {offsets = [0, 8], sizes = [8, 8], strides = [1, 1]} : vector<8x32xf32> to vector<8x8xf32>
    %569 = tpu.transpose %567, [1, 0] : vector<8x8xf32> -> vector<8x8xf32>
    %cst_202 = arith.constant dense<0.000000e+00> : vector<8x8xf32>
    %570 = tpu.matmul %566, %569, %cst_202 {dimension_numbers = #tpu.dot_dimension_numbers<[1], [0], [0], [1], [0, 0, 1, 1], [], []>} : vector<8x8xf32>, vector<8x8xf32>, vector<8x8xf32> -> vector<8x8xf32>
    %cst_203 = arith.constant 0.353553385 : f32
    %571 = vector.broadcast %cst_203 : f32 to vector<8x8xf32>
    %572 = arith.mulf %570, %571 : vector<8x8xf32>
    %573 = arith.addf %572, %544 : vector<8x8xf32>
    %cst_204 = arith.constant dense<0xFF800000> : vector<8xf32>
    %574 = vector.multi_reduction <maximumf>, %573, %cst_204 [1] : vector<8x8xf32> to vector<8xf32>
    %575 = vector.shape_cast %574 : vector<8xf32> to vector<8x1xf32>
    %576 = vector.broadcast %575 : vector<8x1xf32> to vector<8x8xf32>
    %577 = arith.subf %573, %576 : vector<8x8xf32>
    %578 = math.exp %577 : vector<8x8xf32>
    %cst_205 = arith.constant dense<0.000000e+00> : vector<8xf32>
    %579 = vector.multi_reduction <add>, %578, %cst_205 [1] : vector<8x8xf32> to vector<8xf32>
    %580 = vector.shape_cast %579 : vector<8xf32> to vector<8x1xf32>
    %581 = tpu.reciprocal %580 {approx = true} : vector<8x1xf32> -> vector<8x1xf32>
    %582 = vector.broadcast %581 : vector<8x1xf32> to vector<8x8xf32>
    %583 = arith.mulf %578, %582 : vector<8x8xf32>
    %cst_206 = arith.constant dense<0.000000e+00> : vector<8x8xf32>
    %584 = tpu.matmul %583, %568, %cst_206 {dimension_numbers = #tpu.dot_dimension_numbers<[1], [0], [0], [1], [0, 0, 1, 1], [], []>} : vector<8x8xf32>, vector<8x8xf32>, vector<8x8xf32> -> vector<8x8xf32>
    %585 = vector.extract_strided_slice %526 {offsets = [8, 0], sizes = [8, 32], strides = [1, 1]} : vector<32x32xf32> to vector<8x32xf32>
    %cst_207 = arith.constant dense<0.000000e+00> : vector<8x32xf32>
    %586 = tpu.matmul %584, %585, %cst_207 {dimension_numbers = #tpu.dot_dimension_numbers<[1], [0], [0], [1], [0, 0, 1, 1], [], []>} : vector<8x8xf32>, vector<8x32xf32>, vector<8x32xf32> -> vector<8x32xf32>
    %587 = arith.addf %565, %586 : vector<8x32xf32>
    %588 = vector.extract_strided_slice %534 {offsets = [0, 16], sizes = [8, 8], strides = [1, 1]} : vector<8x32xf32> to vector<8x8xf32>
    %589 = vector.extract_strided_slice %535 {offsets = [0, 16], sizes = [8, 8], strides = [1, 1]} : vector<8x32xf32> to vector<8x8xf32>
    %590 = vector.extract_strided_slice %536 {offsets = [0, 16], sizes = [8, 8], strides = [1, 1]} : vector<8x32xf32> to vector<8x8xf32>
    %591 = tpu.transpose %589, [1, 0] : vector<8x8xf32> -> vector<8x8xf32>
    %cst_208 = arith.constant dense<0.000000e+00> : vector<8x8xf32>
    %592 = tpu.matmul %588, %591, %cst_208 {dimension_numbers = #tpu.dot_dimension_numbers<[1], [0], [0], [1], [0, 0, 1, 1], [], []>} : vector<8x8xf32>, vector<8x8xf32>, vector<8x8xf32> -> vector<8x8xf32>
    %cst_209 = arith.constant 0.353553385 : f32
    %593 = vector.broadcast %cst_209 : f32 to vector<8x8xf32>
    %594 = arith.mulf %592, %593 : vector<8x8xf32>
    %595 = arith.addf %594, %544 : vector<8x8xf32>
    %cst_210 = arith.constant dense<0xFF800000> : vector<8xf32>
    %596 = vector.multi_reduction <maximumf>, %595, %cst_210 [1] : vector<8x8xf32> to vector<8xf32>
    %597 = vector.shape_cast %596 : vector<8xf32> to vector<8x1xf32>
    %598 = vector.broadcast %597 : vector<8x1xf32> to vector<8x8xf32>
    %599 = arith.subf %595, %598 : vector<8x8xf32>
    %600 = math.exp %599 : vector<8x8xf32>
    %cst_211 = arith.constant dense<0.000000e+00> : vector<8xf32>
    %601 = vector.multi_reduction <add>, %600, %cst_211 [1] : vector<8x8xf32> to vector<8xf32>
    %602 = vector.shape_cast %601 : vector<8xf32> to vector<8x1xf32>
    %603 = tpu.reciprocal %602 {approx = true} : vector<8x1xf32> -> vector<8x1xf32>
    %604 = vector.broadcast %603 : vector<8x1xf32> to vector<8x8xf32>
    %605 = arith.mulf %600, %604 : vector<8x8xf32>
    %cst_212 = arith.constant dense<0.000000e+00> : vector<8x8xf32>
    %606 = tpu.matmul %605, %590, %cst_212 {dimension_numbers = #tpu.dot_dimension_numbers<[1], [0], [0], [1], [0, 0, 1, 1], [], []>} : vector<8x8xf32>, vector<8x8xf32>, vector<8x8xf32> -> vector<8x8xf32>
    %607 = vector.extract_strided_slice %526 {offsets = [16, 0], sizes = [8, 32], strides = [1, 1]} : vector<32x32xf32> to vector<8x32xf32>
    %cst_213 = arith.constant dense<0.000000e+00> : vector<8x32xf32>
    %608 = tpu.matmul %606, %607, %cst_213 {dimension_numbers = #tpu.dot_dimension_numbers<[1], [0], [0], [1], [0, 0, 1, 1], [], []>} : vector<8x8xf32>, vector<8x32xf32>, vector<8x32xf32> -> vector<8x32xf32>
    %609 = arith.addf %587, %608 : vector<8x32xf32>
    %610 = vector.extract_strided_slice %534 {offsets = [0, 24], sizes = [8, 8], strides = [1, 1]} : vector<8x32xf32> to vector<8x8xf32>
    %611 = vector.extract_strided_slice %535 {offsets = [0, 24], sizes = [8, 8], strides = [1, 1]} : vector<8x32xf32> to vector<8x8xf32>
    %612 = vector.extract_strided_slice %536 {offsets = [0, 24], sizes = [8, 8], strides = [1, 1]} : vector<8x32xf32> to vector<8x8xf32>
    %613 = tpu.transpose %611, [1, 0] : vector<8x8xf32> -> vector<8x8xf32>
    %cst_214 = arith.constant dense<0.000000e+00> : vector<8x8xf32>
    %614 = tpu.matmul %610, %613, %cst_214 {dimension_numbers = #tpu.dot_dimension_numbers<[1], [0], [0], [1], [0, 0, 1, 1], [], []>} : vector<8x8xf32>, vector<8x8xf32>, vector<8x8xf32> -> vector<8x8xf32>
    %cst_215 = arith.constant 0.353553385 : f32
    %615 = vector.broadcast %cst_215 : f32 to vector<8x8xf32>
    %616 = arith.mulf %614, %615 : vector<8x8xf32>
    %617 = arith.addf %616, %544 : vector<8x8xf32>
    %cst_216 = arith.constant dense<0xFF800000> : vector<8xf32>
    %618 = vector.multi_reduction <maximumf>, %617, %cst_216 [1] : vector<8x8xf32> to vector<8xf32>
    %619 = vector.shape_cast %618 : vector<8xf32> to vector<8x1xf32>
    %620 = vector.broadcast %619 : vector<8x1xf32> to vector<8x8xf32>
    %621 = arith.subf %617, %620 : vector<8x8xf32>
    %622 = math.exp %621 : vector<8x8xf32>
    %cst_217 = arith.constant dense<0.000000e+00> : vector<8xf32>
    %623 = vector.multi_reduction <add>, %622, %cst_217 [1] : vector<8x8xf32> to vector<8xf32>
    %624 = vector.shape_cast %623 : vector<8xf32> to vector<8x1xf32>
    %625 = tpu.reciprocal %624 {approx = true} : vector<8x1xf32> -> vector<8x1xf32>
    %626 = vector.broadcast %625 : vector<8x1xf32> to vector<8x8xf32>
    %627 = arith.mulf %622, %626 : vector<8x8xf32>
    %cst_218 = arith.constant dense<0.000000e+00> : vector<8x8xf32>
    %628 = tpu.matmul %627, %612, %cst_218 {dimension_numbers = #tpu.dot_dimension_numbers<[1], [0], [0], [1], [0, 0, 1, 1], [], []>} : vector<8x8xf32>, vector<8x8xf32>, vector<8x8xf32> -> vector<8x8xf32>
    %629 = vector.extract_strided_slice %526 {offsets = [24, 0], sizes = [8, 32], strides = [1, 1]} : vector<32x32xf32> to vector<8x32xf32>
    %cst_219 = arith.constant dense<0.000000e+00> : vector<8x32xf32>
    %630 = tpu.matmul %628, %629, %cst_219 {dimension_numbers = #tpu.dot_dimension_numbers<[1], [0], [0], [1], [0, 0, 1, 1], [], []>} : vector<8x8xf32>, vector<8x32xf32>, vector<8x32xf32> -> vector<8x32xf32>
    %631 = arith.addf %609, %630 : vector<8x32xf32>
    %632 = vector.extract_strided_slice %531 {offsets = [8, 0], sizes = [8, 32], strides = [1, 1]} : vector<16x32xf32> to vector<8x32xf32>
    %633 = vector.extract_strided_slice %532 {offsets = [8, 0], sizes = [8, 32], strides = [1, 1]} : vector<16x32xf32> to vector<8x32xf32>
    %634 = vector.extract_strided_slice %533 {offsets = [8, 0], sizes = [8, 32], strides = [1, 1]} : vector<16x32xf32> to vector<8x32xf32>
    %635 = vector.extract_strided_slice %15 {offsets = [1, 0], sizes = [1, 8], strides = [1, 1]} : vector<2x8xi32> to vector<1x8xi32>
    %c0_i32_220 = arith.constant 0 : i32
    %636 = vector.broadcast %c0_i32_220 : i32 to vector<1x8xi32>
    %637 = arith.cmpi ne, %635, %636 : vector<1x8xi32>
    %cst_221 = arith.constant -1.000000e+09 : f32
    %cst_222 = arith.constant 0.000000e+00 : f32
    %638 = vector.broadcast %cst_221 : f32 to vector<1x8xf32>
    %639 = vector.broadcast %cst_222 : f32 to vector<1x8xf32>
    %640 = arith.select %637, %638, %639 : vector<1x8xi1>, vector<1x8xf32>
    %641 = vector.broadcast %640 : vector<1x8xf32> to vector<8x8xf32>
    %642 = arith.addf %14, %641 : vector<8x8xf32>
    %643 = vector.extract_strided_slice %632 {offsets = [0, 0], sizes = [8, 8], strides = [1, 1]} : vector<8x32xf32> to vector<8x8xf32>
    %644 = vector.extract_strided_slice %633 {offsets = [0, 0], sizes = [8, 8], strides = [1, 1]} : vector<8x32xf32> to vector<8x8xf32>
    %645 = vector.extract_strided_slice %634 {offsets = [0, 0], sizes = [8, 8], strides = [1, 1]} : vector<8x32xf32> to vector<8x8xf32>
    %646 = tpu.transpose %644, [1, 0] : vector<8x8xf32> -> vector<8x8xf32>
    %cst_223 = arith.constant dense<0.000000e+00> : vector<8x8xf32>
    %647 = tpu.matmul %643, %646, %cst_223 {dimension_numbers = #tpu.dot_dimension_numbers<[1], [0], [0], [1], [0, 0, 1, 1], [], []>} : vector<8x8xf32>, vector<8x8xf32>, vector<8x8xf32> -> vector<8x8xf32>
    %cst_224 = arith.constant 0.353553385 : f32
    %648 = vector.broadcast %cst_224 : f32 to vector<8x8xf32>
    %649 = arith.mulf %647, %648 : vector<8x8xf32>
    %650 = arith.addf %649, %642 : vector<8x8xf32>
    %cst_225 = arith.constant dense<0xFF800000> : vector<8xf32>
    %651 = vector.multi_reduction <maximumf>, %650, %cst_225 [1] : vector<8x8xf32> to vector<8xf32>
    %652 = vector.shape_cast %651 : vector<8xf32> to vector<8x1xf32>
    %653 = vector.broadcast %652 : vector<8x1xf32> to vector<8x8xf32>
    %654 = arith.subf %650, %653 : vector<8x8xf32>
    %655 = math.exp %654 : vector<8x8xf32>
    %cst_226 = arith.constant dense<0.000000e+00> : vector<8xf32>
    %656 = vector.multi_reduction <add>, %655, %cst_226 [1] : vector<8x8xf32> to vector<8xf32>
    %657 = vector.shape_cast %656 : vector<8xf32> to vector<8x1xf32>
    %658 = tpu.reciprocal %657 {approx = true} : vector<8x1xf32> -> vector<8x1xf32>
    %659 = vector.broadcast %658 : vector<8x1xf32> to vector<8x8xf32>
    %660 = arith.mulf %655, %659 : vector<8x8xf32>
    %cst_227 = arith.constant dense<0.000000e+00> : vector<8x8xf32>
    %661 = tpu.matmul %660, %645, %cst_227 {dimension_numbers = #tpu.dot_dimension_numbers<[1], [0], [0], [1], [0, 0, 1, 1], [], []>} : vector<8x8xf32>, vector<8x8xf32>, vector<8x8xf32> -> vector<8x8xf32>
    %662 = vector.extract_strided_slice %526 {offsets = [0, 0], sizes = [8, 32], strides = [1, 1]} : vector<32x32xf32> to vector<8x32xf32>
    %cst_228 = arith.constant dense<0.000000e+00> : vector<8x32xf32>
    %663 = tpu.matmul %661, %662, %cst_228 {dimension_numbers = #tpu.dot_dimension_numbers<[1], [0], [0], [1], [0, 0, 1, 1], [], []>} : vector<8x8xf32>, vector<8x32xf32>, vector<8x32xf32> -> vector<8x32xf32>
    %664 = vector.extract_strided_slice %632 {offsets = [0, 8], sizes = [8, 8], strides = [1, 1]} : vector<8x32xf32> to vector<8x8xf32>
    %665 = vector.extract_strided_slice %633 {offsets = [0, 8], sizes = [8, 8], strides = [1, 1]} : vector<8x32xf32> to vector<8x8xf32>
    %666 = vector.extract_strided_slice %634 {offsets = [0, 8], sizes = [8, 8], strides = [1, 1]} : vector<8x32xf32> to vector<8x8xf32>
    %667 = tpu.transpose %665, [1, 0] : vector<8x8xf32> -> vector<8x8xf32>
    %cst_229 = arith.constant dense<0.000000e+00> : vector<8x8xf32>
    %668 = tpu.matmul %664, %667, %cst_229 {dimension_numbers = #tpu.dot_dimension_numbers<[1], [0], [0], [1], [0, 0, 1, 1], [], []>} : vector<8x8xf32>, vector<8x8xf32>, vector<8x8xf32> -> vector<8x8xf32>
    %cst_230 = arith.constant 0.353553385 : f32
    %669 = vector.broadcast %cst_230 : f32 to vector<8x8xf32>
    %670 = arith.mulf %668, %669 : vector<8x8xf32>
    %671 = arith.addf %670, %642 : vector<8x8xf32>
    %cst_231 = arith.constant dense<0xFF800000> : vector<8xf32>
    %672 = vector.multi_reduction <maximumf>, %671, %cst_231 [1] : vector<8x8xf32> to vector<8xf32>
    %673 = vector.shape_cast %672 : vector<8xf32> to vector<8x1xf32>
    %674 = vector.broadcast %673 : vector<8x1xf32> to vector<8x8xf32>
    %675 = arith.subf %671, %674 : vector<8x8xf32>
    %676 = math.exp %675 : vector<8x8xf32>
    %cst_232 = arith.constant dense<0.000000e+00> : vector<8xf32>
    %677 = vector.multi_reduction <add>, %676, %cst_232 [1] : vector<8x8xf32> to vector<8xf32>
    %678 = vector.shape_cast %677 : vector<8xf32> to vector<8x1xf32>
    %679 = tpu.reciprocal %678 {approx = true} : vector<8x1xf32> -> vector<8x1xf32>
    %680 = vector.broadcast %679 : vector<8x1xf32> to vector<8x8xf32>
    %681 = arith.mulf %676, %680 : vector<8x8xf32>
    %cst_233 = arith.constant dense<0.000000e+00> : vector<8x8xf32>
    %682 = tpu.matmul %681, %666, %cst_233 {dimension_numbers = #tpu.dot_dimension_numbers<[1], [0], [0], [1], [0, 0, 1, 1], [], []>} : vector<8x8xf32>, vector<8x8xf32>, vector<8x8xf32> -> vector<8x8xf32>
    %683 = vector.extract_strided_slice %526 {offsets = [8, 0], sizes = [8, 32], strides = [1, 1]} : vector<32x32xf32> to vector<8x32xf32>
    %cst_234 = arith.constant dense<0.000000e+00> : vector<8x32xf32>
    %684 = tpu.matmul %682, %683, %cst_234 {dimension_numbers = #tpu.dot_dimension_numbers<[1], [0], [0], [1], [0, 0, 1, 1], [], []>} : vector<8x8xf32>, vector<8x32xf32>, vector<8x32xf32> -> vector<8x32xf32>
    %685 = arith.addf %663, %684 : vector<8x32xf32>
    %686 = vector.extract_strided_slice %632 {offsets = [0, 16], sizes = [8, 8], strides = [1, 1]} : vector<8x32xf32> to vector<8x8xf32>
    %687 = vector.extract_strided_slice %633 {offsets = [0, 16], sizes = [8, 8], strides = [1, 1]} : vector<8x32xf32> to vector<8x8xf32>
    %688 = vector.extract_strided_slice %634 {offsets = [0, 16], sizes = [8, 8], strides = [1, 1]} : vector<8x32xf32> to vector<8x8xf32>
    %689 = tpu.transpose %687, [1, 0] : vector<8x8xf32> -> vector<8x8xf32>
    %cst_235 = arith.constant dense<0.000000e+00> : vector<8x8xf32>
    %690 = tpu.matmul %686, %689, %cst_235 {dimension_numbers = #tpu.dot_dimension_numbers<[1], [0], [0], [1], [0, 0, 1, 1], [], []>} : vector<8x8xf32>, vector<8x8xf32>, vector<8x8xf32> -> vector<8x8xf32>
    %cst_236 = arith.constant 0.353553385 : f32
    %691 = vector.broadcast %cst_236 : f32 to vector<8x8xf32>
    %692 = arith.mulf %690, %691 : vector<8x8xf32>
    %693 = arith.addf %692, %642 : vector<8x8xf32>
    %cst_237 = arith.constant dense<0xFF800000> : vector<8xf32>
    %694 = vector.multi_reduction <maximumf>, %693, %cst_237 [1] : vector<8x8xf32> to vector<8xf32>
    %695 = vector.shape_cast %694 : vector<8xf32> to vector<8x1xf32>
    %696 = vector.broadcast %695 : vector<8x1xf32> to vector<8x8xf32>
    %697 = arith.subf %693, %696 : vector<8x8xf32>
    %698 = math.exp %697 : vector<8x8xf32>
    %cst_238 = arith.constant dense<0.000000e+00> : vector<8xf32>
    %699 = vector.multi_reduction <add>, %698, %cst_238 [1] : vector<8x8xf32> to vector<8xf32>
    %700 = vector.shape_cast %699 : vector<8xf32> to vector<8x1xf32>
    %701 = tpu.reciprocal %700 {approx = true} : vector<8x1xf32> -> vector<8x1xf32>
    %702 = vector.broadcast %701 : vector<8x1xf32> to vector<8x8xf32>
    %703 = arith.mulf %698, %702 : vector<8x8xf32>
    %cst_239 = arith.constant dense<0.000000e+00> : vector<8x8xf32>
    %704 = tpu.matmul %703, %688, %cst_239 {dimension_numbers = #tpu.dot_dimension_numbers<[1], [0], [0], [1], [0, 0, 1, 1], [], []>} : vector<8x8xf32>, vector<8x8xf32>, vector<8x8xf32> -> vector<8x8xf32>
    %705 = vector.extract_strided_slice %526 {offsets = [16, 0], sizes = [8, 32], strides = [1, 1]} : vector<32x32xf32> to vector<8x32xf32>
    %cst_240 = arith.constant dense<0.000000e+00> : vector<8x32xf32>
    %706 = tpu.matmul %704, %705, %cst_240 {dimension_numbers = #tpu.dot_dimension_numbers<[1], [0], [0], [1], [0, 0, 1, 1], [], []>} : vector<8x8xf32>, vector<8x32xf32>, vector<8x32xf32> -> vector<8x32xf32>
    %707 = arith.addf %685, %706 : vector<8x32xf32>
    %708 = vector.extract_strided_slice %632 {offsets = [0, 24], sizes = [8, 8], strides = [1, 1]} : vector<8x32xf32> to vector<8x8xf32>
    %709 = vector.extract_strided_slice %633 {offsets = [0, 24], sizes = [8, 8], strides = [1, 1]} : vector<8x32xf32> to vector<8x8xf32>
    %710 = vector.extract_strided_slice %634 {offsets = [0, 24], sizes = [8, 8], strides = [1, 1]} : vector<8x32xf32> to vector<8x8xf32>
    %711 = tpu.transpose %709, [1, 0] : vector<8x8xf32> -> vector<8x8xf32>
    %cst_241 = arith.constant dense<0.000000e+00> : vector<8x8xf32>
    %712 = tpu.matmul %708, %711, %cst_241 {dimension_numbers = #tpu.dot_dimension_numbers<[1], [0], [0], [1], [0, 0, 1, 1], [], []>} : vector<8x8xf32>, vector<8x8xf32>, vector<8x8xf32> -> vector<8x8xf32>
    %cst_242 = arith.constant 0.353553385 : f32
    %713 = vector.broadcast %cst_242 : f32 to vector<8x8xf32>
    %714 = arith.mulf %712, %713 : vector<8x8xf32>
    %715 = arith.addf %714, %642 : vector<8x8xf32>
    %cst_243 = arith.constant dense<0xFF800000> : vector<8xf32>
    %716 = vector.multi_reduction <maximumf>, %715, %cst_243 [1] : vector<8x8xf32> to vector<8xf32>
    %717 = vector.shape_cast %716 : vector<8xf32> to vector<8x1xf32>
    %718 = vector.broadcast %717 : vector<8x1xf32> to vector<8x8xf32>
    %719 = arith.subf %715, %718 : vector<8x8xf32>
    %720 = math.exp %719 : vector<8x8xf32>
    %cst_244 = arith.constant dense<0.000000e+00> : vector<8xf32>
    %721 = vector.multi_reduction <add>, %720, %cst_244 [1] : vector<8x8xf32> to vector<8xf32>
    %722 = vector.shape_cast %721 : vector<8xf32> to vector<8x1xf32>
    %723 = tpu.reciprocal %722 {approx = true} : vector<8x1xf32> -> vector<8x1xf32>
    %724 = vector.broadcast %723 : vector<8x1xf32> to vector<8x8xf32>
    %725 = arith.mulf %720, %724 : vector<8x8xf32>
    %cst_245 = arith.constant dense<0.000000e+00> : vector<8x8xf32>
    %726 = tpu.matmul %725, %710, %cst_245 {dimension_numbers = #tpu.dot_dimension_numbers<[1], [0], [0], [1], [0, 0, 1, 1], [], []>} : vector<8x8xf32>, vector<8x8xf32>, vector<8x8xf32> -> vector<8x8xf32>
    %727 = vector.extract_strided_slice %526 {offsets = [24, 0], sizes = [8, 32], strides = [1, 1]} : vector<32x32xf32> to vector<8x32xf32>
    %cst_246 = arith.constant dense<0.000000e+00> : vector<8x32xf32>
    %728 = tpu.matmul %726, %727, %cst_246 {dimension_numbers = #tpu.dot_dimension_numbers<[1], [0], [0], [1], [0, 0, 1, 1], [], []>} : vector<8x8xf32>, vector<8x32xf32>, vector<8x32xf32> -> vector<8x32xf32>
    %729 = arith.addf %707, %728 : vector<8x32xf32>
    %730 = tpu.concatenate %631, %729 in 0 : vector<8x32xf32>, vector<8x32xf32> -> vector<16x32xf32>
    %731 = vector.broadcast %527 : vector<1x32xf32> to vector<16x32xf32>
    %732 = arith.addf %730, %731 : vector<16x32xf32>
    %733 = arith.addf %521, %732 : vector<16x32xf32>
    %c1_247 = arith.constant 1 : index
    %c0_248 = arith.constant 0 : index
    %c0_249 = arith.constant 0 : index
    %734 = vector.load %arg20[%c1_247, %c0_248, %c0_249] : memref<2x3x32xf32, #tpu.memory_space<vmem>>, vector<1x3x32xf32>
    %735 = vector.shape_cast %734 : vector<1x3x32xf32> to vector<3x32xf32>
    %736 = vector.extract_strided_slice %735 {offsets = [0, 0], sizes = [1, 32], strides = [1, 1]} : vector<3x32xf32> to vector<1x32xf32>
    %c1_250 = arith.constant 1 : index
    %c0_251 = arith.constant 0 : index
    %c0_252 = arith.constant 0 : index
    %737 = vector.load %arg21[%c1_250, %c0_251, %c0_252] : memref<2x3x32xf32, #tpu.memory_space<vmem>>, vector<1x3x32xf32>
    %738 = vector.shape_cast %737 : vector<1x3x32xf32> to vector<3x32xf32>
    %739 = vector.extract_strided_slice %738 {offsets = [0, 0], sizes = [1, 32], strides = [1, 1]} : vector<3x32xf32> to vector<1x32xf32>
    %cst_253 = arith.constant dense<0.000000e+00> : vector<16xf32>
    %740 = vector.multi_reduction <add>, %733, %cst_253 [1] : vector<16x32xf32> to vector<16xf32>
    %741 = vector.shape_cast %740 : vector<16xf32> to vector<16x1xf32>
    %cst_254 = arith.constant 3.200000e+01 : f32
    %742 = vector.broadcast %cst_254 : f32 to vector<16x1xf32>
    %743 = arith.divf %741, %742 : vector<16x1xf32>
    %744 = vector.broadcast %743 : vector<16x1xf32> to vector<16x32xf32>
    %745 = arith.subf %733, %744 : vector<16x32xf32>
    %746 = arith.mulf %745, %745 : vector<16x32xf32>
    %cst_255 = arith.constant dense<0.000000e+00> : vector<16xf32>
    %747 = vector.multi_reduction <add>, %746, %cst_255 [1] : vector<16x32xf32> to vector<16xf32>
    %748 = vector.shape_cast %747 : vector<16xf32> to vector<16x1xf32>
    %cst_256 = arith.constant 3.200000e+01 : f32
    %749 = vector.broadcast %cst_256 : f32 to vector<16x1xf32>
    %750 = arith.divf %748, %749 : vector<16x1xf32>
    %751 = vector.broadcast %743 : vector<16x1xf32> to vector<16x32xf32>
    %752 = arith.subf %733, %751 : vector<16x32xf32>
    %cst_257 = arith.constant 9.99999974E-6 : f32
    %753 = vector.broadcast %cst_257 : f32 to vector<16x1xf32>
    %754 = arith.addf %750, %753 : vector<16x1xf32>
    %755 = math.rsqrt %754 : vector<16x1xf32>
    %756 = vector.broadcast %755 : vector<16x1xf32> to vector<16x32xf32>
    %757 = arith.mulf %752, %756 : vector<16x32xf32>
    %758 = vector.broadcast %736 : vector<1x32xf32> to vector<16x32xf32>
    %759 = arith.mulf %757, %758 : vector<16x32xf32>
    %760 = vector.broadcast %739 : vector<1x32xf32> to vector<16x32xf32>
    %761 = arith.addf %759, %760 : vector<16x32xf32>
    %c1_258 = arith.constant 1 : index
    %c0_259 = arith.constant 0 : index
    %c0_260 = arith.constant 0 : index
    %762 = vector.load %arg12[%c1_258, %c0_259, %c0_260] : memref<2x32x96xf32, #tpu.memory_space<vmem>>, vector<1x32x96xf32>
    %763 = vector.shape_cast %762 : vector<1x32x96xf32> to vector<32x96xf32>
    %c1_261 = arith.constant 1 : index
    %c0_262 = arith.constant 0 : index
    %764 = vector.load %arg13[%c1_261, %c0_262] : memref<2x96xf32, #tpu.memory_space<vmem>>, vector<1x96xf32>
    %c1_263 = arith.constant 1 : index
    %c0_264 = arith.constant 0 : index
    %c0_265 = arith.constant 0 : index
    %765 = vector.load %arg14[%c1_263, %c0_264, %c0_265] : memref<2x32x32xf32, #tpu.memory_space<vmem>>, vector<1x32x32xf32>
    %766 = vector.shape_cast %765 : vector<1x32x32xf32> to vector<32x32xf32>
    %c1_266 = arith.constant 1 : index
    %c0_267 = arith.constant 0 : index
    %767 = vector.load %arg15[%c1_266, %c0_267] : memref<2x32xf32, #tpu.memory_space<vmem>>, vector<1x32xf32>
    %768 = vector.extract_strided_slice %763 {offsets = [0, 0], sizes = [32, 32], strides = [1, 1]} : vector<32x96xf32> to vector<32x32xf32>
    %cst_268 = arith.constant dense<0.000000e+00> : vector<16x32xf32>
    %769 = tpu.matmul %761, %768, %cst_268 {dimension_numbers = #tpu.dot_dimension_numbers<[1], [0], [0], [1], [0, 0, 1, 1], [], []>} : vector<16x32xf32>, vector<32x32xf32>, vector<16x32xf32> -> vector<16x32xf32>
    %770 = vector.extract_strided_slice %764 {offsets = [0, 0], sizes = [1, 32], strides = [1, 1]} : vector<1x96xf32> to vector<1x32xf32>
    %771 = vector.broadcast %770 : vector<1x32xf32> to vector<16x32xf32>
    %772 = arith.addf %769, %771 : vector<16x32xf32>
    %773 = vector.extract_strided_slice %763 {offsets = [0, 32], sizes = [32, 64], strides = [1, 1]} : vector<32x96xf32> to vector<32x64xf32>
    %cst_269 = arith.constant dense<0.000000e+00> : vector<16x64xf32>
    %774 = tpu.matmul %16, %773, %cst_269 {dimension_numbers = #tpu.dot_dimension_numbers<[1], [0], [0], [1], [0, 0, 1, 1], [], []>} : vector<16x32xf32>, vector<32x64xf32>, vector<16x64xf32> -> vector<16x64xf32>
    %775 = vector.extract_strided_slice %764 {offsets = [0, 32], sizes = [1, 64], strides = [1, 1]} : vector<1x96xf32> to vector<1x64xf32>
    %776 = vector.broadcast %775 : vector<1x64xf32> to vector<16x64xf32>
    %777 = arith.addf %774, %776 : vector<16x64xf32>
    %778 = vector.extract_strided_slice %777 {offsets = [0, 0], sizes = [16, 32], strides = [1, 1]} : vector<16x64xf32> to vector<16x32xf32>
    %779 = vector.extract_strided_slice %777 {offsets = [0, 32], sizes = [16, 32], strides = [1, 1]} : vector<16x64xf32> to vector<16x32xf32>
    %780 = vector.extract_strided_slice %772 {offsets = [0, 0], sizes = [8, 32], strides = [1, 1]} : vector<16x32xf32> to vector<8x32xf32>
    %781 = vector.extract_strided_slice %778 {offsets = [0, 0], sizes = [8, 32], strides = [1, 1]} : vector<16x32xf32> to vector<8x32xf32>
    %782 = vector.extract_strided_slice %779 {offsets = [0, 0], sizes = [8, 32], strides = [1, 1]} : vector<16x32xf32> to vector<8x32xf32>
    %783 = vector.extract_strided_slice %780 {offsets = [0, 0], sizes = [8, 8], strides = [1, 1]} : vector<8x32xf32> to vector<8x8xf32>
    %784 = vector.extract_strided_slice %781 {offsets = [0, 0], sizes = [8, 8], strides = [1, 1]} : vector<8x32xf32> to vector<8x8xf32>
    %785 = vector.extract_strided_slice %782 {offsets = [0, 0], sizes = [8, 8], strides = [1, 1]} : vector<8x32xf32> to vector<8x8xf32>
    %786 = tpu.transpose %784, [1, 0] : vector<8x8xf32> -> vector<8x8xf32>
    %cst_270 = arith.constant dense<0.000000e+00> : vector<8x8xf32>
    %787 = tpu.matmul %783, %786, %cst_270 {dimension_numbers = #tpu.dot_dimension_numbers<[1], [0], [0], [1], [0, 0, 1, 1], [], []>} : vector<8x8xf32>, vector<8x8xf32>, vector<8x8xf32> -> vector<8x8xf32>
    %cst_271 = arith.constant 0.353553385 : f32
    %788 = vector.broadcast %cst_271 : f32 to vector<8x8xf32>
    %789 = arith.mulf %787, %788 : vector<8x8xf32>
    %cst_272 = arith.constant dense<0xFF800000> : vector<8xf32>
    %790 = vector.multi_reduction <maximumf>, %789, %cst_272 [1] : vector<8x8xf32> to vector<8xf32>
    %791 = vector.shape_cast %790 : vector<8xf32> to vector<8x1xf32>
    %792 = vector.broadcast %791 : vector<8x1xf32> to vector<8x8xf32>
    %793 = arith.subf %789, %792 : vector<8x8xf32>
    %794 = math.exp %793 : vector<8x8xf32>
    %cst_273 = arith.constant dense<0.000000e+00> : vector<8xf32>
    %795 = vector.multi_reduction <add>, %794, %cst_273 [1] : vector<8x8xf32> to vector<8xf32>
    %796 = vector.shape_cast %795 : vector<8xf32> to vector<8x1xf32>
    %797 = tpu.reciprocal %796 {approx = true} : vector<8x1xf32> -> vector<8x1xf32>
    %798 = vector.broadcast %797 : vector<8x1xf32> to vector<8x8xf32>
    %799 = arith.mulf %794, %798 : vector<8x8xf32>
    %cst_274 = arith.constant dense<0.000000e+00> : vector<8x8xf32>
    %800 = tpu.matmul %799, %785, %cst_274 {dimension_numbers = #tpu.dot_dimension_numbers<[1], [0], [0], [1], [0, 0, 1, 1], [], []>} : vector<8x8xf32>, vector<8x8xf32>, vector<8x8xf32> -> vector<8x8xf32>
    %801 = vector.extract_strided_slice %766 {offsets = [0, 0], sizes = [8, 32], strides = [1, 1]} : vector<32x32xf32> to vector<8x32xf32>
    %cst_275 = arith.constant dense<0.000000e+00> : vector<8x32xf32>
    %802 = tpu.matmul %800, %801, %cst_275 {dimension_numbers = #tpu.dot_dimension_numbers<[1], [0], [0], [1], [0, 0, 1, 1], [], []>} : vector<8x8xf32>, vector<8x32xf32>, vector<8x32xf32> -> vector<8x32xf32>
    %803 = vector.extract_strided_slice %780 {offsets = [0, 8], sizes = [8, 8], strides = [1, 1]} : vector<8x32xf32> to vector<8x8xf32>
    %804 = vector.extract_strided_slice %781 {offsets = [0, 8], sizes = [8, 8], strides = [1, 1]} : vector<8x32xf32> to vector<8x8xf32>
    %805 = vector.extract_strided_slice %782 {offsets = [0, 8], sizes = [8, 8], strides = [1, 1]} : vector<8x32xf32> to vector<8x8xf32>
    %806 = tpu.transpose %804, [1, 0] : vector<8x8xf32> -> vector<8x8xf32>
    %cst_276 = arith.constant dense<0.000000e+00> : vector<8x8xf32>
    %807 = tpu.matmul %803, %806, %cst_276 {dimension_numbers = #tpu.dot_dimension_numbers<[1], [0], [0], [1], [0, 0, 1, 1], [], []>} : vector<8x8xf32>, vector<8x8xf32>, vector<8x8xf32> -> vector<8x8xf32>
    %cst_277 = arith.constant 0.353553385 : f32
    %808 = vector.broadcast %cst_277 : f32 to vector<8x8xf32>
    %809 = arith.mulf %807, %808 : vector<8x8xf32>
    %cst_278 = arith.constant dense<0xFF800000> : vector<8xf32>
    %810 = vector.multi_reduction <maximumf>, %809, %cst_278 [1] : vector<8x8xf32> to vector<8xf32>
    %811 = vector.shape_cast %810 : vector<8xf32> to vector<8x1xf32>
    %812 = vector.broadcast %811 : vector<8x1xf32> to vector<8x8xf32>
    %813 = arith.subf %809, %812 : vector<8x8xf32>
    %814 = math.exp %813 : vector<8x8xf32>
    %cst_279 = arith.constant dense<0.000000e+00> : vector<8xf32>
    %815 = vector.multi_reduction <add>, %814, %cst_279 [1] : vector<8x8xf32> to vector<8xf32>
    %816 = vector.shape_cast %815 : vector<8xf32> to vector<8x1xf32>
    %817 = tpu.reciprocal %816 {approx = true} : vector<8x1xf32> -> vector<8x1xf32>
    %818 = vector.broadcast %817 : vector<8x1xf32> to vector<8x8xf32>
    %819 = arith.mulf %814, %818 : vector<8x8xf32>
    %cst_280 = arith.constant dense<0.000000e+00> : vector<8x8xf32>
    %820 = tpu.matmul %819, %805, %cst_280 {dimension_numbers = #tpu.dot_dimension_numbers<[1], [0], [0], [1], [0, 0, 1, 1], [], []>} : vector<8x8xf32>, vector<8x8xf32>, vector<8x8xf32> -> vector<8x8xf32>
    %821 = vector.extract_strided_slice %766 {offsets = [8, 0], sizes = [8, 32], strides = [1, 1]} : vector<32x32xf32> to vector<8x32xf32>
    %cst_281 = arith.constant dense<0.000000e+00> : vector<8x32xf32>
    %822 = tpu.matmul %820, %821, %cst_281 {dimension_numbers = #tpu.dot_dimension_numbers<[1], [0], [0], [1], [0, 0, 1, 1], [], []>} : vector<8x8xf32>, vector<8x32xf32>, vector<8x32xf32> -> vector<8x32xf32>
    %823 = arith.addf %802, %822 : vector<8x32xf32>
    %824 = vector.extract_strided_slice %780 {offsets = [0, 16], sizes = [8, 8], strides = [1, 1]} : vector<8x32xf32> to vector<8x8xf32>
    %825 = vector.extract_strided_slice %781 {offsets = [0, 16], sizes = [8, 8], strides = [1, 1]} : vector<8x32xf32> to vector<8x8xf32>
    %826 = vector.extract_strided_slice %782 {offsets = [0, 16], sizes = [8, 8], strides = [1, 1]} : vector<8x32xf32> to vector<8x8xf32>
    %827 = tpu.transpose %825, [1, 0] : vector<8x8xf32> -> vector<8x8xf32>
    %cst_282 = arith.constant dense<0.000000e+00> : vector<8x8xf32>
    %828 = tpu.matmul %824, %827, %cst_282 {dimension_numbers = #tpu.dot_dimension_numbers<[1], [0], [0], [1], [0, 0, 1, 1], [], []>} : vector<8x8xf32>, vector<8x8xf32>, vector<8x8xf32> -> vector<8x8xf32>
    %cst_283 = arith.constant 0.353553385 : f32
    %829 = vector.broadcast %cst_283 : f32 to vector<8x8xf32>
    %830 = arith.mulf %828, %829 : vector<8x8xf32>
    %cst_284 = arith.constant dense<0xFF800000> : vector<8xf32>
    %831 = vector.multi_reduction <maximumf>, %830, %cst_284 [1] : vector<8x8xf32> to vector<8xf32>
    %832 = vector.shape_cast %831 : vector<8xf32> to vector<8x1xf32>
    %833 = vector.broadcast %832 : vector<8x1xf32> to vector<8x8xf32>
    %834 = arith.subf %830, %833 : vector<8x8xf32>
    %835 = math.exp %834 : vector<8x8xf32>
    %cst_285 = arith.constant dense<0.000000e+00> : vector<8xf32>
    %836 = vector.multi_reduction <add>, %835, %cst_285 [1] : vector<8x8xf32> to vector<8xf32>
    %837 = vector.shape_cast %836 : vector<8xf32> to vector<8x1xf32>
    %838 = tpu.reciprocal %837 {approx = true} : vector<8x1xf32> -> vector<8x1xf32>
    %839 = vector.broadcast %838 : vector<8x1xf32> to vector<8x8xf32>
    %840 = arith.mulf %835, %839 : vector<8x8xf32>
    %cst_286 = arith.constant dense<0.000000e+00> : vector<8x8xf32>
    %841 = tpu.matmul %840, %826, %cst_286 {dimension_numbers = #tpu.dot_dimension_numbers<[1], [0], [0], [1], [0, 0, 1, 1], [], []>} : vector<8x8xf32>, vector<8x8xf32>, vector<8x8xf32> -> vector<8x8xf32>
    %842 = vector.extract_strided_slice %766 {offsets = [16, 0], sizes = [8, 32], strides = [1, 1]} : vector<32x32xf32> to vector<8x32xf32>
    %cst_287 = arith.constant dense<0.000000e+00> : vector<8x32xf32>
    %843 = tpu.matmul %841, %842, %cst_287 {dimension_numbers = #tpu.dot_dimension_numbers<[1], [0], [0], [1], [0, 0, 1, 1], [], []>} : vector<8x8xf32>, vector<8x32xf32>, vector<8x32xf32> -> vector<8x32xf32>
    %844 = arith.addf %823, %843 : vector<8x32xf32>
    %845 = vector.extract_strided_slice %780 {offsets = [0, 24], sizes = [8, 8], strides = [1, 1]} : vector<8x32xf32> to vector<8x8xf32>
    %846 = vector.extract_strided_slice %781 {offsets = [0, 24], sizes = [8, 8], strides = [1, 1]} : vector<8x32xf32> to vector<8x8xf32>
    %847 = vector.extract_strided_slice %782 {offsets = [0, 24], sizes = [8, 8], strides = [1, 1]} : vector<8x32xf32> to vector<8x8xf32>
    %848 = tpu.transpose %846, [1, 0] : vector<8x8xf32> -> vector<8x8xf32>
    %cst_288 = arith.constant dense<0.000000e+00> : vector<8x8xf32>
    %849 = tpu.matmul %845, %848, %cst_288 {dimension_numbers = #tpu.dot_dimension_numbers<[1], [0], [0], [1], [0, 0, 1, 1], [], []>} : vector<8x8xf32>, vector<8x8xf32>, vector<8x8xf32> -> vector<8x8xf32>
    %cst_289 = arith.constant 0.353553385 : f32
    %850 = vector.broadcast %cst_289 : f32 to vector<8x8xf32>
    %851 = arith.mulf %849, %850 : vector<8x8xf32>
    %cst_290 = arith.constant dense<0xFF800000> : vector<8xf32>
    %852 = vector.multi_reduction <maximumf>, %851, %cst_290 [1] : vector<8x8xf32> to vector<8xf32>
    %853 = vector.shape_cast %852 : vector<8xf32> to vector<8x1xf32>
    %854 = vector.broadcast %853 : vector<8x1xf32> to vector<8x8xf32>
    %855 = arith.subf %851, %854 : vector<8x8xf32>
    %856 = math.exp %855 : vector<8x8xf32>
    %cst_291 = arith.constant dense<0.000000e+00> : vector<8xf32>
    %857 = vector.multi_reduction <add>, %856, %cst_291 [1] : vector<8x8xf32> to vector<8xf32>
    %858 = vector.shape_cast %857 : vector<8xf32> to vector<8x1xf32>
    %859 = tpu.reciprocal %858 {approx = true} : vector<8x1xf32> -> vector<8x1xf32>
    %860 = vector.broadcast %859 : vector<8x1xf32> to vector<8x8xf32>
    %861 = arith.mulf %856, %860 : vector<8x8xf32>
    %cst_292 = arith.constant dense<0.000000e+00> : vector<8x8xf32>
    %862 = tpu.matmul %861, %847, %cst_292 {dimension_numbers = #tpu.dot_dimension_numbers<[1], [0], [0], [1], [0, 0, 1, 1], [], []>} : vector<8x8xf32>, vector<8x8xf32>, vector<8x8xf32> -> vector<8x8xf32>
    %863 = vector.extract_strided_slice %766 {offsets = [24, 0], sizes = [8, 32], strides = [1, 1]} : vector<32x32xf32> to vector<8x32xf32>
    %cst_293 = arith.constant dense<0.000000e+00> : vector<8x32xf32>
    %864 = tpu.matmul %862, %863, %cst_293 {dimension_numbers = #tpu.dot_dimension_numbers<[1], [0], [0], [1], [0, 0, 1, 1], [], []>} : vector<8x8xf32>, vector<8x32xf32>, vector<8x32xf32> -> vector<8x32xf32>
    %865 = arith.addf %844, %864 : vector<8x32xf32>
    %866 = vector.extract_strided_slice %772 {offsets = [8, 0], sizes = [8, 32], strides = [1, 1]} : vector<16x32xf32> to vector<8x32xf32>
    %867 = vector.extract_strided_slice %778 {offsets = [8, 0], sizes = [8, 32], strides = [1, 1]} : vector<16x32xf32> to vector<8x32xf32>
    %868 = vector.extract_strided_slice %779 {offsets = [8, 0], sizes = [8, 32], strides = [1, 1]} : vector<16x32xf32> to vector<8x32xf32>
    %869 = vector.extract_strided_slice %866 {offsets = [0, 0], sizes = [8, 8], strides = [1, 1]} : vector<8x32xf32> to vector<8x8xf32>
    %870 = vector.extract_strided_slice %867 {offsets = [0, 0], sizes = [8, 8], strides = [1, 1]} : vector<8x32xf32> to vector<8x8xf32>
    %871 = vector.extract_strided_slice %868 {offsets = [0, 0], sizes = [8, 8], strides = [1, 1]} : vector<8x32xf32> to vector<8x8xf32>
    %872 = tpu.transpose %870, [1, 0] : vector<8x8xf32> -> vector<8x8xf32>
    %cst_294 = arith.constant dense<0.000000e+00> : vector<8x8xf32>
    %873 = tpu.matmul %869, %872, %cst_294 {dimension_numbers = #tpu.dot_dimension_numbers<[1], [0], [0], [1], [0, 0, 1, 1], [], []>} : vector<8x8xf32>, vector<8x8xf32>, vector<8x8xf32> -> vector<8x8xf32>
    %cst_295 = arith.constant 0.353553385 : f32
    %874 = vector.broadcast %cst_295 : f32 to vector<8x8xf32>
    %875 = arith.mulf %873, %874 : vector<8x8xf32>
    %cst_296 = arith.constant dense<0xFF800000> : vector<8xf32>
    %876 = vector.multi_reduction <maximumf>, %875, %cst_296 [1] : vector<8x8xf32> to vector<8xf32>
    %877 = vector.shape_cast %876 : vector<8xf32> to vector<8x1xf32>
    %878 = vector.broadcast %877 : vector<8x1xf32> to vector<8x8xf32>
    %879 = arith.subf %875, %878 : vector<8x8xf32>
    %880 = math.exp %879 : vector<8x8xf32>
    %cst_297 = arith.constant dense<0.000000e+00> : vector<8xf32>
    %881 = vector.multi_reduction <add>, %880, %cst_297 [1] : vector<8x8xf32> to vector<8xf32>
    %882 = vector.shape_cast %881 : vector<8xf32> to vector<8x1xf32>
    %883 = tpu.reciprocal %882 {approx = true} : vector<8x1xf32> -> vector<8x1xf32>
    %884 = vector.broadcast %883 : vector<8x1xf32> to vector<8x8xf32>
    %885 = arith.mulf %880, %884 : vector<8x8xf32>
    %cst_298 = arith.constant dense<0.000000e+00> : vector<8x8xf32>
    %886 = tpu.matmul %885, %871, %cst_298 {dimension_numbers = #tpu.dot_dimension_numbers<[1], [0], [0], [1], [0, 0, 1, 1], [], []>} : vector<8x8xf32>, vector<8x8xf32>, vector<8x8xf32> -> vector<8x8xf32>
    %887 = vector.extract_strided_slice %766 {offsets = [0, 0], sizes = [8, 32], strides = [1, 1]} : vector<32x32xf32> to vector<8x32xf32>
    %cst_299 = arith.constant dense<0.000000e+00> : vector<8x32xf32>
    %888 = tpu.matmul %886, %887, %cst_299 {dimension_numbers = #tpu.dot_dimension_numbers<[1], [0], [0], [1], [0, 0, 1, 1], [], []>} : vector<8x8xf32>, vector<8x32xf32>, vector<8x32xf32> -> vector<8x32xf32>
    %889 = vector.extract_strided_slice %866 {offsets = [0, 8], sizes = [8, 8], strides = [1, 1]} : vector<8x32xf32> to vector<8x8xf32>
    %890 = vector.extract_strided_slice %867 {offsets = [0, 8], sizes = [8, 8], strides = [1, 1]} : vector<8x32xf32> to vector<8x8xf32>
    %891 = vector.extract_strided_slice %868 {offsets = [0, 8], sizes = [8, 8], strides = [1, 1]} : vector<8x32xf32> to vector<8x8xf32>
    %892 = tpu.transpose %890, [1, 0] : vector<8x8xf32> -> vector<8x8xf32>
    %cst_300 = arith.constant dense<0.000000e+00> : vector<8x8xf32>
    %893 = tpu.matmul %889, %892, %cst_300 {dimension_numbers = #tpu.dot_dimension_numbers<[1], [0], [0], [1], [0, 0, 1, 1], [], []>} : vector<8x8xf32>, vector<8x8xf32>, vector<8x8xf32> -> vector<8x8xf32>
    %cst_301 = arith.constant 0.353553385 : f32
    %894 = vector.broadcast %cst_301 : f32 to vector<8x8xf32>
    %895 = arith.mulf %893, %894 : vector<8x8xf32>
    %cst_302 = arith.constant dense<0xFF800000> : vector<8xf32>
    %896 = vector.multi_reduction <maximumf>, %895, %cst_302 [1] : vector<8x8xf32> to vector<8xf32>
    %897 = vector.shape_cast %896 : vector<8xf32> to vector<8x1xf32>
    %898 = vector.broadcast %897 : vector<8x1xf32> to vector<8x8xf32>
    %899 = arith.subf %895, %898 : vector<8x8xf32>
    %900 = math.exp %899 : vector<8x8xf32>
    %cst_303 = arith.constant dense<0.000000e+00> : vector<8xf32>
    %901 = vector.multi_reduction <add>, %900, %cst_303 [1] : vector<8x8xf32> to vector<8xf32>
    %902 = vector.shape_cast %901 : vector<8xf32> to vector<8x1xf32>
    %903 = tpu.reciprocal %902 {approx = true} : vector<8x1xf32> -> vector<8x1xf32>
    %904 = vector.broadcast %903 : vector<8x1xf32> to vector<8x8xf32>
    %905 = arith.mulf %900, %904 : vector<8x8xf32>
    %cst_304 = arith.constant dense<0.000000e+00> : vector<8x8xf32>
    %906 = tpu.matmul %905, %891, %cst_304 {dimension_numbers = #tpu.dot_dimension_numbers<[1], [0], [0], [1], [0, 0, 1, 1], [], []>} : vector<8x8xf32>, vector<8x8xf32>, vector<8x8xf32> -> vector<8x8xf32>
    %907 = vector.extract_strided_slice %766 {offsets = [8, 0], sizes = [8, 32], strides = [1, 1]} : vector<32x32xf32> to vector<8x32xf32>
    %cst_305 = arith.constant dense<0.000000e+00> : vector<8x32xf32>
    %908 = tpu.matmul %906, %907, %cst_305 {dimension_numbers = #tpu.dot_dimension_numbers<[1], [0], [0], [1], [0, 0, 1, 1], [], []>} : vector<8x8xf32>, vector<8x32xf32>, vector<8x32xf32> -> vector<8x32xf32>
    %909 = arith.addf %888, %908 : vector<8x32xf32>
    %910 = vector.extract_strided_slice %866 {offsets = [0, 16], sizes = [8, 8], strides = [1, 1]} : vector<8x32xf32> to vector<8x8xf32>
    %911 = vector.extract_strided_slice %867 {offsets = [0, 16], sizes = [8, 8], strides = [1, 1]} : vector<8x32xf32> to vector<8x8xf32>
    %912 = vector.extract_strided_slice %868 {offsets = [0, 16], sizes = [8, 8], strides = [1, 1]} : vector<8x32xf32> to vector<8x8xf32>
    %913 = tpu.transpose %911, [1, 0] : vector<8x8xf32> -> vector<8x8xf32>
    %cst_306 = arith.constant dense<0.000000e+00> : vector<8x8xf32>
    %914 = tpu.matmul %910, %913, %cst_306 {dimension_numbers = #tpu.dot_dimension_numbers<[1], [0], [0], [1], [0, 0, 1, 1], [], []>} : vector<8x8xf32>, vector<8x8xf32>, vector<8x8xf32> -> vector<8x8xf32>
    %cst_307 = arith.constant 0.353553385 : f32
    %915 = vector.broadcast %cst_307 : f32 to vector<8x8xf32>
    %916 = arith.mulf %914, %915 : vector<8x8xf32>
    %cst_308 = arith.constant dense<0xFF800000> : vector<8xf32>
    %917 = vector.multi_reduction <maximumf>, %916, %cst_308 [1] : vector<8x8xf32> to vector<8xf32>
    %918 = vector.shape_cast %917 : vector<8xf32> to vector<8x1xf32>
    %919 = vector.broadcast %918 : vector<8x1xf32> to vector<8x8xf32>
    %920 = arith.subf %916, %919 : vector<8x8xf32>
    %921 = math.exp %920 : vector<8x8xf32>
    %cst_309 = arith.constant dense<0.000000e+00> : vector<8xf32>
    %922 = vector.multi_reduction <add>, %921, %cst_309 [1] : vector<8x8xf32> to vector<8xf32>
    %923 = vector.shape_cast %922 : vector<8xf32> to vector<8x1xf32>
    %924 = tpu.reciprocal %923 {approx = true} : vector<8x1xf32> -> vector<8x1xf32>
    %925 = vector.broadcast %924 : vector<8x1xf32> to vector<8x8xf32>
    %926 = arith.mulf %921, %925 : vector<8x8xf32>
    %cst_310 = arith.constant dense<0.000000e+00> : vector<8x8xf32>
    %927 = tpu.matmul %926, %912, %cst_310 {dimension_numbers = #tpu.dot_dimension_numbers<[1], [0], [0], [1], [0, 0, 1, 1], [], []>} : vector<8x8xf32>, vector<8x8xf32>, vector<8x8xf32> -> vector<8x8xf32>
    %928 = vector.extract_strided_slice %766 {offsets = [16, 0], sizes = [8, 32], strides = [1, 1]} : vector<32x32xf32> to vector<8x32xf32>
    %cst_311 = arith.constant dense<0.000000e+00> : vector<8x32xf32>
    %929 = tpu.matmul %927, %928, %cst_311 {dimension_numbers = #tpu.dot_dimension_numbers<[1], [0], [0], [1], [0, 0, 1, 1], [], []>} : vector<8x8xf32>, vector<8x32xf32>, vector<8x32xf32> -> vector<8x32xf32>
    %930 = arith.addf %909, %929 : vector<8x32xf32>
    %931 = vector.extract_strided_slice %866 {offsets = [0, 24], sizes = [8, 8], strides = [1, 1]} : vector<8x32xf32> to vector<8x8xf32>
    %932 = vector.extract_strided_slice %867 {offsets = [0, 24], sizes = [8, 8], strides = [1, 1]} : vector<8x32xf32> to vector<8x8xf32>
    %933 = vector.extract_strided_slice %868 {offsets = [0, 24], sizes = [8, 8], strides = [1, 1]} : vector<8x32xf32> to vector<8x8xf32>
    %934 = tpu.transpose %932, [1, 0] : vector<8x8xf32> -> vector<8x8xf32>
    %cst_312 = arith.constant dense<0.000000e+00> : vector<8x8xf32>
    %935 = tpu.matmul %931, %934, %cst_312 {dimension_numbers = #tpu.dot_dimension_numbers<[1], [0], [0], [1], [0, 0, 1, 1], [], []>} : vector<8x8xf32>, vector<8x8xf32>, vector<8x8xf32> -> vector<8x8xf32>
    %cst_313 = arith.constant 0.353553385 : f32
    %936 = vector.broadcast %cst_313 : f32 to vector<8x8xf32>
    %937 = arith.mulf %935, %936 : vector<8x8xf32>
    %cst_314 = arith.constant dense<0xFF800000> : vector<8xf32>
    %938 = vector.multi_reduction <maximumf>, %937, %cst_314 [1] : vector<8x8xf32> to vector<8xf32>
    %939 = vector.shape_cast %938 : vector<8xf32> to vector<8x1xf32>
    %940 = vector.broadcast %939 : vector<8x1xf32> to vector<8x8xf32>
    %941 = arith.subf %937, %940 : vector<8x8xf32>
    %942 = math.exp %941 : vector<8x8xf32>
    %cst_315 = arith.constant dense<0.000000e+00> : vector<8xf32>
    %943 = vector.multi_reduction <add>, %942, %cst_315 [1] : vector<8x8xf32> to vector<8xf32>
    %944 = vector.shape_cast %943 : vector<8xf32> to vector<8x1xf32>
    %945 = tpu.reciprocal %944 {approx = true} : vector<8x1xf32> -> vector<8x1xf32>
    %946 = vector.broadcast %945 : vector<8x1xf32> to vector<8x8xf32>
    %947 = arith.mulf %942, %946 : vector<8x8xf32>
    %cst_316 = arith.constant dense<0.000000e+00> : vector<8x8xf32>
    %948 = tpu.matmul %947, %933, %cst_316 {dimension_numbers = #tpu.dot_dimension_numbers<[1], [0], [0], [1], [0, 0, 1, 1], [], []>} : vector<8x8xf32>, vector<8x8xf32>, vector<8x8xf32> -> vector<8x8xf32>
    %949 = vector.extract_strided_slice %766 {offsets = [24, 0], sizes = [8, 32], strides = [1, 1]} : vector<32x32xf32> to vector<8x32xf32>
    %cst_317 = arith.constant dense<0.000000e+00> : vector<8x32xf32>
    %950 = tpu.matmul %948, %949, %cst_317 {dimension_numbers = #tpu.dot_dimension_numbers<[1], [0], [0], [1], [0, 0, 1, 1], [], []>} : vector<8x8xf32>, vector<8x32xf32>, vector<8x32xf32> -> vector<8x32xf32>
    %951 = arith.addf %930, %950 : vector<8x32xf32>
    %952 = tpu.concatenate %865, %951 in 0 : vector<8x32xf32>, vector<8x32xf32> -> vector<16x32xf32>
    %953 = vector.broadcast %767 : vector<1x32xf32> to vector<16x32xf32>
    %954 = arith.addf %952, %953 : vector<16x32xf32>
    %955 = arith.addf %761, %954 : vector<16x32xf32>
    %c1_318 = arith.constant 1 : index
    %c0_319 = arith.constant 0 : index
    %c0_320 = arith.constant 0 : index
    %956 = vector.load %arg20[%c1_318, %c0_319, %c0_320] : memref<2x3x32xf32, #tpu.memory_space<vmem>>, vector<1x3x32xf32>
    %957 = vector.shape_cast %956 : vector<1x3x32xf32> to vector<3x32xf32>
    %958 = vector.extract_strided_slice %957 {offsets = [1, 0], sizes = [1, 32], strides = [1, 1]} : vector<3x32xf32> to vector<1x32xf32>
    %c1_321 = arith.constant 1 : index
    %c0_322 = arith.constant 0 : index
    %c0_323 = arith.constant 0 : index
    %959 = vector.load %arg21[%c1_321, %c0_322, %c0_323] : memref<2x3x32xf32, #tpu.memory_space<vmem>>, vector<1x3x32xf32>
    %960 = vector.shape_cast %959 : vector<1x3x32xf32> to vector<3x32xf32>
    %961 = vector.extract_strided_slice %960 {offsets = [1, 0], sizes = [1, 32], strides = [1, 1]} : vector<3x32xf32> to vector<1x32xf32>
    %cst_324 = arith.constant dense<0.000000e+00> : vector<16xf32>
    %962 = vector.multi_reduction <add>, %955, %cst_324 [1] : vector<16x32xf32> to vector<16xf32>
    %963 = vector.shape_cast %962 : vector<16xf32> to vector<16x1xf32>
    %cst_325 = arith.constant 3.200000e+01 : f32
    %964 = vector.broadcast %cst_325 : f32 to vector<16x1xf32>
    %965 = arith.divf %963, %964 : vector<16x1xf32>
    %966 = vector.broadcast %965 : vector<16x1xf32> to vector<16x32xf32>
    %967 = arith.subf %955, %966 : vector<16x32xf32>
    %968 = arith.mulf %967, %967 : vector<16x32xf32>
    %cst_326 = arith.constant dense<0.000000e+00> : vector<16xf32>
    %969 = vector.multi_reduction <add>, %968, %cst_326 [1] : vector<16x32xf32> to vector<16xf32>
    %970 = vector.shape_cast %969 : vector<16xf32> to vector<16x1xf32>
    %cst_327 = arith.constant 3.200000e+01 : f32
    %971 = vector.broadcast %cst_327 : f32 to vector<16x1xf32>
    %972 = arith.divf %970, %971 : vector<16x1xf32>
    %973 = vector.broadcast %965 : vector<16x1xf32> to vector<16x32xf32>
    %974 = arith.subf %955, %973 : vector<16x32xf32>
    %cst_328 = arith.constant 9.99999974E-6 : f32
    %975 = vector.broadcast %cst_328 : f32 to vector<16x1xf32>
    %976 = arith.addf %972, %975 : vector<16x1xf32>
    %977 = math.rsqrt %976 : vector<16x1xf32>
    %978 = vector.broadcast %977 : vector<16x1xf32> to vector<16x32xf32>
    %979 = arith.mulf %974, %978 : vector<16x32xf32>
    %980 = vector.broadcast %958 : vector<1x32xf32> to vector<16x32xf32>
    %981 = arith.mulf %979, %980 : vector<16x32xf32>
    %982 = vector.broadcast %961 : vector<1x32xf32> to vector<16x32xf32>
    %983 = arith.addf %981, %982 : vector<16x32xf32>
    %c1_329 = arith.constant 1 : index
    %c0_330 = arith.constant 0 : index
    %c0_331 = arith.constant 0 : index
    %984 = vector.load %arg16[%c1_329, %c0_330, %c0_331] : memref<2x32x64xf32, #tpu.memory_space<vmem>>, vector<1x32x64xf32>
    %985 = vector.shape_cast %984 : vector<1x32x64xf32> to vector<32x64xf32>
    %cst_332 = arith.constant dense<0.000000e+00> : vector<16x64xf32>
    %986 = tpu.matmul %983, %985, %cst_332 {dimension_numbers = #tpu.dot_dimension_numbers<[1], [0], [0], [1], [0, 0, 1, 1], [], []>} : vector<16x32xf32>, vector<32x64xf32>, vector<16x64xf32> -> vector<16x64xf32>
    %c1_333 = arith.constant 1 : index
    %c0_334 = arith.constant 0 : index
    %987 = vector.load %arg17[%c1_333, %c0_334] : memref<2x64xf32, #tpu.memory_space<vmem>>, vector<1x64xf32>
    %988 = vector.broadcast %987 : vector<1x64xf32> to vector<16x64xf32>
    %989 = arith.addf %986, %988 : vector<16x64xf32>
    %cst_335 = arith.constant 0.000000e+00 : f32
    %990 = vector.broadcast %cst_335 : f32 to vector<16x64xf32>
    %991 = arith.maximumf %989, %990 : vector<16x64xf32>
    %c1_336 = arith.constant 1 : index
    %c0_337 = arith.constant 0 : index
    %c0_338 = arith.constant 0 : index
    %992 = vector.load %arg18[%c1_336, %c0_337, %c0_338] : memref<2x64x32xf32, #tpu.memory_space<vmem>>, vector<1x64x32xf32>
    %993 = vector.shape_cast %992 : vector<1x64x32xf32> to vector<64x32xf32>
    %cst_339 = arith.constant dense<0.000000e+00> : vector<16x32xf32>
    %994 = tpu.matmul %991, %993, %cst_339 {dimension_numbers = #tpu.dot_dimension_numbers<[1], [0], [0], [1], [0, 0, 1, 1], [], []>} : vector<16x64xf32>, vector<64x32xf32>, vector<16x32xf32> -> vector<16x32xf32>
    %c1_340 = arith.constant 1 : index
    %c0_341 = arith.constant 0 : index
    %995 = vector.load %arg19[%c1_340, %c0_341] : memref<2x32xf32, #tpu.memory_space<vmem>>, vector<1x32xf32>
    %996 = vector.broadcast %995 : vector<1x32xf32> to vector<16x32xf32>
    %997 = arith.addf %994, %996 : vector<16x32xf32>
    %998 = arith.addf %983, %997 : vector<16x32xf32>
    %c1_342 = arith.constant 1 : index
    %c0_343 = arith.constant 0 : index
    %c0_344 = arith.constant 0 : index
    %999 = vector.load %arg20[%c1_342, %c0_343, %c0_344] : memref<2x3x32xf32, #tpu.memory_space<vmem>>, vector<1x3x32xf32>
    %1000 = vector.shape_cast %999 : vector<1x3x32xf32> to vector<3x32xf32>
    %1001 = vector.extract_strided_slice %1000 {offsets = [2, 0], sizes = [1, 32], strides = [1, 1]} : vector<3x32xf32> to vector<1x32xf32>
    %c1_345 = arith.constant 1 : index
    %c0_346 = arith.constant 0 : index
    %c0_347 = arith.constant 0 : index
    %1002 = vector.load %arg21[%c1_345, %c0_346, %c0_347] : memref<2x3x32xf32, #tpu.memory_space<vmem>>, vector<1x3x32xf32>
    %1003 = vector.shape_cast %1002 : vector<1x3x32xf32> to vector<3x32xf32>
    %1004 = vector.extract_strided_slice %1003 {offsets = [2, 0], sizes = [1, 32], strides = [1, 1]} : vector<3x32xf32> to vector<1x32xf32>
    %cst_348 = arith.constant dense<0.000000e+00> : vector<16xf32>
    %1005 = vector.multi_reduction <add>, %998, %cst_348 [1] : vector<16x32xf32> to vector<16xf32>
    %1006 = vector.shape_cast %1005 : vector<16xf32> to vector<16x1xf32>
    %cst_349 = arith.constant 3.200000e+01 : f32
    %1007 = vector.broadcast %cst_349 : f32 to vector<16x1xf32>
    %1008 = arith.divf %1006, %1007 : vector<16x1xf32>
    %1009 = vector.broadcast %1008 : vector<16x1xf32> to vector<16x32xf32>
    %1010 = arith.subf %998, %1009 : vector<16x32xf32>
    %1011 = arith.mulf %1010, %1010 : vector<16x32xf32>
    %cst_350 = arith.constant dense<0.000000e+00> : vector<16xf32>
    %1012 = vector.multi_reduction <add>, %1011, %cst_350 [1] : vector<16x32xf32> to vector<16xf32>
    %1013 = vector.shape_cast %1012 : vector<16xf32> to vector<16x1xf32>
    %cst_351 = arith.constant 3.200000e+01 : f32
    %1014 = vector.broadcast %cst_351 : f32 to vector<16x1xf32>
    %1015 = arith.divf %1013, %1014 : vector<16x1xf32>
    %1016 = vector.broadcast %1008 : vector<16x1xf32> to vector<16x32xf32>
    %1017 = arith.subf %998, %1016 : vector<16x32xf32>
    %cst_352 = arith.constant 9.99999974E-6 : f32
    %1018 = vector.broadcast %cst_352 : f32 to vector<16x1xf32>
    %1019 = arith.addf %1015, %1018 : vector<16x1xf32>
    %1020 = math.rsqrt %1019 : vector<16x1xf32>
    %1021 = vector.broadcast %1020 : vector<16x1xf32> to vector<16x32xf32>
    %1022 = arith.mulf %1017, %1021 : vector<16x32xf32>
    %1023 = vector.broadcast %1001 : vector<1x32xf32> to vector<16x32xf32>
    %1024 = arith.mulf %1022, %1023 : vector<16x32xf32>
    %1025 = vector.broadcast %1004 : vector<1x32xf32> to vector<16x32xf32>
    %1026 = arith.addf %1024, %1025 : vector<16x32xf32>
    %c0_353 = arith.constant 0 : index
    %c0_354 = arith.constant 0 : index
    %1027 = vector.load %arg6[%c0_353, %c0_354] : memref<32x128xf32, #tpu.memory_space<vmem>>, vector<32x128xf32>
    %cst_355 = arith.constant dense<0.000000e+00> : vector<16x128xf32>
    %1028 = tpu.matmul %1026, %1027, %cst_355 {dimension_numbers = #tpu.dot_dimension_numbers<[1], [0], [0], [1], [0, 0, 1, 1], [], []>} : vector<16x32xf32>, vector<32x128xf32>, vector<16x128xf32> -> vector<16x128xf32>
    %c0_356 = arith.constant 0 : index
    %c0_357 = arith.constant 0 : index
    %1029 = vector.load %arg7[%c0_356, %c0_357] : memref<1x128xf32, #tpu.memory_space<vmem>>, vector<1x128xf32>
    %1030 = vector.broadcast %1029 : vector<1x128xf32> to vector<16x128xf32>
    %1031 = arith.addf %1028, %1030 : vector<16x128xf32>
    %c0_358 = arith.constant 0 : index
    %c0_359 = arith.constant 0 : index
    %1032 = vector.load %arg22[%c0_358, %c0_359] : memref<16x128xf32, #tpu.memory_space<vmem>>, vector<16x128xf32>
    tpu.vector_store %arg22[%c0_358, %c0_359], %1031 {strides = array<i32>} : memref<16x128xf32, #tpu.memory_space<vmem>>, vector<16x128xf32>,
    return
  }
}

</mosaic_0001>

<bundles_post_ra>
// kernel: parallel_decoder_forward.1
= control target key start
LH: loop header
LB: loop body
LE: loop exit
PB: predicated region body
PF: predicated region fallthrough
CT: control target
= control target key end

     0   :  { %s12468_s0 = inlined_call_operand.vmem [shape: f32[16,16], index: 0, kind: input, shape index: {}]   ;;  %s12469_s1 = inlined_call_operand.vmem [shape: s32[2,8], index: 1, kind: input, shape index: {}]   ;;  %s12470_s2 = inlined_call_operand.vmem [shape: f32[16,32], index: 2, kind: input, shape index: {}]   ;;  %s12471_s3 = inlined_call_operand.hbm [shape: f32[16,32], index: 3, kind: input, shape index: {}]   ;;  %s12472_s4 = inlined_call_operand.hbm [shape: f32[1,32], index: 4, kind: input, shape index: {}]   ;;  %s12473_s5 = inlined_call_operand.hbm [shape: f32[8,32], index: 5, kind: input, shape index: {}]   ;;  %s12474_s6 = inlined_call_operand.hbm [shape: f32[32,128], index: 6, kind: input, shape index: {}]   ;;  %s12475_s7 = inlined_call_operand.hbm [shape: f32[1,128], index: 7, kind: input, shape index: {}]   ;;  %s12476_s8 = inlined_call_operand.vmem [shape: f32[2,32,96], index: 8, kind: input, shape index: {}]   ;;  %s12477_s9 = inlined_call_operand.hbm [shape: f32[2,96], index: 9, kind: input, shape index: {}]   ;;  %s12478_s10 = inlined_call_operand.vmem [shape: f32[2,32,32], index: 10, kind: input, shape index: {}]   ;;  %s12479_s11 = inlined_call_operand.hbm [shape: f32[2,32], index: 11, kind: input, shape index: {}]   ;;  %s12480_s12 = inlined_call_operand.vmem [shape: f32[2,32,96], index: 12, kind: input, shape index: {}]   ;;  %s12481_s13 = inlined_call_operand.hbm [shape: f32[2,96], index: 13, kind: input, shape index: {}]   ;;  %s12482_s14 = inlined_call_operand.hbm [shape: f32[2,32,32], index: 14, kind: input, shape index: {}]   ;;  %s12483_s15 = inlined_call_operand.hbm [shape: f32[2,32], index: 15, kind: input, shape index: {}]   ;;  %s12484_s16 = inlined_call_operand.hbm [shape: f32[2,32,64], index: 16, kind: input, shape index: {}]   ;;  %s12485_s17 = inlined_call_operand.hbm [shape: f32[2,64], index: 17, kind: input, shape index: {}]   ;;  %s12486_s18 = inlined_call_operand.vmem [shape: f32[2,64,32], index: 18, kind: input, shape index: {}]   ;;  %s12487_s19 = inlined_call_operand.hbm [shape: f32[2,32], index: 19, kind: input, shape index: {}]   ;;  %s12488_s20 = inlined_call_operand.vmem [shape: f32[2,3,32], index: 20, kind: input, shape index: {}]   ;;  %s12489_s21 = inlined_call_operand.vmem [shape: f32[2,3,32], index: 21, kind: input, shape index: {}]   ;;  %s12490_s22 = inlined_call_operand.vmem [shape: f32[16,128], index: 22, kind: output, shape index: {}]  }
   0x1   :  { %12498 = sst [smem:[#allocation29_spill]] %s12468_s0 }
   0x2   :  { %12499 = sst [smem:[#allocation30_spill]] %s12469_s1 }
   0x3   :  { %12500 = sst [smem:[#allocation31_spill]] %s12470_s2 }
   0x4   :  { %12501 = sst [smem:[#allocation32_spill]] %s12471_s3 }
   0x5   :  { %12502 = sst [smem:[#allocation33_spill]] %s12472_s4 }
   0x6   :  { %12503 = sst [smem:[#allocation34_spill]] %s12473_s5 }
   0x7   :  { %12504 = sst [smem:[#allocation35_spill]] %s12474_s6 }
   0x8   :  { %12505 = sst [smem:[#allocation36_spill]] %s12490_s22 }
   0x9   :  { %27 = vsyncpa [#allocation3], 0 }
   0xa   :  { %28 = vsyncpa [#allocation5], 0 }
   0xb   :  { %29 = vsyncpa [#allocation8], 0 }
   0xc   :  { %30 = vsyncpa [#allocation11], 0 }
   0xd   :  { %31 = vsyncpa [#allocation14], 0 }
   0xe   :  { %32 = vsyncpa [#allocation17], 0 }
   0xf   :  { %33 = vsyncpa [#allocation20], 0  ;;  %s11039_s3 = smov [#allocation4]   ;;  %s12506_s4 = sld [smem:[#allocation33_spill]] }
  0x10   :  { %s58_s28 = sshll.u32 %s11039_s3, 4  ;;  %s59_s28 = int_to_ptr.vmem [resolvable:$true] %s58_s28 }
  0x15   :  { %s10739_s0 = scalar_lea.hbm %s12506_s4, 16 }
  0x16   :  { %p10740_p0 = scmp.ne.s32.totalorder %s12506_s4, %s10739_s0  ;;  %p10743_p1 = scmp.lt.u32.totalorder %s10739_s0, %s12506_s4 }
  0x18   :  { %p10745_p2 = pnand %p10743_p1, %p10740_p0 }
  0x1a   :  { %10748 = shalt.err (!%p10745_p2)
}
  0x1b   :  { %s10749_s6 = scalar_lea.vmem %s59_s28, 16  ;;  %s10753_s25 = scalar_lea.vmem %s59_s28, 32 }
  0x1c   :  { %p10750_p3 = scmp.ne.s32.totalorder %s59_s28, %s10749_s6  ;;  %p10754_p4 = scmp.lt.s32.totalorder %s59_s28, %s59_s28 }
  0x1d   :  { %p10755_p5 = scmp.lt.s32.totalorder %s10753_s25, %s10749_s6 }
  0x1f   :  { %p10756_p6 = por %p10755_p5, %p10754_p4 }
  0x21   :  { %p10757_p7 = pnand %p10756_p6, %p10750_p3 }
  0x23   :  { %10760 = shalt.err (!%p10757_p7)
}
  0x24   :  { %61 = dma.hbm_to_vmem [thread:$0]  %s12506_s4, 16, %s59_s28, [#allocation5]  }
  0x25   :  { %s11040_s27 = smov [#allocation7]   ;;  %s11041_s29 = smov [#allocation10]  }
  0x26   :  { %s77_s3 = sshll.u32 %s11040_s27, 4  ;;  %s102_s30 = sshll.u32 %s11041_s29, 4  ;;  %s78_s3 = int_to_ptr.vmem [resolvable:$true] %s77_s3  ;;  %s103_s30 = int_to_ptr.vmem [resolvable:$true] %s102_s30 }
  0x27   :  { %s12507_s1 = sld [smem:[#allocation35_spill]] }
  0x2d   :  { %s10761_s5 = scalar_lea.hbm %s12507_s1, 512 }
  0x2e   :  { %p10762_p8 = scmp.ne.s32.totalorder %s12507_s1, %s10761_s5  ;;  %p10765_p9 = scmp.lt.u32.totalorder %s10761_s5, %s12507_s1 }
  0x30   :  { %p10767_p10 = pnand %p10765_p9, %p10762_p8 }
  0x32   :  { %10770 = shalt.err (!%p10767_p10)
}
  0x33   :  { %s10771_s28 = scalar_lea.vmem %s78_s3, 512  ;;  %p10776_p12 = scmp.lt.s32.totalorder %s78_s3, %s78_s3 }
  0x34   :  { %p10772_p11 = scmp.ne.s32.totalorder %s78_s3, %s10771_s28  ;;  %p10777_p13 = scmp.lt.s32.totalorder %s10771_s28, %s10771_s28 }
  0x36   :  { %p10778_p0 = por %p10777_p13, %p10776_p12 }
  0x38   :  { %p10779_p1 = pnand %p10778_p0, %p10772_p11 }
  0x3a   :  { %10782 = shalt.err (!%p10779_p1)
}
  0x3b   :  { %s11042_s4 = smov 128   ;;  %s11043_s26 = smov 8  }
  0x3c   :  { %83 = dma.hbm_to_vmem [thread:$0]  %s12507_s1, 512, %s78_s3, [#allocation8], %s11042_s4, %s11042_s4, %s11043_s26  }
  0x3d   :  { %s10783_s0 = scalar_lea.hbm %s12477_s9, 32 }
  0x3e   :  { %p10784_p2 = scmp.ne.s32.totalorder %s12477_s9, %s10783_s0  ;;  %p10787_p3 = scmp.lt.u32.totalorder %s10783_s0, %s12477_s9 }
  0x40   :  { %p10789_p4 = pnand %p10787_p3, %p10784_p2 }
  0x42   :  { %10792 = shalt.err (!%p10789_p4)
}
  0x43   :  { %s10793_s25 = scalar_lea.vmem %s103_s30, 32  ;;  %p10798_p6 = scmp.lt.s32.totalorder %s103_s30, %s103_s30 }
  0x44   :  { %p10794_p5 = scmp.ne.s32.totalorder %s103_s30, %s10793_s25  ;;  %p10799_p7 = scmp.lt.s32.totalorder %s10793_s25, %s10793_s25 }
  0x46   :  { %p10800_p8 = por %p10799_p7, %p10798_p6 }
  0x48   :  { %p10801_p9 = pnand %p10800_p8, %p10794_p5 }
  0x4a   :  { %10804 = shalt.err (!%p10801_p9)
}
  0x4b   :  { %105 = dma.hbm_to_vmem [thread:$0]  %s12477_s9, 32, %s103_s30, [#allocation11]  }
  0x4c   :  { %s11044_s28 = smov [#allocation13]   ;;  %s11045_s2 = smov [#allocation16]  }
  0x4d   :  { %s126_s22 = sshll.u32 %s11044_s28, 4  ;;  %s148_s27 = sshll.u32 %s11045_s2, 4  ;;  %s127_s22 = int_to_ptr.vmem [resolvable:$true] %s126_s22  ;;  %s149_s27 = int_to_ptr.vmem [resolvable:$true] %s148_s27 }
  0x4e   :  { %s10805_s23 = scalar_lea.hbm %s12481_s13, 32 }
  0x4f   :  { %p10806_p10 = scmp.ne.s32.totalorder %s12481_s13, %s10805_s23  ;;  %p10809_p11 = scmp.lt.u32.totalorder %s10805_s23, %s12481_s13 }
  0x51   :  { %p10811_p12 = pnand %p10809_p11, %p10806_p10 }
  0x53   :  { %10814 = shalt.err (!%p10811_p12)
}
  0x54   :  { %s10815_s9 = scalar_lea.vmem %s127_s22, 32  ;;  %p10820_p0 = scmp.lt.s32.totalorder %s127_s22, %s127_s22 }
  0x55   :  { %p10816_p13 = scmp.ne.s32.totalorder %s127_s22, %s10815_s9  ;;  %p10821_p1 = scmp.lt.s32.totalorder %s10815_s9, %s10815_s9 }
  0x57   :  { %p10822_p2 = por %p10821_p1, %p10820_p0 }
  0x59   :  { %p10823_p3 = pnand %p10822_p2, %p10816_p13 }
  0x5b   :  { %10826 = shalt.err (!%p10823_p3)
}
  0x5c   :  { %129 = dma.hbm_to_vmem [thread:$0]  %s12481_s13, 32, %s127_s22, [#allocation14]  }
  0x5d   :  { %s10827_s2 = scalar_lea.hbm %s12483_s15, 32 }
  0x5e   :  { %p10828_p4 = scmp.ne.s32.totalorder %s12483_s15, %s10827_s2  ;;  %p10831_p5 = scmp.lt.u32.totalorder %s10827_s2, %s12483_s15 }
  0x60   :  { %p10833_p6 = pnand %p10831_p5, %p10828_p4 }
  0x62   :  { %10836 = shalt.err (!%p10833_p6)
}
  0x63   :  { %s10837_s24 = scalar_lea.vmem %s149_s27, 32  ;;  %p10842_p8 = scmp.lt.s32.totalorder %s149_s27, %s149_s27 }
  0x64   :  { %p10838_p7 = scmp.ne.s32.totalorder %s149_s27, %s10837_s24  ;;  %p10843_p9 = scmp.lt.s32.totalorder %s10837_s24, %s10837_s24 }
  0x66   :  { %p10844_p10 = por %p10843_p9, %p10842_p8 }
  0x68   :  { %p10845_p11 = pnand %p10844_p10, %p10838_p7 }
  0x6a   :  { %10848 = shalt.err (!%p10845_p11)
}
  0x6b   :  { %151 = dma.hbm_to_vmem [thread:$0]  %s12483_s15, 32, %s149_s27, [#allocation17]  }
  0x6c   :  { %s11046_s6 = smov [#allocation19]   ;;  %s11047_s9 = smov [#allocation2]  }
  0x6d   :  { %s170_s25 = sshll.u32 %s11046_s6, 4  ;;  %s45_s30 = sshll.u32 %s11047_s9, 4  ;;  %s171_s25 = int_to_ptr.vmem [resolvable:$true] %s170_s25  ;;  %s46_s30 = int_to_ptr.vmem [resolvable:$true] %s45_s30 }
  0x6e   :  { %s10849_s28 = scalar_lea.hbm %s12485_s17, 32 }
  0x6f   :  { %p10850_p12 = scmp.ne.s32.totalorder %s12485_s17, %s10849_s28  ;;  %p10853_p13 = scmp.lt.u32.totalorder %s10849_s28, %s12485_s17 }
  0x71   :  { %p10855_p0 = pnand %p10853_p13, %p10850_p12 }
  0x73   :  { %10858 = shalt.err (!%p10855_p0)
}
  0x74   :  { %s10859_s15 = scalar_lea.vmem %s171_s25, 32  ;;  %p10864_p2 = scmp.lt.s32.totalorder %s171_s25, %s171_s25 }
  0x75   :  { %p10860_p1 = scmp.ne.s32.totalorder %s171_s25, %s10859_s15  ;;  %p10865_p3 = scmp.lt.s32.totalorder %s10859_s15, %s10859_s15 }
  0x77   :  { %p10866_p4 = por %p10865_p3, %p10864_p2 }
  0x79   :  { %p10867_p5 = pnand %p10866_p4, %p10860_p1 }
  0x7b   :  { %10870 = shalt.err (!%p10867_p5)
}
  0x7c   :  { %173 = dma.hbm_to_vmem [thread:$0]  %s12485_s17, 32, %s171_s25, [#allocation20]  }
  0x7d   :  { %s12508_s22 = sld [smem:[#allocation32_spill]] }
  0x83   :  { %s10871_s6 = scalar_lea.hbm %s12508_s22, 256 }
  0x84   :  { %p10872_p6 = scmp.ne.s32.totalorder %s12508_s22, %s10871_s6  ;;  %p10875_p7 = scmp.lt.u32.totalorder %s10871_s6, %s12508_s22 }
  0x86   :  { %p10877_p8 = pnand %p10875_p7, %p10872_p6 }
  0x88   :  { %10880 = shalt.err (!%p10877_p8)
}
  0x89   :  { %s10881_s2 = scalar_lea.vmem %s46_s30, 256  ;;  %p10886_p10 = scmp.lt.s32.totalorder %s46_s30, %s46_s30 }
  0x8a   :  { %p10882_p9 = scmp.ne.s32.totalorder %s46_s30, %s10881_s2  ;;  %p10887_p11 = scmp.lt.s32.totalorder %s10881_s2, %s10881_s2 }
  0x8c   :  { %p10888_p12 = por %p10887_p11, %p10886_p10 }
  0x8e   :  { %p10889_p13 = pnand %p10888_p12, %p10882_p9 }
  0x90   :  { %10892 = shalt.err (!%p10889_p13)
}
  0x91   :  { %51 = dma.hbm_to_vmem [thread:$0]  %s12508_s22, 256, %s46_s30, [#allocation3], %s11042_s4, %s11042_s4, %s11043_s26  }
  0x92   :  { %s11048_s29 = smov [#allocation6]   ;;  %s11049_s23 = smov [#allocation9]  }
  0x93   :  { %s68_s0 = sshll.u32 %s11048_s29, 4  ;;  %s90_s15 = sshll.u32 %s11049_s23, 4  ;;  %s69_s0 = int_to_ptr.vmem [resolvable:$true] %s68_s0  ;;  %s91_s15 = int_to_ptr.vmem [resolvable:$true] %s90_s15 }
  0x94   :  { %s12509_s24 = sld [smem:[#allocation34_spill]] }
  0x9a   :  { %s10893_s13 = scalar_lea.hbm %s12509_s24, 128 }
  0x9b   :  { %p10894_p0 = scmp.ne.s32.totalorder %s12509_s24, %s10893_s13  ;;  %p10897_p1 = scmp.lt.u32.totalorder %s10893_s13, %s12509_s24 }
  0x9d   :  { %p10899_p2 = pnand %p10897_p1, %p10894_p0 }
  0x9f   :  { %10902 = shalt.err (!%p10899_p2)
}
  0xa0   :  { %s10903_s30 = scalar_lea.vmem %s69_s0, 128  ;;  %p10908_p4 = scmp.lt.s32.totalorder %s69_s0, %s69_s0 }
  0xa1   :  { %p10904_p3 = scmp.ne.s32.totalorder %s69_s0, %s10903_s30  ;;  %p10909_p5 = scmp.lt.s32.totalorder %s10903_s30, %s10903_s30 }
  0xa3   :  { %p10910_p6 = por %p10909_p5, %p10908_p4 }
  0xa5   :  { %p10911_p7 = pnand %p10910_p6, %p10904_p3 }
  0xa7   :  { %10914 = shalt.err (!%p10911_p7)
}
  0xa8   :  { %71 = dma.hbm_to_vmem [thread:$0]  %s12509_s24, 128, %s69_s0, [#allocation5]  }
  0xa9   :  { %s10915_s25 = scalar_lea.hbm %s12475_s7, 16 }
  0xaa   :  { %p10916_p8 = scmp.ne.s32.totalorder %s12475_s7, %s10915_s25  ;;  %p10919_p9 = scmp.lt.u32.totalorder %s10915_s25, %s12475_s7 }
  0xac   :  { %p10921_p10 = pnand %p10919_p9, %p10916_p8 }
  0xae   :  { %10924 = shalt.err (!%p10921_p10)
}
  0xaf   :  { %s10925_s13 = scalar_lea.vmem %s91_s15, 16  ;;  %s10929_s6 = scalar_lea.vmem %s91_s15, 32 }
  0xb0   :  { %p10926_p11 = scmp.ne.s32.totalorder %s91_s15, %s10925_s13  ;;  %p10930_p12 = scmp.lt.s32.totalorder %s91_s15, %s91_s15 }
  0xb1   :  { %p10931_p13 = scmp.lt.s32.totalorder %s10929_s6, %s10925_s13 }
  0xb3   :  { %p10932_p0 = por %p10931_p13, %p10930_p12 }
  0xb5   :  { %p10933_p1 = pnand %p10932_p0, %p10926_p11 }
  0xb7   :  { %10936 = shalt.err (!%p10933_p1)
}
  0xb8   :  { %93 = dma.hbm_to_vmem [thread:$0]  %s12475_s7, 16, %s91_s15, [#allocation8]  }
  0xb9   :  { %s11050_s9 = smov [#allocation12]   ;;  %s11051_s1 = smov [#allocation15]  }
  0xba   :  { %s114_s3 = sshll.u32 %s11050_s9, 4  ;;  %s135_s30 = sshll.u32 %s11051_s1, 4  ;;  %s115_s3 = int_to_ptr.vmem [resolvable:$true] %s114_s3  ;;  %s136_s30 = int_to_ptr.vmem [resolvable:$true] %s135_s30 }
  0xbb   :  { %s10937_s2 = scalar_lea.hbm %s12479_s11, 32 }
  0xbc   :  { %p10938_p2 = scmp.ne.s32.totalorder %s12479_s11, %s10937_s2  ;;  %p10941_p3 = scmp.lt.u32.totalorder %s10937_s2, %s12479_s11 }
  0xbe   :  { %p10943_p4 = pnand %p10941_p3, %p10938_p2 }
  0xc0   :  { %10946 = shalt.err (!%p10943_p4)
}
  0xc1   :  { %s10947_s7 = scalar_lea.vmem %s115_s3, 32  ;;  %p10952_p6 = scmp.lt.s32.totalorder %s115_s3, %s115_s3 }
  0xc2   :  { %p10948_p5 = scmp.ne.s32.totalorder %s115_s3, %s10947_s7  ;;  %p10953_p7 = scmp.lt.s32.totalorder %s10947_s7, %s10947_s7 }
  0xc4   :  { %p10954_p8 = por %p10953_p7, %p10952_p6 }
  0xc6   :  { %p10955_p9 = pnand %p10954_p8, %p10948_p5 }
  0xc8   :  { %10958 = shalt.err (!%p10955_p9)
}
  0xc9   :  { %117 = dma.hbm_to_vmem [thread:$0]  %s12479_s11, 32, %s115_s3, [#allocation11]  }
  0xca   :  { %s10959_s6 = scalar_lea.hbm %s12482_s14, 1024 }
  0xcb   :  { %p10960_p10 = scmp.ne.s32.totalorder %s12482_s14, %s10959_s6  ;;  %p10963_p11 = scmp.lt.u32.totalorder %s10959_s6, %s12482_s14 }
  0xcd   :  { %p10965_p12 = pnand %p10963_p11, %p10960_p10 }
  0xcf   :  { %10968 = shalt.err (!%p10965_p12)
}
  0xd0   :  { %s10969_s22 = scalar_lea.vmem %s136_s30, 1024  ;;  %p10974_p0 = scmp.lt.s32.totalorder %s136_s30, %s136_s30 }
  0xd1   :  { %p10970_p13 = scmp.ne.s32.totalorder %s136_s30, %s10969_s22  ;;  %p10975_p1 = scmp.lt.s32.totalorder %s10969_s22, %s10969_s22 }
  0xd3   :  { %p10976_p2 = por %p10975_p1, %p10974_p0 }
  0xd5   :  { %p10977_p3 = pnand %p10976_p2, %p10970_p13 }
  0xd7   :  { %10980 = shalt.err (!%p10977_p3)
}
  0xd8   :  { %141 = dma.hbm_to_vmem [thread:$0]  %s12482_s14, 1024, %s136_s30, [#allocation14], %s11042_s4, %s11042_s4, %s11043_s26  }
  0xd9   :  { %s11052_s28 = smov [#allocation18]   ;;  %s11053_s17 = smov [#allocation21]  }
  0xda   :  { %s157_s2 = sshll.u32 %s11052_s28, 4  ;;  %s182_s25 = sshll.u32 %s11053_s17, 4  ;;  %s158_s2 = int_to_ptr.vmem [resolvable:$true] %s157_s2  ;;  %s183_s25 = int_to_ptr.vmem [resolvable:$true] %s182_s25 }
  0xdb   :  { %s10981_s7 = scalar_lea.hbm %s12484_s16, 1024 }
  0xdc   :  { %p10982_p4 = scmp.ne.s32.totalorder %s12484_s16, %s10981_s7  ;;  %p10985_p5 = scmp.lt.u32.totalorder %s10981_s7, %s12484_s16 }
  0xde   :  { %p10987_p6 = pnand %p10985_p5, %p10982_p4 }
  0xe0   :  { %10990 = shalt.err (!%p10987_p6)
}
  0xe1   :  { %s10991_s14 = scalar_lea.vmem %s158_s2, 1024  ;;  %p10996_p8 = scmp.lt.s32.totalorder %s158_s2, %s158_s2 }
  0xe2   :  { %p10992_p7 = scmp.ne.s32.totalorder %s158_s2, %s10991_s14  ;;  %p10997_p9 = scmp.lt.s32.totalorder %s10991_s14, %s10991_s14 }
  0xe4   :  { %p10998_p10 = por %p10997_p9, %p10996_p8 }
  0xe6   :  { %p10999_p11 = pnand %p10998_p10, %p10992_p7 }
  0xe8   :  { %11002 = shalt.err (!%p10999_p11)
}
  0xe9   :  { %163 = dma.hbm_to_vmem [thread:$0]  %s12484_s16, 1024, %s158_s2, [#allocation17], %s11042_s4, %s11042_s4, %s11043_s26  }
  0xea   :  { %s11003_s9 = scalar_lea.hbm %s12487_s19, 32 }
  0xeb   :  { %p11004_p12 = scmp.ne.s32.totalorder %s12487_s19, %s11003_s9  ;;  %p11007_p13 = scmp.lt.u32.totalorder %s11003_s9, %s12487_s19 }
  0xed   :  { %p11009_p0 = pnand %p11007_p13, %p11004_p12 }
  0xef   :  { %11012 = shalt.err (!%p11009_p0)
}
  0xf0   :  { %s11013_s28 = scalar_lea.vmem %s183_s25, 32  ;;  %p11018_p2 = scmp.lt.s32.totalorder %s183_s25, %s183_s25 }
  0xf1   :  { %p11014_p1 = scmp.ne.s32.totalorder %s183_s25, %s11013_s28  ;;  %p11019_p3 = scmp.lt.s32.totalorder %s11013_s28, %s11013_s28 }
  0xf3   :  { %p11020_p4 = por %p11019_p3, %p11018_p2 }
  0xf5   :  { %p11021_p5 = pnand %p11020_p4, %p11014_p1 }
  0xf7   :  { %11024 = shalt.err (!%p11021_p5)
}
  0xf8   :  { %185 = dma.hbm_to_vmem [thread:$0]  %s12487_s19, 32, %s183_s25, [#allocation20]  }
  0xf9   :  { %11025 = dma.done.wait [#allocation3], 256  }
  0xfa   :  { %11026 = vsyncadd [#allocation3], 4294967040 }
  0xfb   :  { %11027 = dma.done.wait [#allocation5], 144  }
  0xfc   :  { %11028 = vsyncadd [#allocation5], 4294967152 }
  0xfd   :  { %11029 = dma.done.wait [#allocation8], 528  }
  0xfe   :  { %11030 = vsyncadd [#allocation8], 4294966768 }
  0xff   :  { %11031 = dma.done.wait [#allocation11], 64  }
 0x100   :  { %11032 = vsyncadd [#allocation11], 4294967232 }
 0x101   :  { %11033 = dma.done.wait [#allocation14], 1056  }
 0x102   :  { %11034 = vsyncadd [#allocation14], 4294966240 }
 0x103   :  { %11035 = dma.done.wait [#allocation17], 1056  }
 0x104   :  { %11036 = vsyncadd [#allocation17], 4294966240 }
 0x105   :  { %11037 = dma.done.wait [#allocation20], 64  }
 0x106   :  { %11038 = vsyncadd [#allocation20], 4294967232  ;;  %vm240_vm0 = vcmask 130048   ;;  %v231_v0 = vld [vmem:[#allocation2] sm:$0xff]  ;;  %v232_v1 = vld [vmem:[#allocation2 + $0x8] sm:$0xff]  ;;  %s12510_s19 = sld [smem:[#allocation29_spill]]  ;;  %v325_v28 = vlaneseq }
 0x107   :  { %v10429_v3 = vpack.c.bf16 %v232_v1, %v231_v0  ;;  %v334_v4 = vld [vmem:[%s12476_s8] sm:$0xff]  ;;  %v335_v5 = vld [vmem:[%s12476_s8 + $0x8] sm:$0xff]  ;;  %v336_v8 = vld [vmem:[%s12476_s8 + $0x10] sm:$0xff]  ;;  %vm348_vm1 = vcmask 261120   ;;  %v11054_v19 = vmov 0.0   ;;  %vm11055_vm2 = vmmov 0  }
 0x108   :  { %v10433_v6 = vpack.c.bf16 %v335_v5, %v334_v4  ;;  %v337_v9 = vld [vmem:[%s12476_s8 + $0x18] sm:$0xff]  ;;  %v9347_v11 = vld [vmem:[#allocation4] ss:$0 sm:$0xff]  ;;  %s11056_s30 = smov 120   ;;  %s11057_s6 = smov 96   ;;  %vm440_vm3 = vcmask 64512  }
 0x109   :  { %10430 = vmatprep.subr.bf16.mxu0 %v10429_v3  ;;  %v10437_v10 = vpack.c.bf16 %v337_v9, %v336_v8  ;;  %v322_v14 = vld [vmem:[#allocation6] sm:$0xff]  ;;  %v9350_v20 = vld [vmem:[#allocation10] ss:$0 sm:$0xff]  ;;  %s11058_s0 = smov 88   ;;  %s12511_s1 = sld [smem:[#allocation30_spill]]  ;;  %v11406_v30 = vshrl.u32 %v325_v28, 7 }
 0x10a   :  { %10432 = vmatpush3.bf16.msra.mxu0 %v10429_v3  ;;  %10434 = vmatprep.subr.bf16.mxu1 %v10433_v6  ;;  %v328_v31 = vand.u32 127, %v325_v28  ;;  %s11059_s22 = smov 56   ;;  %s11060_s11 = smov 64   ;;  %v11440_v57 = vld [vmem:[%s12478_s10 + $0x8] sm:$0xff]  ;;  %vm4673_vm6 = vcmask 523264  }
 0x10b   :  { %10436 = vmatpush3.bf16.msra.mxu1 %v10433_v6  ;;  %9823 = vmatprep.subr.mxu0 %v11054_v19  ;;  %v11409_v32 = vsub.s32 0, %v11406_v30  ;;  %s11061_s3 = smov 80   ;;  %s11062_s28 = smov 112  }
 0x10c   :  { %v229_v2 = vld [vmem:[%s12510_s19] sm:$0xff]  ;;  %v230_v7 = vld [vmem:[%s12510_s19 + $0x8] sm:$0xff]  ;;  %10438 = vmatprep.subr.bf16.mxu1 %v10437_v10  ;;  %vm329_vm5 = vcmp.gt.s32.totalorder %v328_v31, %v11406_v30  ;;  %s11063_s19 = smov 72   ;;  %s11064_s17 = smov 104  }
 0x10d   :  { %9809 = vmatprep.mubr.msk.f32.mxu0 %vm240_vm0, %v229_v2  ;;  %v11418_v35 = vsel %vm329_vm5, -1e+09, %v11054_v19  ;;  %v11455_v2 = vld [vmem:[%s12478_s10] sm:$0xff]  ;;  %s11065_s25 = smov 48   ;;  %s11066_s7 = smov 40  }
 0x10e   :  { %9810 = vmatmul.mubr.msk.f32.vlgmr.msra.gmra.mrb[0].mxu0 %vm240_vm0, %v230_v7  ;;  %s12512_s5 = sld [smem:[#allocation31_spill]] }
 0x10f   :  { %10440 = vmatpush3.bf16.msra.mxu1 %v10437_v10  ;;  %9825 = vmatprep.mubr.msk.f32.mxu0 %vm11055_vm2, %v11054_v19  ;;  %v331_v29 = vld [vmem:[%s12511_s1] sm:$0x3] }
 0x110   :  { %9833 = vmatprep.subr.mxu1 %v11054_v19  ;;  %vm430_vm4 = vcmp.ne.s32.totalorder %v331_v29, 0 }
 0x111   :  { %v11412_v33 = vsel %vm430_vm4, -1e+09, %v11054_v19 }
 0x112   :  { %v435_v34 = vrot.slane %v11412_v33, %v11409_v32 }
 0x114   :  { %v11421_v36 = vadd.f32 %v435_v34, %v11418_v35 }
 0x1e1   :  { %v9811_v12 = vpop.f32.mrb[0].mxu0 }
 0x1e2   :  { %v319_v13 = vadd.f32 %v9811_v12, %v9347_v11  ;;  %v313_v15 = vpop.f32.mrb[1].mxu0 }
 0x1e3   :  { %v314_v16 = vadd.f32 %v9347_v11, %v313_v15 }
 0x1e4   :  { %v11370_v18 = vadd.f32 %v322_v14, %v319_v13 }
 0x1e5   :  { %v11368_v17 = vadd.f32 %v322_v14, %v314_v16 }
 0x1e7   :  { %9820 = vmatprep.mubr.msk.f32.mxu1 %vm348_vm1, %v11368_v17 }
 0x1e8   :  { %9821 = vmatmul.mubr.msk.f32.vlgmr.msra.gmra.mrb[0].mxu1 %vm348_vm1, %v11370_v18 }
 0x1e9   :  { %9835 = vmatprep.mubr.msk.f32.mxu1 %vm11055_vm2, %v11054_v19 }
 0x2bb   :  { %v9822_v21 = vpop.f32.mrb[0].mxu1 }
 0x2bc   :  { %v11382_v22 = vadd.f32 %v9822_v21, %v9350_v20  ;;  %v421_v23 = vpop.f32.mrb[1].mxu1 }
 0x2bd   :  { %v11384_v24 = vadd.f32 %v9350_v20, %v421_v23 }
 0x2bf   :  { %604 = vrot.lane.b32.xlu1 %v11384_v24, %s11056_s30  ;;  %438 = vrot.lane.b32.xlu0 %v11384_v24, %s11057_s6 }
 0x2c3   :  { %606 = vrot.lane.b32.xlu0 %v11384_v24, %s11058_s0 }
 0x331   :  { %v439_v25 = vpop.permute.xlu0 %438  ;;  %v605_v27 = vpop.permute.xlu1 %604 }
 0x332   :  { %9824 = vmatpush3.xpose.msk.msra.mxu0 %vm440_vm3, %v439_v25 }
 0x333   :  { %9828 = vmatprep.subr.mxu0 %v11054_v19 }
 0x335   :  { %9826 = vmatmul.mubr.msk.f32.vlgmr.msra.gmra.mrb[2].mxu0 %vm440_vm3, %v11384_v24  ;;  %v607_v26 = vpop.permute.xlu0 %606 }
 0x336   :  { %9834 = vmatpush3.xpose.msk.msra.mxu1 %vm440_vm3, %v607_v26  ;;  %9830 = vmatprep.mubr.msk.f32.mxu0 %vm11055_vm2, %v11054_v19 }
 0x337   :  { %9843 = vmatprep.subr.mxu1 %v11054_v19 }
 0x339   :  { %9836 = vmatmul.mubr.msk.f32.vlgmr.msra.gmra.mrb[2].mxu1 %vm440_vm3, %v605_v27 }
 0x33a   :  { %9845 = vmatprep.mubr.msk.f32.mxu1 %vm11055_vm2, %v11054_v19  ;;  %9844 = vmatpush3.msra.mxu1 %v11440_v57 }
 0x33b   :  { %9853 = vmatprep.subr.mxu1 %v11054_v19 }
 0x408   :  { %v511_v37 = vpop.f32.mrb[2].mxu0 }
 0x409   :  { %v515_v38 = vmul.f32 0.35355338, %v511_v37  ;;  %v9827_v39 = vpop.f32.mrb[3].mxu0 }
 0x40b   :  { %v516_v40 = vadd.f32 %v515_v38, %v11421_v36 }
 0x40c   :  { %v678_v41 = vpop.f32.mrb[2].mxu1 }
 0x40d   :  { %v682_v42 = vmul.f32 0.35355338, %v678_v41  ;;  %v9837_v43 = vpop.f32.mrb[3].mxu1  ;;  %v517_v44 = vsel %vm440_vm3, %v516_v40, -inf }
 0x40e   :  { %518 = vmax.xlane.f32.xlu1 %v517_v44 }
 0x40f   :  { %v683_v45 = vadd.f32 %v682_v42, %v11421_v36 }
 0x411   :  { %v684_v46 = vsel %vm440_vm3, %v683_v45, -inf }
 0x412   :  { %685 = vmax.xlane.f32.xlu0 %v684_v46 }
 0x49b   :  { %v519_v47 = vpop.xlane.xlu1 %518 }
 0x49c   :  { %v520_v48 = vsub.f32 %v516_v40, %v519_v47  ;;  %v11495_v40 = vld [vmem:[%s12478_s10 + $0x10] sm:$0xff] }
 0x49e   :  { %v521_v49 = vmul.f32 1.442695, %v520_v48 }
 0x49f   :  { %v686_v50 = vpop.xlane.xlu0 %685 }
 0x4a0   :  { %10585 = vpow2.f32 %v521_v49  ;;  %v687_v51 = vsub.f32 %v683_v45, %v686_v50 }
 0x4a2   :  { %v688_v52 = vmul.f32 1.442695, %v687_v51 }
 0x4a4   :  { %10587 = vpow2.f32 %v688_v52 }
 0x4aa   :  { %v10586_v53 = vpop.eup %10585 }
 0x4ab   :  { %v523_v54 = vsel %vm440_vm3, %v10586_v53, 0.0 }
 0x4ac   :  { %524 = vadd.xlane.f32.xlu0 %v523_v54 }
 0x4ae   :  { %v10588_v55 = vpop.eup %10587 }
 0x4af   :  { %v690_v56 = vsel %vm440_vm3, %v10588_v55, 0.0 }
 0x4b0   :  { %691 = vadd.xlane.f32.xlu1 %v690_v56 }
 0x4c1   :  { %695 = vrot.lane.b32.xlu1 %v11384_v24, %s11059_s22 }
 0x4c2   :  { %528 = vrot.lane.b32.xlu0 %v11384_v24, %s11060_s11 }
 0x4c5   :  { %919 = vrot.lane.b32.xlu1 %v11384_v24, %s11061_s3 }
 0x4c6   :  { %917 = vrot.lane.b32.xlu0 %v11384_v24, %s11062_s28 }
 0x539   :  { %v525_v58 = vpop.xlane.xlu0 %524 }
 0x53a   :  { %10589 = vrcp.f32 %v525_v58 }
 0x53d   :  { %v692_v59 = vpop.xlane.xlu1 %691  ;;  %v529_v60 = vpop.permute.xlu0 %528 }
 0x53e   :  { %10591 = vrcp.f32 %v692_v59  ;;  %9829 = vmatpush3.msra.mxu0 %v529_v60 }
 0x53f   :  { %9838 = vmatprep.subr.mxu0 %v11054_v19 }
 0x541   :  { %v696_v63 = vpop.permute.xlu1 %695  ;;  %v918_v8 = vpop.permute.xlu0 %917 }
 0x544   :  { %v10590_v61 = vpop.eup %10589 }
 0x545   :  { %v527_v62 = vmul.f32 %v10590_v61, %v10586_v53  ;;  %v920_v6 = vpop.permute.xlu1 %919 }
 0x547   :  { %9831 = vmatmul.mubr.msk.f32.vlgmr.msra.gmra.mrb[4].mxu0 %vm440_vm3, %v527_v62 }
 0x548   :  { %v10592_v0 = vpop.eup %10591  ;;  %9839 = vmatpush3.msra.mxu0 %v696_v63  ;;  %9840 = vmatprep.mubr.msk.f32.mxu0 %vm11055_vm2, %v11054_v19  ;;  %v11534_v63 = vld [vmem:[%s12478_s10 + $0x18] sm:$0xff] }
 0x549   :  { %v694_v1 = vmul.f32 %v10592_v0, %v10588_v55  ;;  %9848 = vmatprep.subr.mxu0 %v11054_v19  ;;  %v11539_v0 = vsub.s32 1, %v11406_v30 }
 0x54b   :  { %9841 = vmatmul.mubr.msk.f32.vlgmr.msra.gmra.mrb[6].mxu0 %vm440_vm3, %v694_v1 }
 0x54c   :  { %9850 = vmatprep.mubr.msk.f32.mxu0 %vm11055_vm2, %v11054_v19  ;;  %9849 = vmatpush3.msra.mxu0 %v11455_v2 }
 0x54d   :  { %9858 = vmatprep.subr.mxu0 %v11054_v19 }
 0x61a   :  { %v600_v3 = vpop.f32.mrb[4].mxu0 }
 0x61b   :  { %v9832_v4 = vpop.f32.mrb[5].mxu0  ;;  %9851 = vmatmul.mubr.msk.f32.vlgmr.msra.gmra.mrb[8].mxu0 %vm440_vm3, %v600_v3 }
 0x61c   :  { %9860 = vmatprep.mubr.msk.f32.mxu0 %vm11055_vm2, %v11054_v19 }
 0x61e   :  { %v767_v5 = vpop.f32.mrb[6].mxu0 }
 0x61f   :  { %v9842_v7 = vpop.f32.mrb[7].mxu0  ;;  %9846 = vmatmul.mubr.msk.f32.vlgmr.msra.gmra.mrb[4].mxu1 %vm440_vm3, %v767_v5 }
 0x620   :  { %9854 = vmatpush3.xpose.msk.msra.mxu1 %vm440_vm3, %v920_v6  ;;  %9855 = vmatprep.mubr.msk.f32.mxu1 %vm11055_vm2, %v11054_v19 }
 0x621   :  { %9863 = vmatprep.subr.mxu1 %v11054_v19 }
 0x623   :  { %9856 = vmatmul.mubr.msk.f32.vlgmr.msra.gmra.mrb[6].mxu1 %vm440_vm3, %v918_v8 }
 0x624   :  { %9865 = vmatprep.mubr.msk.f32.mxu1 %vm11055_vm2, %v11054_v19  ;;  %9864 = vmatpush3.msra.mxu1 %v11495_v40 }
 0x625   :  { %9873 = vmatprep.subr.mxu1 %v11054_v19 }
 0x6ee   :  { %v913_v9 = vpop.f32.mrb[8].mxu0 }
 0x6ef   :  { %v9852_v10 = vpop.f32.mrb[9].mxu0 }
 0x6f2   :  { %v840_v11 = vpop.f32.mrb[4].mxu1 }
 0x6f3   :  { %v11470_v12 = vadd.f32 %v913_v9, %v840_v11  ;;  %v9847_v13 = vpop.f32.mrb[5].mxu1 }
 0x6f6   :  { %v991_v14 = vpop.f32.mrb[6].mxu1 }
 0x6f7   :  { %v995_v15 = vmul.f32 0.35355338, %v991_v14  ;;  %v9857_v16 = vpop.f32.mrb[7].mxu1 }
 0x6f9   :  { %v996_v20 = vadd.f32 %v995_v15, %v11421_v36 }
 0x6fb   :  { %v997_v21 = vsel %vm440_vm3, %v996_v20, -inf }
 0x6fc   :  { %998 = vmax.xlane.f32.xlu1 %v997_v21 }
 0x70d   :  { %1160 = vrot.lane.b32.xlu1 %v11384_v24, %s11063_s19 }
 0x711   :  { %1158 = vrot.lane.b32.xlu1 %v11384_v24, %s11064_s17 }
 0x715   :  { %1405 = vrot.lane.b32.xlu1 %v11382_v22, %s11057_s6 }
 0x789   :  { %v999_v23 = vpop.xlane.xlu1 %998 }
 0x78a   :  { %v1000_v25 = vsub.f32 %v996_v20, %v999_v23 }
 0x78c   :  { %v1001_v26 = vmul.f32 1.442695, %v1000_v25 }
 0x78d   :  { %v1161_v37 = vpop.permute.xlu1 %1160 }
 0x78e   :  { %10593 = vpow2.f32 %v1001_v26 }
 0x791   :  { %v1159_v39 = vpop.permute.xlu1 %1158 }
 0x795   :  { %v1406_v56 = vpop.permute.xlu1 %1405 }
 0x798   :  { %v10594_v27 = vpop.eup %10593 }
 0x799   :  { %v1003_v28 = vsel %vm440_vm3, %v10594_v27, 0.0 }
 0x79a   :  { %1004 = vadd.xlane.f32.xlu0 %v1003_v28 }
 0x7b0   :  { %1008 = vrot.lane.b32.xlu0 %v11384_v24, %s11065_s25 }
 0x827   :  { %v1005_v29 = vpop.xlane.xlu0 %1004 }
 0x828   :  { %10595 = vrcp.f32 %v1005_v29 }
 0x82b   :  { %v1009_v31 = vpop.permute.xlu0 %1008 }
 0x82c   :  { %9859 = vmatpush3.msra.mxu0 %v1009_v31 }
 0x82d   :  { %9868 = vmatprep.subr.mxu0 %v11054_v19 }
 0x832   :  { %v10596_v34 = vpop.eup %10595 }
 0x833   :  { %v1007_v38 = vmul.f32 %v10596_v34, %v10594_v27 }
 0x835   :  { %9861 = vmatmul.mubr.msk.f32.vlgmr.msra.gmra.mrb[10].mxu0 %vm440_vm3, %v1007_v38 }
 0x836   :  { %9869 = vmatpush3.xpose.msk.msra.mxu0 %vm440_vm3, %v1161_v37  ;;  %9870 = vmatprep.mubr.msk.f32.mxu0 %vm11055_vm2, %v11054_v19 }
 0x837   :  { %9878 = vmatprep.subr.mxu0 %v11054_v19 }
 0x839   :  { %9871 = vmatmul.mubr.msk.f32.vlgmr.msra.gmra.mrb[12].mxu0 %vm440_vm3, %v1159_v39 }
 0x83a   :  { %9880 = vmatprep.mubr.msk.f32.mxu0 %vm11055_vm2, %v11054_v19  ;;  %9879 = vmatpush3.msra.mxu0 %v11534_v63 }
 0x83b   :  { %9888 = vmatprep.subr.mxu0 %v11054_v19 }
 0x908   :  { %v1080_v41 = vpop.f32.mrb[10].mxu0 }
 0x909   :  { %v9862_v42 = vpop.f32.mrb[11].mxu0  ;;  %9866 = vmatmul.mubr.msk.f32.vlgmr.msra.gmra.mrb[8].mxu1 %vm440_vm3, %v1080_v41 }
 0x90a   :  { %9875 = vmatprep.mubr.msk.f32.mxu1 %vm11055_vm2, %v11054_v19 }
 0x90c   :  { %v1232_v43 = vpop.f32.mrb[12].mxu0 }
 0x90d   :  { %v1236_v44 = vmul.f32 0.35355338, %v1232_v43  ;;  %v9872_v45 = vpop.f32.mrb[13].mxu0 }
 0x90f   :  { %v1237_v46 = vadd.f32 %v1236_v44, %v11421_v36 }
 0x911   :  { %v1238_v47 = vsel %vm440_vm3, %v1237_v46, -inf }
 0x912   :  { %1239 = vmax.xlane.f32.xlu0 %v1238_v47 }
 0x928   :  { %1249 = vrot.lane.b32.xlu0 %v11384_v24, %s11066_s7 }
 0x92c   :  { %1572 = vrot.lane.b32.xlu0 %v11382_v22, %s11058_s0 }
 0x99f   :  { %v1240_v48 = vpop.xlane.xlu0 %1239 }
 0x9a0   :  { %v1241_v49 = vsub.f32 %v1237_v46, %v1240_v48 }
 0x9a2   :  { %v1242_v50 = vmul.f32 1.442695, %v1241_v49 }
 0x9a3   :  { %v1250_v51 = vpop.permute.xlu0 %1249 }
 0x9a4   :  { %10597 = vpow2.f32 %v1242_v50  ;;  %9874 = vmatpush3.msra.mxu1 %v1250_v51 }
 0x9a5   :  { %9883 = vmatprep.subr.mxu1 %v11054_v19 }
 0x9a7   :  { %v1573_v61 = vpop.permute.xlu0 %1572 }
 0x9ae   :  { %v10598_v52 = vpop.eup %10597 }
 0x9af   :  { %v1244_v53 = vsel %vm440_vm3, %v10598_v52, 0.0 }
 0x9b0   :  { %1245 = vadd.xlane.f32.xlu1 %v1244_v53 }
 0x9c1   :  { %1570 = vrot.lane.b32.xlu1 %v11382_v22, %s11056_s30 }
 0x9dc   :  { %v1153_v54 = vpop.f32.mrb[8].mxu1 }
 0x9dd   :  { %v11513_v24 = vadd.f32 %v1153_v54, %v11470_v12  ;;  %v9867_v55 = vpop.f32.mrb[9].mxu1 }
 0xa3d   :  { %v1246_v58 = vpop.xlane.xlu1 %1245 }
 0xa3e   :  { %10599 = vrcp.f32 %v1246_v58 }
 0xa41   :  { %v1571_v62 = vpop.permute.xlu1 %1570 }
 0xa48   :  { %v10600_v59 = vpop.eup %10599 }
 0xa49   :  { %v1248_v60 = vmul.f32 %v10600_v59, %v10598_v52 }
 0xa4b   :  { %9876 = vmatmul.mubr.msk.f32.vlgmr.msra.gmra.mrb[10].mxu1 %vm440_vm3, %v1248_v60 }
 0xa4c   :  { %9884 = vmatpush3.xpose.msk.msra.mxu1 %vm440_vm3, %v1406_v56  ;;  %9885 = vmatprep.mubr.msk.f32.mxu1 %vm11055_vm2, %v11054_v19 }
 0xa4d   :  { %9893 = vmatprep.subr.mxu1 %v11054_v19 }
 0xa4f   :  { %9886 = vmatmul.mubr.msk.f32.vlgmr.msra.gmra.mrb[12].mxu1 %vm440_vm3, %v11382_v22 }
 0xa50   :  { %9894 = vmatpush3.xpose.msk.msra.mxu1 %vm440_vm3, %v1573_v61  ;;  %9895 = vmatprep.mubr.msk.f32.mxu1 %vm11055_vm2, %v11054_v19 }
 0xa51   :  { %9903 = vmatprep.subr.mxu1 %v11054_v19 }
 0xa53   :  { %9896 = vmatmul.mubr.msk.f32.vlgmr.msra.gmra.mrb[14].mxu1 %vm440_vm3, %v1571_v62 }
 0xa54   :  { %9904 = vmatpush3.msra.mxu1 %v11440_v57  ;;  %9905 = vmatprep.mubr.msk.f32.mxu1 %vm11055_vm2, %v11054_v19  ;;  %v1402_v57 = vrot.slane %v11412_v33, %v11539_v0 }
 0xa55   :  { %9913 = vmatprep.subr.mxu1 %v11054_v19 }
 0xa56   :  { %v11547_v4 = vadd.f32 %v1402_v57, %v11418_v35 }
 0xb1e   :  { %v1321_v1 = vpop.f32.mrb[10].mxu1 }
 0xb1f   :  { %v9877_v3 = vpop.f32.mrb[11].mxu1  ;;  %9881 = vmatmul.mubr.msk.f32.vlgmr.msra.gmra.mrb[14].mxu0 %vm440_vm3, %v1321_v1 }
 0xb20   :  { %9890 = vmatprep.mubr.msk.f32.mxu0 %vm11055_vm2, %v11054_v19 }
 0xb22   :  { %v1477_v5 = vpop.f32.mrb[12].mxu1 }
 0xb23   :  { %v1481_v6 = vmul.f32 0.35355338, %v1477_v5  ;;  %v9887_v7 = vpop.f32.mrb[13].mxu1 }
 0xb25   :  { %v1482_v8 = vadd.f32 %v1481_v6, %v11547_v4 }
 0xb26   :  { %v1644_v9 = vpop.f32.mrb[14].mxu1 }
 0xb27   :  { %v1648_v10 = vmul.f32 0.35355338, %v1644_v9  ;;  %v9897_v11 = vpop.f32.mrb[15].mxu1  ;;  %v1483_v33 = vsel %vm440_vm3, %v1482_v8, -inf }
 0xb28   :  { %1484 = vmax.xlane.f32.xlu0 %v1483_v33  ;;  %v9385_v11 = vld [vmem:[#allocation12] ss:$0 sm:$0xff] }
 0xb29   :  { %v1649_v12 = vadd.f32 %v1648_v10, %v11547_v4 }
 0xb2b   :  { %v1650_v13 = vsel %vm440_vm3, %v1649_v12, -inf }
 0xb2c   :  { %1651 = vmax.xlane.f32.xlu1 %v1650_v13 }
 0xb3d   :  { %1494 = vrot.lane.b32.xlu1 %v11382_v22, %s11060_s11 }
 0xb41   :  { %1885 = vrot.lane.b32.xlu1 %v11382_v22, %s11061_s3 }
 0xb45   :  { %1883 = vrot.lane.b32.xlu1 %v11382_v22, %s11062_s28 }
 0xbb5   :  { %v1485_v35 = vpop.xlane.xlu0 %1484 }
 0xbb6   :  { %v1486_v14 = vsub.f32 %v1482_v8, %v1485_v35 }
 0xbb8   :  { %v1487_v15 = vmul.f32 1.442695, %v1486_v14 }
 0xbb9   :  { %v1652_v16 = vpop.xlane.xlu1 %1651 }
 0xbba   :  { %10601 = vpow2.f32 %v1487_v15  ;;  %v1653_v20 = vsub.f32 %v1649_v12, %v1652_v16 }
 0xbbc   :  { %v1654_v21 = vmul.f32 1.442695, %v1653_v20 }
 0xbbd   :  { %v1495_v23 = vpop.permute.xlu1 %1494 }
 0xbbe   :  { %10603 = vpow2.f32 %v1654_v21  ;;  %9889 = vmatpush3.msra.mxu0 %v1495_v23 }
 0xbbf   :  { %9898 = vmatprep.subr.mxu0 %v11054_v19 }
 0xbc1   :  { %v1886_v47 = vpop.permute.xlu1 %1885 }
 0xbc4   :  { %v10602_v25 = vpop.eup %10601 }
 0xbc5   :  { %v1489_v26 = vsel %vm440_vm3, %v10602_v25, 0.0 }
 0xbc6   :  { %1490 = vadd.xlane.f32.xlu0 %v1489_v26 }
 0xbc8   :  { %v10604_v27 = vpop.eup %10603 }
 0xbc9   :  { %v1656_v28 = vsel %vm440_vm3, %v10604_v27, 0.0 }
 0xbca   :  { %1657 = vadd.xlane.f32.xlu0 %v1656_v28 }
 0xbe0   :  { %1661 = vrot.lane.b32.xlu0 %v11382_v22, %s11059_s22 }
 0xbf2   :  { %v1394_v29 = vpop.f32.mrb[14].mxu0 }
 0xbf3   :  { %v11565_v31 = vadd.f32 %v1394_v29, %v11513_v24  ;;  %v9882_v34 = vpop.f32.mrb[15].mxu0 }
 0xbf5   :  { %v2369_v12 = vadd.f32 %v9385_v11, %v11565_v31 }
 0xbf7   :  { %v2371_v15 = vadd.f32 %v2369_v12, %v11368_v17 }
 0xbf9   :  { %v2375_v16 = vsel %vm348_vm1, %v2371_v15, 0.0 }
 0xc53   :  { %v1491_v37 = vpop.xlane.xlu0 %1490 }
 0xc54   :  { %10605 = vrcp.f32 %v1491_v37 }
 0xc57   :  { %v1658_v38 = vpop.xlane.xlu0 %1657 }
 0xc58   :  { %10607 = vrcp.f32 %v1658_v38 }
 0xc5b   :  { %v1662_v42 = vpop.permute.xlu0 %1661 }
 0xc5e   :  { %v10606_v39 = vpop.eup %10605 }
 0xc5f   :  { %v1493_v41 = vmul.f32 %v10606_v39, %v10602_v25 }
 0xc61   :  { %9891 = vmatmul.mubr.msk.f32.vlgmr.msra.gmra.mrb[16].mxu0 %vm440_vm3, %v1493_v41 }
 0xc62   :  { %v10608_v43 = vpop.eup %10607  ;;  %9899 = vmatpush3.msra.mxu0 %v1662_v42  ;;  %9900 = vmatprep.mubr.msk.f32.mxu0 %vm11055_vm2, %v11054_v19 }
 0xc63   :  { %v1660_v44 = vmul.f32 %v10608_v43, %v10604_v27  ;;  %9908 = vmatprep.subr.mxu0 %v11054_v19 }
 0xc65   :  { %9901 = vmatmul.mubr.msk.f32.vlgmr.msra.gmra.mrb[18].mxu0 %vm440_vm3, %v1660_v44 }
 0xc66   :  { %9909 = vmatpush3.msra.mxu0 %v11455_v2  ;;  %9910 = vmatprep.mubr.msk.f32.mxu0 %vm11055_vm2, %v11054_v19  ;;  %v1884_v2 = vpop.permute.xlu1 %1883 }
 0xc67   :  { %9918 = vmatprep.subr.mxu0 %v11054_v19 }
 0xd34   :  { %v1566_v45 = vpop.f32.mrb[16].mxu0 }
 0xd35   :  { %v9892_v46 = vpop.f32.mrb[17].mxu0  ;;  %9911 = vmatmul.mubr.msk.f32.vlgmr.msra.gmra.mrb[20].mxu0 %vm440_vm3, %v1566_v45 }
 0xd36   :  { %9920 = vmatprep.mubr.msk.f32.mxu0 %vm11055_vm2, %v11054_v19 }
 0xd38   :  { %v1733_v48 = vpop.f32.mrb[18].mxu0 }
 0xd39   :  { %v9902_v49 = vpop.f32.mrb[19].mxu0  ;;  %9906 = vmatmul.mubr.msk.f32.vlgmr.msra.gmra.mrb[16].mxu1 %vm440_vm3, %v1733_v48 }
 0xd3a   :  { %9914 = vmatpush3.xpose.msk.msra.mxu1 %vm440_vm3, %v1886_v47  ;;  %9915 = vmatprep.mubr.msk.f32.mxu1 %vm11055_vm2, %v11054_v19 }
 0xd3b   :  { %9923 = vmatprep.subr.mxu1 %v11054_v19 }
 0xd3d   :  { %9916 = vmatmul.mubr.msk.f32.vlgmr.msra.gmra.mrb[18].mxu1 %vm440_vm3, %v1884_v2 }
 0xd3e   :  { %9924 = vmatpush3.msra.mxu1 %v11495_v40  ;;  %9925 = vmatprep.mubr.msk.f32.mxu1 %vm11055_vm2, %v11054_v19 }
 0xd3f   :  { %9933 = vmatprep.subr.mxu1 %v11054_v19 }
 0xe08   :  { %v1879_v50 = vpop.f32.mrb[20].mxu0 }
 0xe09   :  { %v9912_v51 = vpop.f32.mrb[21].mxu0 }
 0xe0a   :  { %v2417_v51 = vld [vmem:[%s12480_s12 + $0x18] sm:$0xff] }
 0xe0c   :  { %v1806_v52 = vpop.f32.mrb[16].mxu1 }
 0xe0d   :  { %v1880_v53 = vadd.f32 %v1879_v50, %v1806_v52  ;;  %v9907_v54 = vpop.f32.mrb[17].mxu1  ;;  %v2416_v50 = vld [vmem:[%s12480_s12 + $0x10] sm:$0xff] }
 0xe0e   :  { %v10570_v52 = vpack.i.bf16 %v2417_v51, %v2416_v50 }
 0xe10   :  { %v1957_v24 = vpop.f32.mrb[18].mxu1 }
 0xe11   :  { %v1961_v55 = vmul.f32 0.35355338, %v1957_v24  ;;  %v9917_v56 = vpop.f32.mrb[19].mxu1 }
 0xe13   :  { %v1962_v58 = vadd.f32 %v1961_v55, %v11547_v4 }
 0xe15   :  { %v1963_v59 = vsel %vm440_vm3, %v1962_v58, -inf }
 0xe16   :  { %1964 = vmax.xlane.f32.xlu0 %v1963_v59 }
 0xe2c   :  { %1974 = vrot.lane.b32.xlu0 %v11382_v22, %s11065_s25 }
 0xe30   :  { %2124 = vrot.lane.b32.xlu0 %v11382_v22, %s11064_s17 }
 0xea3   :  { %v1965_v40 = vpop.xlane.xlu0 %1964 }
 0xea4   :  { %v1966_v60 = vsub.f32 %v1962_v58, %v1965_v40  ;;  %v11635_v40 = vld [vmem:[%s12488_s20] sm:$0x7] }
 0xea6   :  { %v1967_v61 = vmul.f32 1.442695, %v1966_v60  ;;  %v11640_v60 = vld [vmem:[%s12489_s21] sm:$0x7] }
 0xea7   :  { %v1975_v62 = vpop.permute.xlu0 %1974 }
 0xea8   :  { %10609 = vpow2.f32 %v1967_v61  ;;  %9919 = vmatpush3.msra.mxu0 %v1975_v62  ;;  %v2405_v61 = vrot.slane %v11635_v40, %v11409_v32  ;;  %v2414_v62 = vld [vmem:[%s12480_s12] sm:$0xff] }
 0xea9   :  { %9928 = vmatprep.subr.mxu0 %v11054_v19 }
 0xeab   :  { %v2125_v8 = vpop.permute.xlu0 %2124 }
 0xeb2   :  { %v10610_v57 = vpop.eup %10609 }
 0xeb3   :  { %v1969_v1 = vsel %vm440_vm3, %v10610_v57, 0.0 }
 0xeb4   :  { %1970 = vadd.xlane.f32.xlu1 %v1969_v1 }
 0xec5   :  { %2126 = vrot.lane.b32.xlu1 %v11382_v22, %s11063_s19 }
 0xf41   :  { %v1971_v3 = vpop.xlane.xlu1 %1970 }
 0xf42   :  { %10611 = vrcp.f32 %v1971_v3 }
 0xf45   :  { %v2127_v7 = vpop.permute.xlu1 %2126 }
 0xf4c   :  { %v10612_v5 = vpop.eup %10611 }
 0xf4d   :  { %v1973_v6 = vmul.f32 %v10612_v5, %v10610_v57  ;;  %v2415_v57 = vld [vmem:[%s12480_s12 + $0x8] sm:$0xff]  ;;  %v2411_v5 = vrot.slane %v11640_v60, %v11409_v32 }
 0xf4f   :  { %9921 = vmatmul.mubr.msk.f32.vlgmr.msra.gmra.mrb[22].mxu0 %vm440_vm3, %v1973_v6  ;;  %v10565_v6 = vpack.i.bf16 %v2415_v57, %v2414_v62 }
 0xf50   :  { %9929 = vmatpush3.xpose.msk.msra.mxu0 %vm440_vm3, %v2127_v7  ;;  %9930 = vmatprep.mubr.msk.f32.mxu0 %vm11055_vm2, %v11054_v19 }
 0xf51   :  { %9938 = vmatprep.subr.mxu0 %v11054_v19 }
 0xf53   :  { %9931 = vmatmul.mubr.msk.f32.vlgmr.msra.gmra.mrb[24].mxu0 %vm440_vm3, %v2125_v8 }
 0xf54   :  { %9939 = vmatpush3.msra.mxu0 %v11534_v63  ;;  %9940 = vmatprep.mubr.msk.f32.mxu0 %vm11055_vm2, %v11054_v19 }
0x1022   :  { %v2046_v9 = vpop.f32.mrb[22].mxu0 }
0x1023   :  { %v9922_v10 = vpop.f32.mrb[23].mxu0  ;;  %9926 = vmatmul.mubr.msk.f32.vlgmr.msra.gmra.mrb[20].mxu1 %vm440_vm3, %v2046_v9  ;;  %v10441_v9 = vpack.c.bf16 %v2415_v57, %v2414_v62 }
0x1024   :  { %9935 = vmatprep.mubr.msk.f32.mxu1 %vm11055_vm2, %v11054_v19  ;;  %v332_v10 = vld [vmem:[%s12512_s5] sm:$0xff] }
0x1026   :  { %v2198_v33 = vpop.f32.mrb[24].mxu0 }
0x1027   :  { %v2202_v13 = vmul.f32 0.35355338, %v2198_v33  ;;  %v9932_v35 = vpop.f32.mrb[25].mxu0  ;;  %v11662_v33 = vld [vmem:[#allocation13] ss:$0 sm:$0xff] }
0x1029   :  { %v2203_v14 = vadd.f32 %v2202_v13, %v11547_v4 }
0x102b   :  { %v2204_v63 = vsel %vm440_vm3, %v2203_v14, -inf }
0x102c   :  { %2205 = vmax.xlane.f32.xlu1 %v2204_v63 }
0x1030   :  { %2376 = vadd.xlane.f32.xlu1 %v2375_v16 }
0x10b9   :  { %v2206_v20 = vpop.xlane.xlu1 %2205 }
0x10ba   :  { %v2207_v21 = vsub.f32 %v2203_v14, %v2206_v20 }
0x10bc   :  { %v2208_v23 = vmul.f32 1.442695, %v2207_v21 }
0x10bd   :  { %v2377_v41 = vpop.xlane.xlu1 %2376 }
0x10be   :  { %10613 = vpow2.f32 %v2208_v23  ;;  %v2382_v42 = vmul.f32 0.03125, %v2377_v41 }
0x10c0   :  { %v2384_v45 = vsub.f32 %v2371_v15, %v2382_v42 }
0x10c2   :  { %v2386_v49 = vmul.f32 %v2384_v45, %v2384_v45 }
0x10c4   :  { %v2388_v2 = vsel %vm348_vm1, %v2386_v49, 0.0 }
0x10c8   :  { %v10614_v25 = vpop.eup %10613 }
0x10c9   :  { %v2210_v26 = vsel %vm440_vm3, %v10614_v25, 0.0 }
0x10ca   :  { %2211 = vadd.xlane.f32.xlu0 %v2210_v26  ;;  %v333_v26 = vld [vmem:[%s12512_s5 + $0x8] sm:$0xff] }
0x10e0   :  { %2215 = vrot.lane.b32.xlu0 %v11382_v22, %s11066_s7 }
0x10e4   :  { %10571 = vrot.lane.b32.xlu0 %v10570_v52, %s11057_s6 }
0x10e8   :  { %2526 = vrot.lane.b32.xlu0 %v11662_v33, %s11057_s6 }
0x10f6   :  { %v2119_v27 = vpop.f32.mrb[20].mxu1 }
0x10f7   :  { %v2123_v28 = vadd.f32 %v2119_v27, %v1880_v53  ;;  %v9927_v29 = vpop.f32.mrb[21].mxu1 }
0x1157   :  { %v2212_v31 = vpop.xlane.xlu0 %2211 }
0x1158   :  { %10615 = vrcp.f32 %v2212_v31 }
0x115b   :  { %v2216_v17 = vpop.permute.xlu0 %2215 }
0x115c   :  { %9934 = vmatpush3.msra.mxu1 %v2216_v17 }
0x115d   :  { %10442 = vmatprep.subr.bf16.mxu1 %v10441_v9 }
0x115f   :  { %v10572_v13 = vpop.permute.xlu0 %10571 }
0x1160   :  { %v10574_v63 = vunpack.i.h.bf16 %v10572_v13  ;;  %v10573_v15 = vunpack.i.l.bf16 %v10572_v13 }
0x1162   :  { %v10616_v34 = vpop.eup %10615 }
0x1163   :  { %v2214_v37 = vmul.f32 %v10616_v34, %v10614_v25  ;;  %v10453_v25 = vpack.c.bf16 %v10574_v63, %v10573_v15  ;;  %v11679_v17 = vpop.permute.xlu0 %2526 }
0x1165   :  { %9936 = vmatmul.mubr.msk.f32.vlgmr.msra.gmra.mrb[22].mxu1 %vm440_vm3, %v2214_v37 }
0x1166   :  { %10444 = vmatpush3.bf16.msra.mxu1 %v10441_v9 }
0x1238   :  { %v2287_v38 = vpop.f32.mrb[22].mxu1 }
0x1239   :  { %v9937_v39 = vpop.f32.mrb[23].mxu1  ;;  %9941 = vmatmul.mubr.msk.f32.vlgmr.msra.gmra.mrb[26].mxu0 %vm440_vm3, %v2287_v38 }
0x123a   :  { %9962 = vmatprep.mubr.msk.f32.mxu0 %vm348_vm1, %v332_v10  ;;  %v11728_v10 = vld [vmem:[#allocation15] sm:$0xff] }
0x130c   :  { %v2360_v43 = vpop.f32.mrb[26].mxu0 }
0x130d   :  { %v2364_v44 = vadd.f32 %v2360_v43, %v2123_v28  ;;  %v9942_v22 = vpop.f32.mrb[27].mxu0 }
0x130f   :  { %v2370_v46 = vadd.f32 %v9385_v11, %v2364_v44  ;;  %v10445_v11 = vpack.c.bf16 %v2417_v51, %v2416_v50 }
0x1311   :  { %v2372_v47 = vadd.f32 %v2370_v46, %v11370_v18  ;;  %10446 = vmatprep.subr.bf16.mxu1 %v10445_v11 }
0x1312   :  { %10448 = vmatpush3.bf16.msra.mxu1 %v10445_v11 }
0x1313   :  { %v2378_v48 = vsel %vm348_vm1, %v2372_v47, 0.0  ;;  %9965 = vmatprep.subr.mxu1 %v11054_v19 }
0x1314   :  { %2379 = vadd.xlane.f32.xlu1 %v2378_v48 }
0x1318   :  { %2389 = vadd.xlane.f32.xlu1 %v2388_v2 }
0x13a1   :  { %v2380_v53 = vpop.xlane.xlu1 %2379 }
0x13a2   :  { %v2383_v18 = vmul.f32 0.03125, %v2380_v53 }
0x13a4   :  { %v2385_v54 = vsub.f32 %v2372_v47, %v2383_v18 }
0x13a5   :  { %v2390_v24 = vpop.xlane.xlu1 %2389 }
0x13a6   :  { %v2394_v55 = vmul.f32 0.03125, %v2390_v24  ;;  %v2387_v56 = vmul.f32 %v2385_v54, %v2385_v54 }
0x13a8   :  { %v2396_v58 = vadd.f32 1e-05, %v2394_v55  ;;  %v2391_v59 = vsel %vm348_vm1, %v2387_v56, 0.0 }
0x13a9   :  { %2392 = vadd.xlane.f32.xlu1 %v2391_v59 }
0x13aa   :  { %10617 = vrsqrt.f32 %v2396_v58 }
0x13b4   :  { %v10618_v1 = vpop.eup %10617 }
0x13b5   :  { %v2400_v3 = vmul.f32 %v10618_v1, %v2384_v45 }
0x13b7   :  { %v2406_v7 = vmul.f32 %v2405_v61, %v2400_v3  ;;  %v11723_v3 = vld [vmem:[#allocation15 + $0x8] sm:$0xff] }
0x13b9   :  { %v11652_v8 = vadd.f32 %v2411_v5, %v2406_v7 }
0x13ba   :  { %10566 = vrot.lane.b32.xlu1 %v10565_v6, %s11057_s6 }
0x13bb   :  { %9951 = vmatprep.mubr.msk.f32.mxu1 %vm348_vm1, %v11652_v8 }
0x1436   :  { %v2393_v12 = vpop.xlane.xlu1 %2392 }
0x1437   :  { %v2395_v35 = vmul.f32 0.03125, %v2393_v12 }
0x1439   :  { %v2397_v14 = vadd.f32 1e-05, %v2395_v35 }
0x143a   :  { %v10567_v16 = vpop.permute.xlu1 %10566 }
0x143b   :  { %10619 = vrsqrt.f32 %v2397_v14  ;;  %v10569_v20 = vunpack.i.h.bf16 %v10567_v16  ;;  %v10568_v21 = vunpack.i.l.bf16 %v10567_v16 }
0x143d   :  { %v10449_v23 = vpack.c.bf16 %v10569_v20, %v10568_v21 }
0x143f   :  { %10450 = vmatprep.subr.bf16.mxu0 %v10449_v23 }
0x1440   :  { %10452 = vmatpush3.bf16.msra.mxu0 %v10449_v23 }
0x1441   :  { %10454 = vmatprep.subr.bf16.mxu0 %v10453_v25 }
0x1444   :  { %10456 = vmatpush3.bf16.msra.mxu0 %v10453_v25 }
0x1445   :  { %v10620_v27 = vpop.eup %10619  ;;  %9970 = vmatprep.subr.mxu0 %v11054_v19 }
0x1446   :  { %v2401_v28 = vmul.f32 %v10620_v27, %v2385_v54 }
0x1447   :  { %9963 = vmatmul.mubr.msk.f32.vlgmr.msra.gmra.mrb[28].mxu0 %vm348_vm1, %v333_v26 }
0x1448   :  { %v2407_v29 = vmul.f32 %v2405_v61, %v2401_v28  ;;  %9972 = vmatprep.mubr.msk.f32.mxu0 %vm11055_vm2, %v11054_v19 }
0x144a   :  { %v11673_v31 = vadd.f32 %v2411_v5, %v2407_v29 }
0x144c   :  { %9952 = vmatmul.mubr.msk.f32.vlgmr.msra.gmra.mrb[24].mxu1 %vm348_vm1, %v11673_v31 }
0x144d   :  { %9967 = vmatprep.mubr.msk.f32.mxu1 %vm11055_vm2, %v11054_v19 }
0x151a   :  { %v11681_v34 = vpop.f32.mrb[28].mxu0 }
0x151b   :  { %v2601_v37 = vpop.f32.mrb[29].mxu0 }
0x151c   :  { %v11684_v38 = vadd.f32 %v2601_v37, %v11679_v17 }
0x151e   :  { %2776 = vrot.lane.b32.xlu0 %v11684_v38, %s11056_s30  ;;  %9966 = vmatpush3.xpose.msk.msra.mxu1 %vm440_vm3, %v11684_v38 }
0x151f   :  { %v11690_v39 = vpop.f32.mrb[24].mxu1  ;;  %9975 = vmatprep.subr.mxu1 %v11054_v19 }
0x1520   :  { %v2500_v41 = vpop.f32.mrb[25].mxu1 }
0x1521   :  { %v11694_v42 = vadd.f32 %v11662_v33, %v2500_v41 }
0x1523   :  { %2774 = vrot.lane.b32.xlu0 %v11694_v42, %s11056_s30  ;;  %9968 = vmatmul.mubr.msk.f32.vlgmr.msra.gmra.mrb[26].mxu1 %vm440_vm3, %v11694_v42 }
0x1524   :  { %9977 = vmatprep.mubr.msk.f32.mxu1 %vm11055_vm2, %v11054_v19 }
0x1590   :  { %v2777_v43 = vpop.permute.xlu0 %2776 }
0x1591   :  { %9976 = vmatpush3.xpose.msk.msra.mxu1 %vm440_vm3, %v2777_v43 }
0x1592   :  { %9985 = vmatprep.subr.mxu1 %v11054_v19 }
0x1595   :  { %v2775_v44 = vpop.permute.xlu0 %2774 }
0x1596   :  { %9978 = vmatmul.mubr.msk.f32.vlgmr.msra.gmra.mrb[28].mxu1 %vm440_vm3, %v2775_v44 }
0x1597   :  { %9987 = vmatprep.mubr.msk.f32.mxu1 %vm11055_vm2, %v11054_v19  ;;  %9986 = vmatpush3.msra.mxu1 %v11723_v3 }
0x1598   :  { %9995 = vmatprep.subr.mxu1 %v11054_v19 }
0x15f6   :  { %v2682_v22 = vpop.f32.mrb[26].mxu1 }
0x15f7   :  { %v2686_v45 = vmul.f32 0.35355338, %v2682_v22  ;;  %v9969_v46 = vpop.f32.mrb[27].mxu1 }
0x15f9   :  { %v2687_v47 = vsel %vm440_vm3, %v2686_v45, -inf }
0x15fa   :  { %2688 = vmax.xlane.f32.xlu1 %v2687_v47 }
0x1669   :  { %v2848_v48 = vpop.f32.mrb[28].mxu1 }
0x166a   :  { %v2852_v49 = vmul.f32 0.35355338, %v2848_v48  ;;  %v9979_v2 = vpop.f32.mrb[29].mxu1 }
0x166c   :  { %v2853_v50 = vsel %vm440_vm3, %v2852_v49, -inf }
0x166d   :  { %2854 = vmax.xlane.f32.xlu0 %v2853_v50 }
0x1687   :  { %v2689_v51 = vpop.xlane.xlu1 %2688 }
0x1688   :  { %v2690_v52 = vsub.f32 %v2686_v45, %v2689_v51 }
0x168a   :  { %v2691_v53 = vmul.f32 1.442695, %v2690_v52 }
0x168c   :  { %10621 = vpow2.f32 %v2691_v53 }
0x1696   :  { %v10622_v18 = vpop.eup %10621 }
0x1697   :  { %v2693_v54 = vsel %vm440_vm3, %v10622_v18, 0.0 }
0x1698   :  { %2694 = vadd.xlane.f32.xlu0 %v2693_v54  ;;  %v11775_v54 = vadd.f32 %v11690_v39, %v11662_v33 }
0x16ae   :  { %2698 = vrot.lane.b32.xlu0 %v11684_v38, %s11057_s6 }
0x16b2   :  { %3086 = vrot.lane.b32.xlu0 %v11694_v42, %s11062_s28 }
0x16fa   :  { %v2855_v24 = vpop.xlane.xlu0 %2854 }
0x16fb   :  { %v2856_v55 = vsub.f32 %v2852_v49, %v2855_v24  ;;  %v11763_v49 = vld [vmem:[#allocation15 + $0x10] sm:$0xff] }
0x16fd   :  { %v2857_v56 = vmul.f32 1.442695, %v2856_v55 }
0x16ff   :  { %10623 = vpow2.f32 %v2857_v56 }
0x1709   :  { %v10624_v58 = vpop.eup %10623 }
0x170a   :  { %v2859_v59 = vsel %vm440_vm3, %v10624_v58, 0.0 }
0x170b   :  { %2860 = vadd.xlane.f32.xlu1 %v2859_v59 }
0x171c   :  { %2864 = vrot.lane.b32.xlu1 %v11684_v38, %s11058_s0 }
0x1720   :  { %3088 = vrot.lane.b32.xlu1 %v11684_v38, %s11062_s28 }
0x1725   :  { %v2695_v61 = vpop.xlane.xlu0 %2694 }
0x1726   :  { %10625 = vrcp.f32 %v2695_v61 }
0x1729   :  { %v2699_v62 = vpop.permute.xlu0 %2698 }
0x172a   :  { %9971 = vmatpush3.msra.mxu0 %v2699_v62 }
0x172b   :  { %9980 = vmatprep.subr.mxu0 %v11054_v19 }
0x172d   :  { %v3087_v63 = vpop.permute.xlu0 %3086 }
0x1730   :  { %v10626_v57 = vpop.eup %10625 }
0x1731   :  { %v2697_v1 = vmul.f32 %v10626_v57, %v10622_v18 }
0x1733   :  { %9973 = vmatmul.mubr.msk.f32.vlgmr.msra.gmra.mrb[30].mxu0 %vm440_vm3, %v2697_v1 }
0x1734   :  { %9982 = vmatprep.mubr.msk.f32.mxu0 %vm11055_vm2, %v11054_v19 }
0x1798   :  { %v2861_v5 = vpop.xlane.xlu1 %2860 }
0x1799   :  { %10627 = vrcp.f32 %v2861_v5 }
0x179c   :  { %v2865_v6 = vpop.permute.xlu1 %2864 }
0x179d   :  { %9981 = vmatpush3.msra.mxu0 %v2865_v6  ;;  %v11804_v6 = vld [vmem:[#allocation15 + $0x18] sm:$0xff] }
0x179e   :  { %9990 = vmatprep.subr.mxu0 %v11054_v19 }
0x17a0   :  { %v3089_v35 = vpop.permute.xlu1 %3088 }
0x17a3   :  { %v10628_v7 = vpop.eup %10627 }
0x17a4   :  { %v2863_v9 = vmul.f32 %v10628_v7, %v10624_v58 }
0x17a6   :  { %9983 = vmatmul.mubr.msk.f32.vlgmr.msra.gmra.mrb[32].mxu0 %vm440_vm3, %v2863_v9 }
0x17a7   :  { %9991 = vmatpush3.msra.mxu0 %v11728_v10  ;;  %9992 = vmatprep.mubr.msk.f32.mxu0 %vm11055_vm2, %v11054_v19 }
0x17a8   :  { %10000 = vmatprep.subr.mxu0 %v11054_v19 }
0x1806   :  { %v2770_v11 = vpop.f32.mrb[30].mxu0 }
0x1807   :  { %v9974_v12 = vpop.f32.mrb[31].mxu0  ;;  %9993 = vmatmul.mubr.msk.f32.vlgmr.msra.gmra.mrb[34].mxu0 %vm440_vm3, %v2770_v11 }
0x1808   :  { %10002 = vmatprep.mubr.msk.f32.mxu0 %vm11055_vm2, %v11054_v19 }
0x1879   :  { %v2936_v13 = vpop.f32.mrb[32].mxu0 }
0x187a   :  { %v9984_v14 = vpop.f32.mrb[33].mxu0  ;;  %9988 = vmatmul.mubr.msk.f32.vlgmr.msra.gmra.mrb[30].mxu1 %vm440_vm3, %v2936_v13 }
0x187b   :  { %9996 = vmatpush3.xpose.msk.msra.mxu1 %vm440_vm3, %v3089_v35  ;;  %9997 = vmatprep.mubr.msk.f32.mxu1 %vm11055_vm2, %v11054_v19 }
0x187c   :  { %10005 = vmatprep.subr.mxu1 %v11054_v19 }
0x187e   :  { %9998 = vmatmul.mubr.msk.f32.vlgmr.msra.gmra.mrb[32].mxu1 %vm440_vm3, %v3087_v63 }
0x187f   :  { %10007 = vmatprep.mubr.msk.f32.mxu1 %vm11055_vm2, %v11054_v19  ;;  %10006 = vmatpush3.msra.mxu1 %v11763_v49 }
0x1880   :  { %10015 = vmatprep.subr.mxu1 %v11054_v19 }
0x18da   :  { %v3082_v15 = vpop.f32.mrb[34].mxu0 }
0x18db   :  { %v9994_v16 = vpop.f32.mrb[35].mxu0 }
0x194d   :  { %v3009_v20 = vpop.f32.mrb[30].mxu1 }
0x194e   :  { %v3083_v21 = vadd.f32 %v3082_v15, %v3009_v20  ;;  %v9989_v23 = vpop.f32.mrb[31].mxu1 }
0x1951   :  { %v3160_v25 = vpop.f32.mrb[32].mxu1 }
0x1952   :  { %v3164_v26 = vmul.f32 0.35355338, %v3160_v25  ;;  %v9999_v27 = vpop.f32.mrb[33].mxu1 }
0x1954   :  { %v3165_v28 = vsel %vm440_vm3, %v3164_v26, -inf }
0x1955   :  { %3166 = vmax.xlane.f32.xlu1 %v3165_v28 }
0x1966   :  { %3328 = vrot.lane.b32.xlu1 %v11684_v38, %s11064_s17 }
0x196a   :  { %3326 = vrot.lane.b32.xlu1 %v11694_v42, %s11064_s17 }
0x19e2   :  { %v3167_v29 = vpop.xlane.xlu1 %3166 }
0x19e3   :  { %v3168_v37 = vsub.f32 %v3164_v26, %v3167_v29 }
0x19e5   :  { %v3169_v41 = vmul.f32 1.442695, %v3168_v37 }
0x19e6   :  { %v3329_v47 = vpop.permute.xlu1 %3328 }
0x19e7   :  { %10629 = vpow2.f32 %v3169_v41 }
0x19ea   :  { %v3327_v48 = vpop.permute.xlu1 %3326 }
0x19f1   :  { %v10630_v43 = vpop.eup %10629 }
0x19f2   :  { %v3171_v44 = vsel %vm440_vm3, %v10630_v43, 0.0 }
0x19f3   :  { %3172 = vadd.xlane.f32.xlu0 %v3171_v44 }
0x1a09   :  { %3176 = vrot.lane.b32.xlu0 %v11684_v38, %s11061_s3 }
0x1a80   :  { %v3173_v22 = vpop.xlane.xlu0 %3172 }
0x1a81   :  { %10631 = vrcp.f32 %v3173_v22 }
0x1a84   :  { %v3177_v45 = vpop.permute.xlu0 %3176 }
0x1a85   :  { %10001 = vmatpush3.msra.mxu0 %v3177_v45 }
0x1a86   :  { %10010 = vmatprep.subr.mxu0 %v11054_v19 }
0x1a8b   :  { %v10632_v46 = vpop.eup %10631 }
0x1a8c   :  { %v3175_v42 = vmul.f32 %v10632_v46, %v10630_v43 }
0x1a8e   :  { %10003 = vmatmul.mubr.msk.f32.vlgmr.msra.gmra.mrb[36].mxu0 %vm440_vm3, %v3175_v42 }
0x1a8f   :  { %10011 = vmatpush3.xpose.msk.msra.mxu0 %vm440_vm3, %v3329_v47  ;;  %10012 = vmatprep.mubr.msk.f32.mxu0 %vm11055_vm2, %v11054_v19 }
0x1a90   :  { %10020 = vmatprep.subr.mxu0 %v11054_v19 }
0x1a92   :  { %10013 = vmatmul.mubr.msk.f32.vlgmr.msra.gmra.mrb[38].mxu0 %vm440_vm3, %v3327_v48 }
0x1a93   :  { %10022 = vmatprep.mubr.msk.f32.mxu0 %vm11055_vm2, %v11054_v19  ;;  %10021 = vmatpush3.msra.mxu0 %v11804_v6 }
0x1a94   :  { %10030 = vmatprep.subr.mxu0 %v11054_v19 }
0x1b61   :  { %v3248_v2 = vpop.f32.mrb[36].mxu0 }
0x1b62   :  { %v10004_v50 = vpop.f32.mrb[37].mxu0  ;;  %10008 = vmatmul.mubr.msk.f32.vlgmr.msra.gmra.mrb[34].mxu1 %vm440_vm3, %v3248_v2 }
0x1b63   :  { %10017 = vmatprep.mubr.msk.f32.mxu1 %vm11055_vm2, %v11054_v19 }
0x1b65   :  { %v3400_v51 = vpop.f32.mrb[38].mxu0 }
0x1b66   :  { %v3404_v52 = vmul.f32 0.35355338, %v3400_v51  ;;  %v10014_v53 = vpop.f32.mrb[39].mxu0 }
0x1b68   :  { %v3405_v18 = vsel %vm440_vm3, %v3404_v52, -inf }
0x1b69   :  { %3406 = vmax.xlane.f32.xlu0 %v3405_v18 }
0x1b7f   :  { %3416 = vrot.lane.b32.xlu0 %v11684_v38, %s11063_s19  ;;  %v11783_v38 = vadd.f32 %v11681_v34, %v11679_v17 }
0x1b83   :  { %3730 = vrot.lane.b32.xlu0 %v11775_v54, %s11056_s30 }
0x1bf6   :  { %v3407_v24 = vpop.xlane.xlu0 %3406 }
0x1bf7   :  { %v3408_v55 = vsub.f32 %v3404_v52, %v3407_v24 }
0x1bf9   :  { %v3409_v56 = vmul.f32 1.442695, %v3408_v55 }
0x1bfa   :  { %v3417_v58 = vpop.permute.xlu0 %3416 }
0x1bfb   :  { %10633 = vpow2.f32 %v3409_v56  ;;  %10016 = vmatpush3.msra.mxu1 %v3417_v58 }
0x1bfc   :  { %10025 = vmatprep.subr.mxu1 %v11054_v19 }
0x1bfe   :  { %v3731_v34 = vpop.permute.xlu0 %3730 }
0x1c05   :  { %v10634_v59 = vpop.eup %10633 }
0x1c06   :  { %v3411_v61 = vsel %vm440_vm3, %v10634_v59, 0.0 }
0x1c07   :  { %3412 = vadd.xlane.f32.xlu1 %v3411_v61 }
0x1c18   :  { %3732 = vrot.lane.b32.xlu1 %v11783_v38, %s11056_s30 }
0x1c35   :  { %v3321_v33 = vpop.f32.mrb[34].mxu1 }
0x1c36   :  { %v3325_v39 = vadd.f32 %v3321_v33, %v3083_v21  ;;  %v10009_v62 = vpop.f32.mrb[35].mxu1 }
0x1c94   :  { %v3413_v57 = vpop.xlane.xlu1 %3412 }
0x1c95   :  { %10635 = vrcp.f32 %v3413_v57 }
0x1c98   :  { %v3733_v17 = vpop.permute.xlu1 %3732 }
0x1c9f   :  { %v10636_v1 = vpop.eup %10635 }
0x1ca0   :  { %v3415_v5 = vmul.f32 %v10636_v1, %v10634_v59 }
0x1ca2   :  { %10018 = vmatmul.mubr.msk.f32.vlgmr.msra.gmra.mrb[36].mxu1 %vm440_vm3, %v3415_v5 }
0x1ca3   :  { %10026 = vmatpush3.xpose.msk.msra.mxu1 %vm440_vm3, %v11783_v38  ;;  %10027 = vmatprep.mubr.msk.f32.mxu1 %vm11055_vm2, %v11054_v19 }
0x1ca4   :  { %10035 = vmatprep.subr.mxu1 %v11054_v19 }
0x1ca6   :  { %10028 = vmatmul.mubr.msk.f32.vlgmr.msra.gmra.mrb[38].mxu1 %vm440_vm3, %v11775_v54 }
0x1ca7   :  { %10036 = vmatpush3.xpose.msk.msra.mxu1 %vm440_vm3, %v3733_v17  ;;  %10037 = vmatprep.mubr.msk.f32.mxu1 %vm11055_vm2, %v11054_v19 }
0x1ca8   :  { %10045 = vmatprep.subr.mxu1 %v11054_v19 }
0x1caa   :  { %10038 = vmatmul.mubr.msk.f32.vlgmr.msra.gmra.mrb[40].mxu1 %vm440_vm3, %v3731_v34 }
0x1cab   :  { %10046 = vmatpush3.msra.mxu1 %v11723_v3  ;;  %10047 = vmatprep.mubr.msk.f32.mxu1 %vm11055_vm2, %v11054_v19 }
0x1cac   :  { %10055 = vmatprep.subr.mxu1 %v11054_v19 }
0x1d75   :  { %v3488_v7 = vpop.f32.mrb[36].mxu1 }
0x1d76   :  { %v10019_v9 = vpop.f32.mrb[37].mxu1  ;;  %10023 = vmatmul.mubr.msk.f32.vlgmr.msra.gmra.mrb[40].mxu0 %vm440_vm3, %v3488_v7 }
0x1d77   :  { %10032 = vmatprep.mubr.msk.f32.mxu0 %vm11055_vm2, %v11054_v19 }
0x1d79   :  { %v3638_v11 = vpop.f32.mrb[38].mxu1 }
0x1d7a   :  { %v3642_v3 = vmul.f32 0.35355338, %v3638_v11  ;;  %v10029_v12 = vpop.f32.mrb[39].mxu1 }
0x1d7c   :  { %v3643_v13 = vsel %vm440_vm3, %v3642_v3, -inf }
0x1d7d   :  { %3644 = vmax.xlane.f32.xlu1 %v3643_v13  ;;  %v3804_v35 = vpop.f32.mrb[40].mxu1 }
0x1d7e   :  { %v3808_v14 = vmul.f32 0.35355338, %v3804_v35  ;;  %v10039_v63 = vpop.f32.mrb[41].mxu1 }
0x1d80   :  { %v3809_v15 = vsel %vm440_vm3, %v3808_v14, -inf }
0x1d81   :  { %3810 = vmax.xlane.f32.xlu0 %v3809_v15 }
0x1e0a   :  { %v3645_v16 = vpop.xlane.xlu1 %3644 }
0x1e0b   :  { %v3646_v20 = vsub.f32 %v3642_v3, %v3645_v16 }
0x1e0d   :  { %v3647_v21 = vmul.f32 1.442695, %v3646_v20 }
0x1e0e   :  { %v3811_v23 = vpop.xlane.xlu0 %3810 }
0x1e0f   :  { %10637 = vpow2.f32 %v3647_v21  ;;  %v3812_v25 = vsub.f32 %v3808_v14, %v3811_v23 }
0x1e11   :  { %v3813_v26 = vmul.f32 1.442695, %v3812_v25  ;;  %v9423_v25 = vld [vmem:[#allocation16] ss:$0 sm:$0xff] }
0x1e13   :  { %10639 = vpow2.f32 %v3813_v26 }
0x1e19   :  { %v10638_v27 = vpop.eup %10637 }
0x1e1a   :  { %v3649_v28 = vsel %vm440_vm3, %v10638_v27, 0.0 }
0x1e1b   :  { %3650 = vadd.xlane.f32.xlu0 %v3649_v28 }
0x1e1d   :  { %v10640_v29 = vpop.eup %10639 }
0x1e1e   :  { %v3815_v37 = vsel %vm440_vm3, %v10640_v29, 0.0 }
0x1e1f   :  { %3816 = vadd.xlane.f32.xlu1 %v3815_v37 }
0x1e30   :  { %3820 = vrot.lane.b32.xlu1 %v11783_v38, %s11058_s0 }
0x1e31   :  { %3654 = vrot.lane.b32.xlu0 %v11783_v38, %s11057_s6 }
0x1e34   :  { %4044 = vrot.lane.b32.xlu1 %v11783_v38, %s11062_s28 }
0x1e35   :  { %4042 = vrot.lane.b32.xlu0 %v11775_v54, %s11062_s28 }
0x1e49   :  { %v3561_v41 = vpop.f32.mrb[40].mxu0 }
0x1e4a   :  { %v11823_v43 = vadd.f32 %v3561_v41, %v3325_v39  ;;  %v10024_v44 = vpop.f32.mrb[41].mxu0 }
0x1e4c   :  { %v4526_v26 = vadd.f32 %v9423_v25, %v11823_v43 }
0x1ea8   :  { %v3651_v22 = vpop.xlane.xlu0 %3650 }
0x1ea9   :  { %10641 = vrcp.f32 %v3651_v22 }
0x1eac   :  { %v3817_v45 = vpop.xlane.xlu1 %3816  ;;  %v3655_v46 = vpop.permute.xlu0 %3654 }
0x1ead   :  { %10643 = vrcp.f32 %v3817_v45  ;;  %10031 = vmatpush3.msra.mxu0 %v3655_v46 }
0x1eae   :  { %10040 = vmatprep.subr.mxu0 %v11054_v19 }
0x1eb0   :  { %v3821_v48 = vpop.permute.xlu1 %3820 }
0x1eb3   :  { %v10642_v47 = vpop.eup %10641 }
0x1eb4   :  { %v3653_v42 = vmul.f32 %v10642_v47, %v10638_v27  ;;  %v4045_v18 = vpop.permute.xlu1 %4044 }
0x1eb6   :  { %10033 = vmatmul.mubr.msk.f32.vlgmr.msra.gmra.mrb[42].mxu0 %vm440_vm3, %v3653_v42 }
0x1eb7   :  { %v10644_v2 = vpop.eup %10643  ;;  %10041 = vmatpush3.msra.mxu0 %v3821_v48  ;;  %10042 = vmatprep.mubr.msk.f32.mxu0 %vm11055_vm2, %v11054_v19 }
0x1eb8   :  { %v3819_v50 = vmul.f32 %v10644_v2, %v10640_v29  ;;  %10050 = vmatprep.subr.mxu0 %v11054_v19  ;;  %v4528_v29 = vadd.f32 %v4526_v26, %v11652_v8 }
0x1eba   :  { %10043 = vmatmul.mubr.msk.f32.vlgmr.msra.gmra.mrb[44].mxu0 %vm440_vm3, %v3819_v50  ;;  %v4530_v37 = vsel %vm348_vm1, %v4528_v29, 0.0 }
0x1ebb   :  { %10051 = vmatpush3.msra.mxu0 %v11728_v10  ;;  %10052 = vmatprep.mubr.msk.f32.mxu0 %vm11055_vm2, %v11054_v19  ;;  %v4043_v10 = vpop.permute.xlu0 %4042 }
0x1ebc   :  { %10060 = vmatprep.subr.mxu0 %v11054_v19 }
0x1f89   :  { %v3726_v51 = vpop.f32.mrb[42].mxu0 }
0x1f8a   :  { %v10034_v52 = vpop.f32.mrb[43].mxu0  ;;  %10053 = vmatmul.mubr.msk.f32.vlgmr.msra.gmra.mrb[46].mxu0 %vm440_vm3, %v3726_v51 }
0x1f8b   :  { %10062 = vmatprep.mubr.msk.f32.mxu0 %vm11055_vm2, %v11054_v19 }
0x1f8d   :  { %v3892_v53 = vpop.f32.mrb[44].mxu0 }
0x1f8e   :  { %v10044_v24 = vpop.f32.mrb[45].mxu0  ;;  %10048 = vmatmul.mubr.msk.f32.vlgmr.msra.gmra.mrb[42].mxu1 %vm440_vm3, %v3892_v53 }
0x1f8f   :  { %10056 = vmatpush3.xpose.msk.msra.mxu1 %vm440_vm3, %v4045_v18  ;;  %10057 = vmatprep.mubr.msk.f32.mxu1 %vm11055_vm2, %v11054_v19 }
0x1f90   :  { %10065 = vmatprep.subr.mxu1 %v11054_v19 }
0x1f92   :  { %10058 = vmatmul.mubr.msk.f32.vlgmr.msra.gmra.mrb[44].mxu1 %vm440_vm3, %v4043_v10 }
0x1f93   :  { %10066 = vmatpush3.msra.mxu1 %v11763_v49  ;;  %10067 = vmatprep.mubr.msk.f32.mxu1 %vm11055_vm2, %v11054_v19 }
0x1f94   :  { %10075 = vmatprep.subr.mxu1 %v11054_v19 }
0x205d   :  { %v4038_v55 = vpop.f32.mrb[46].mxu0 }
0x205e   :  { %v10054_v56 = vpop.f32.mrb[47].mxu0 }
0x2061   :  { %v3965_v58 = vpop.f32.mrb[42].mxu1 }
0x2062   :  { %v4039_v59 = vadd.f32 %v4038_v55, %v3965_v58  ;;  %v10049_v61 = vpop.f32.mrb[43].mxu1 }
0x2065   :  { %v4116_v33 = vpop.f32.mrb[44].mxu1 }
0x2066   :  { %v4120_v39 = vmul.f32 0.35355338, %v4116_v33  ;;  %v10059_v62 = vpop.f32.mrb[45].mxu1 }
0x2068   :  { %v4121_v57 = vsel %vm440_vm3, %v4120_v39, -inf }
0x2069   :  { %4122 = vmax.xlane.f32.xlu1 %v4121_v57 }
0x207a   :  { %4284 = vrot.lane.b32.xlu1 %v11783_v38, %s11064_s17 }
0x207e   :  { %4282 = vrot.lane.b32.xlu1 %v11775_v54, %s11064_s17 }
0x20f6   :  { %v4123_v49 = vpop.xlane.xlu1 %4122 }
0x20f7   :  { %v4124_v1 = vsub.f32 %v4120_v39, %v4123_v49 }
0x20f9   :  { %v4125_v5 = vmul.f32 1.442695, %v4124_v1  ;;  %v4565_v1 = vrot.slane %v11640_v60, %v11539_v0 }
0x20fa   :  { %v4285_v3 = vpop.permute.xlu1 %4284 }
0x20fb   :  { %10645 = vpow2.f32 %v4125_v5 }
0x20fe   :  { %v4283_v12 = vpop.permute.xlu1 %4282 }
0x2105   :  { %v10646_v17 = vpop.eup %10645 }
0x2106   :  { %v4127_v34 = vsel %vm440_vm3, %v10646_v17, 0.0 }
0x2107   :  { %4128 = vadd.xlane.f32.xlu0 %v4127_v34  ;;  %v4568_v34 = vld [vmem:[#allocation18] sm:$0xff] }
0x211d   :  { %4132 = vrot.lane.b32.xlu0 %v11783_v38, %s11061_s3 }
0x2194   :  { %v4129_v7 = vpop.xlane.xlu0 %4128 }
0x2195   :  { %10647 = vrcp.f32 %v4129_v7  ;;  %v4569_v7 = vld [vmem:[#allocation18 + $0x8] sm:$0xff] }
0x2198   :  { %v4133_v9 = vpop.permute.xlu0 %4132 }
0x2199   :  { %10061 = vmatpush3.msra.mxu0 %v4133_v9  ;;  %v10457_v9 = vpack.c.bf16 %v4569_v7, %v4568_v34 }
0x219a   :  { %10070 = vmatprep.subr.mxu0 %v11054_v19 }
0x219f   :  { %v10648_v11 = vpop.eup %10647 }
0x21a0   :  { %v4131_v54 = vmul.f32 %v10648_v11, %v10646_v17  ;;  %v4570_v11 = vld [vmem:[#allocation18 + $0x10] sm:$0xff] }
0x21a2   :  { %10063 = vmatmul.mubr.msk.f32.vlgmr.msra.gmra.mrb[48].mxu0 %vm440_vm3, %v4131_v54 }
0x21a3   :  { %10071 = vmatpush3.xpose.msk.msra.mxu0 %vm440_vm3, %v4285_v3  ;;  %10072 = vmatprep.mubr.msk.f32.mxu0 %vm11055_vm2, %v11054_v19  ;;  %v4571_v3 = vld [vmem:[#allocation18 + $0x18] sm:$0xff] }
0x21a4   :  { %10080 = vmatprep.subr.mxu0 %v11054_v19  ;;  %v10461_v54 = vpack.c.bf16 %v4571_v3, %v4570_v11 }
0x21a6   :  { %10073 = vmatmul.mubr.msk.f32.vlgmr.msra.gmra.mrb[50].mxu0 %vm440_vm3, %v4283_v12  ;;  %v4660_v12 = vld [vmem:[%s12486_s18] sm:$0xff] }
0x21a7   :  { %10081 = vmatpush3.msra.mxu0 %v11804_v6  ;;  %10082 = vmatprep.mubr.msk.f32.mxu0 %vm11055_vm2, %v11054_v19 }
0x2275   :  { %v4204_v13 = vpop.f32.mrb[48].mxu0 }
0x2276   :  { %v10064_v35 = vpop.f32.mrb[49].mxu0  ;;  %10068 = vmatmul.mubr.msk.f32.vlgmr.msra.gmra.mrb[46].mxu1 %vm440_vm3, %v4204_v13  ;;  %v4661_v13 = vld [vmem:[%s12486_s18 + $0x8] sm:$0xff] }
0x2277   :  { %10077 = vmatprep.mubr.msk.f32.mxu1 %vm11055_vm2, %v11054_v19  ;;  %v4662_v35 = vld [vmem:[%s12486_s18 + $0x10] sm:$0xff] }
0x2279   :  { %v4356_v14 = vpop.f32.mrb[50].mxu0 }
0x227a   :  { %v4360_v63 = vmul.f32 0.35355338, %v4356_v14  ;;  %v10074_v15 = vpop.f32.mrb[51].mxu0  ;;  %v10465_v14 = vpack.c.bf16 %v4661_v13, %v4660_v12  ;;  %v11935_v13 = vsub.s32 2, %v11406_v30  ;;  %v9438_v30 = vld [vmem:[#allocation10 + $0x1] ss:$0 sm:$0xff] }
0x227c   :  { %v4361_v16 = vsel %vm440_vm3, %v4360_v63, -inf  ;;  %10466 = vmatprep.subr.bf16.mxu0 %v10465_v14 }
0x227d   :  { %4362 = vmax.xlane.f32.xlu0 %v4361_v16  ;;  %v4664_v16 = vld [vmem:[%s12486_s18 + $0x20] sm:$0xff] }
0x2293   :  { %4372 = vrot.lane.b32.xlu0 %v11783_v38, %s11063_s19 }
0x230a   :  { %v4363_v6 = vpop.xlane.xlu0 %4362 }
0x230b   :  { %v4364_v20 = vsub.f32 %v4360_v63, %v4363_v6  ;;  %v4663_v63 = vld [vmem:[%s12486_s18 + $0x18] sm:$0xff]  ;;  %v4665_v6 = vld [vmem:[%s12486_s18 + $0x28] sm:$0xff] }
0x230c   :  { %v10469_v15 = vpack.c.bf16 %v4663_v63, %v4662_v35  ;;  %v4786_v35 = vrot.slane %v11635_v40, %v11935_v13 }
0x230d   :  { %v4365_v21 = vmul.f32 1.442695, %v4364_v20  ;;  %v10473_v20 = vpack.c.bf16 %v4665_v6, %v4664_v16 }
0x230e   :  { %v4373_v23 = vpop.permute.xlu0 %4372 }
0x230f   :  { %10649 = vpow2.f32 %v4365_v21  ;;  %10076 = vmatpush3.msra.mxu1 %v4373_v23 }
0x2310   :  { %10458 = vmatprep.subr.bf16.mxu1 %v10457_v9 }
0x2319   :  { %v10650_v27 = vpop.eup %10649 }
0x231a   :  { %v4367_v28 = vsel %vm440_vm3, %v10650_v27, 0.0 }
0x231b   :  { %4368 = vadd.xlane.f32.xlu1 %v4367_v28 }
0x231f   :  { %4531 = vadd.xlane.f32.xlu1 %v4530_v37  ;;  %v4666_v37 = vld [vmem:[%s12486_s18 + $0x30] sm:$0xff] }
0x2349   :  { %v4277_v41 = vpop.f32.mrb[46].mxu1 }
0x234a   :  { %v4281_v38 = vadd.f32 %v4277_v41, %v4039_v59  ;;  %v10069_v44 = vpop.f32.mrb[47].mxu1  ;;  %v4667_v41 = vld [vmem:[%s12486_s18 + $0x38] sm:$0xff] }
0x234b   :  { %v9424_v44 = vld [vmem:[#allocation19] ss:$0 sm:$0xff] }
0x23a8   :  { %v4369_v22 = vpop.xlane.xlu1 %4368 }
0x23a9   :  { %10651 = vrcp.f32 %v4369_v22 }
0x23ac   :  { %v4532_v42 = vpop.xlane.xlu1 %4531 }
0x23ad   :  { %v4536_v48 = vmul.f32 0.03125, %v4532_v42 }
0x23af   :  { %v4538_v51 = vsub.f32 %v4528_v29, %v4536_v48  ;;  %v9427_v48 = vld [vmem:[#allocation21] ss:$0 sm:$0xff] }
0x23b1   :  { %v4540_v24 = vmul.f32 %v4538_v51, %v4538_v51 }
0x23b3   :  { %v10652_v45 = vpop.eup %10651  ;;  %v4542_v10 = vsel %vm348_vm1, %v4540_v24, 0.0 }
0x23b4   :  { %v4371_v46 = vmul.f32 %v10652_v45, %v10650_v27 }
0x23b6   :  { %10078 = vmatmul.mubr.msk.f32.vlgmr.msra.gmra.mrb[48].mxu1 %vm440_vm3, %v4371_v46 }
0x23b7   :  { %10460 = vmatpush3.bf16.msra.mxu1 %v10457_v9 }
0x23b8   :  { %10462 = vmatprep.subr.bf16.mxu1 %v10461_v54 }
0x23bb   :  { %10464 = vmatpush3.bf16.msra.mxu1 %v10461_v54 }
0x2489   :  { %v4444_v47 = vpop.f32.mrb[48].mxu1 }
0x248a   :  { %v10079_v43 = vpop.f32.mrb[49].mxu1  ;;  %10083 = vmatmul.mubr.msk.f32.vlgmr.msra.gmra.mrb[52].mxu0 %vm440_vm3, %v4444_v47 }
0x248b   :  { %10468 = vmatpush3.bf16.msra.mxu0 %v10465_v14 }
0x248c   :  { %10470 = vmatprep.subr.bf16.mxu0 %v10469_v15 }
0x248f   :  { %10472 = vmatpush3.bf16.msra.mxu0 %v10469_v15  ;;  %v4792_v15 = vrot.slane %v11640_v60, %v11935_v13 }
0x2490   :  { %10474 = vmatprep.subr.bf16.mxu0 %v10473_v20 }
0x2493   :  { %10476 = vmatpush3.bf16.msra.mxu0 %v10473_v20 }
0x255d   :  { %v4517_v8 = vpop.f32.mrb[52].mxu0 }
0x255e   :  { %v4521_v2 = vadd.f32 %v4517_v8, %v4281_v38  ;;  %v10084_v50 = vpop.f32.mrb[53].mxu0  ;;  %v10477_v38 = vpack.c.bf16 %v4667_v41, %v4666_v37 }
0x2560   :  { %v4527_v52 = vadd.f32 %v9423_v25, %v4521_v2  ;;  %10478 = vmatprep.subr.bf16.mxu0 %v10477_v38 }
0x2561   :  { %10480 = vmatpush3.bf16.msra.mxu0 %v10477_v38 }
0x2562   :  { %v4529_v53 = vadd.f32 %v4527_v52, %v11673_v31  ;;  %v4559_v31 = vrot.slane %v11635_v40, %v11539_v0  ;;  %10131 = vmatprep.subr.mxu0 %v11054_v19 }
0x2564   :  { %v4533_v18 = vsel %vm348_vm1, %v4529_v53, 0.0 }
0x2565   :  { %4534 = vadd.xlane.f32.xlu1 %v4533_v18 }
0x2569   :  { %4543 = vadd.xlane.f32.xlu1 %v4542_v10 }
0x25f2   :  { %v4535_v55 = vpop.xlane.xlu1 %4534 }
0x25f3   :  { %v4537_v56 = vmul.f32 0.03125, %v4535_v55 }
0x25f5   :  { %v4539_v58 = vsub.f32 %v4529_v53, %v4537_v56 }
0x25f6   :  { %v4544_v59 = vpop.xlane.xlu1 %4543 }
0x25f7   :  { %v4548_v61 = vmul.f32 0.03125, %v4544_v59  ;;  %v4541_v33 = vmul.f32 %v4539_v58, %v4539_v58 }
0x25f9   :  { %v4550_v39 = vadd.f32 1e-05, %v4548_v61  ;;  %v4545_v62 = vsel %vm348_vm1, %v4541_v33, 0.0 }
0x25fa   :  { %4546 = vadd.xlane.f32.xlu1 %v4545_v62 }
0x25fb   :  { %10653 = vrsqrt.f32 %v4550_v39 }
0x2605   :  { %v10654_v57 = vpop.eup %10653 }
0x2606   :  { %v4554_v49 = vmul.f32 %v10654_v57, %v4538_v51  ;;  %v9430_v57 = vld [vmem:[%s12476_s8 + $0x20] sm:$0xff] }
0x2608   :  { %v4560_v5 = vmul.f32 %v4559_v31, %v4554_v49  ;;  %v9431_v49 = vld [vmem:[%s12476_s8 + $0x28] sm:$0xff] }
0x260a   :  { %v4566_v17 = vadd.f32 %v4565_v1, %v4560_v5  ;;  %v9432_v5 = vld [vmem:[%s12476_s8 + $0x30] sm:$0xff] }
0x260c   :  { %10093 = vmatprep.mubr.msk.f32.mxu1 %vm348_vm1, %v4566_v17 }
0x2687   :  { %v4547_v21 = vpop.xlane.xlu1 %4546 }
0x2688   :  { %v4549_v23 = vmul.f32 0.03125, %v4547_v21 }
0x268a   :  { %v4551_v25 = vadd.f32 1e-05, %v4549_v23 }
0x268c   :  { %10655 = vrsqrt.f32 %v4551_v25 }
0x2696   :  { %v10656_v26 = vpop.eup %10655 }
0x2697   :  { %v4555_v27 = vmul.f32 %v10656_v26, %v4539_v58 }
0x2699   :  { %v4561_v28 = vmul.f32 %v4559_v31, %v4555_v27 }
0x269b   :  { %v4567_v29 = vadd.f32 %v4565_v1, %v4561_v28  ;;  %v10481_v1 = vpack.c.bf16 %v9431_v49, %v9430_v57  ;;  %v12004_v49 = vld [vmem:[%s12478_s10 + $0x20] sm:$0xff] }
0x269d   :  { %10094 = vmatmul.mubr.msk.f32.vlgmr.msra.gmra.mrb[50].mxu1 %vm348_vm1, %v4567_v29  ;;  %10482 = vmatprep.subr.bf16.mxu1 %v10481_v1 }
0x269e   :  { %10484 = vmatpush3.bf16.msra.mxu1 %v10481_v1 }
0x2770   :  { %v10095_v22 = vpop.f32.mrb[50].mxu1 }
0x2771   :  { %v4655_v45 = vadd.f32 %v10095_v22, %v9424_v44  ;;  %v4649_v46 = vpop.f32.mrb[51].mxu1 }
0x2772   :  { %v4650_v47 = vadd.f32 %v9424_v44, %v4649_v46 }
0x2773   :  { %v4659_v42 = vmax.f32 %v4655_v45, 0.0 }
0x2774   :  { %v4658_v43 = vmax.f32 %v4650_v47, 0.0 }
0x2776   :  { %10112 = vmatprep.mubr.msk.f32.mxu0 %vm4673_vm6, %v4658_v43 }
0x2777   :  { %10113 = vmatmul.mubr.msk.f32.vlgmr.msra.gmra.mrb[54].mxu0 %vm4673_vm6, %v4659_v42 }
0x2778   :  { %10133 = vmatprep.mubr.msk.f32.mxu0 %vm11055_vm2, %v11054_v19 }
0x284a   :  { %v10114_v8 = vpop.f32.mrb[54].mxu0 }
0x284b   :  { %v4752_v2 = vadd.f32 %v10114_v8, %v9427_v48  ;;  %v4746_v50 = vpop.f32.mrb[55].mxu0 }
0x284c   :  { %v4747_v51 = vadd.f32 %v9427_v48, %v4746_v50 }
0x284d   :  { %v4756_v52 = vadd.f32 %v4752_v2, %v4567_v29 }
0x284e   :  { %v4755_v53 = vadd.f32 %v4747_v51, %v4566_v17  ;;  %v9433_v17 = vld [vmem:[%s12476_s8 + $0x38] sm:$0xff] }
0x284f   :  { %v4760_v18 = vsel %vm348_vm1, %v4756_v52, 0.0  ;;  %v10485_v34 = vpack.c.bf16 %v9433_v17, %v9432_v5 }
0x2850   :  { %4761 = vadd.xlane.f32.xlu0 %v4760_v18  ;;  %v4757_v24 = vsel %vm348_vm1, %v4755_v53, 0.0 }
0x2851   :  { %4758 = vadd.xlane.f32.xlu1 %v4757_v24  ;;  %10486 = vmatprep.subr.bf16.mxu1 %v10485_v34 }
0x2852   :  { %10488 = vmatpush3.bf16.msra.mxu1 %v10485_v34 }
0x2853   :  { %10126 = vmatprep.subr.mxu1 %v11054_v19 }
0x28dd   :  { %v4762_v10 = vpop.xlane.xlu0 %4761 }
0x28de   :  { %v4764_v55 = vmul.f32 0.03125, %v4762_v10  ;;  %v4759_v56 = vpop.xlane.xlu1 %4758 }
0x28df   :  { %v4763_v58 = vmul.f32 0.03125, %v4759_v56  ;;  %v11989_v56 = vld [vmem:[%s12478_s10 + $0x28] sm:$0xff] }
0x28e0   :  { %v4766_v59 = vsub.f32 %v4756_v52, %v4764_v55 }
0x28e1   :  { %v4765_v61 = vsub.f32 %v4755_v53, %v4763_v58 }
0x28e2   :  { %v4768_v62 = vmul.f32 %v4766_v59, %v4766_v59 }
0x28e3   :  { %v4767_v33 = vmul.f32 %v4765_v61, %v4765_v61 }
0x28e4   :  { %v4772_v31 = vsel %vm348_vm1, %v4768_v62, 0.0 }
0x28e5   :  { %v4769_v39 = vsel %vm348_vm1, %v4767_v33, 0.0 }
0x28e6   :  { %4770 = vadd.xlane.f32.xlu1 %v4769_v39 }
0x28ea   :  { %4773 = vadd.xlane.f32.xlu1 %v4772_v31 }
0x2973   :  { %v4771_v7 = vpop.xlane.xlu1 %4770 }
0x2974   :  { %v4775_v9 = vmul.f32 0.03125, %v4771_v7 }
0x2976   :  { %v4777_v11 = vadd.f32 1e-05, %v4775_v9 }
0x2977   :  { %v4774_v3 = vpop.xlane.xlu1 %4773 }
0x2978   :  { %10657 = vrsqrt.f32 %v4777_v11  ;;  %v4776_v54 = vmul.f32 0.03125, %v4774_v3 }
0x297a   :  { %v4778_v12 = vadd.f32 1e-05, %v4776_v54 }
0x297c   :  { %10659 = vrsqrt.f32 %v4778_v12 }
0x2982   :  { %v10658_v14 = vpop.eup %10657 }
0x2983   :  { %v4781_v63 = vmul.f32 %v10658_v14, %v4765_v61 }
0x2985   :  { %v4787_v16 = vmul.f32 %v4786_v35, %v4781_v63 }
0x2986   :  { %v10660_v6 = vpop.eup %10659 }
0x2987   :  { %v4782_v20 = vmul.f32 %v10660_v6, %v4766_v59  ;;  %v11941_v21 = vadd.f32 %v4792_v15, %v4787_v16 }
0x2989   :  { %v4788_v23 = vmul.f32 %v4786_v35, %v4782_v20  ;;  %10123 = vmatprep.mubr.msk.f32.mxu1 %vm348_vm1, %v11941_v21 }
0x298b   :  { %v11945_v25 = vadd.f32 %v4792_v15, %v4788_v23 }
0x298d   :  { %10124 = vmatmul.mubr.msk.f32.vlgmr.msra.gmra.mrb[52].mxu1 %vm348_vm1, %v11945_v25 }
0x298e   :  { %10128 = vmatprep.mubr.msk.f32.mxu1 %vm11055_vm2, %v11054_v19 }
0x2a60   :  { %v10125_v40 = vpop.f32.mrb[52].mxu1 }
0x2a61   :  { %v11951_v60 = vadd.f32 %v10125_v40, %v9438_v30  ;;  %v4883_v26 = vpop.f32.mrb[53].mxu1 }
0x2a62   :  { %v11953_v27 = vadd.f32 %v9438_v30, %v4883_v26 }
0x2a64   :  { %5058 = vrot.lane.b32.xlu0 %v11953_v27, %s11056_s30  ;;  %4893 = vrot.lane.b32.xlu1 %v11953_v27, %s11057_s6 }
0x2a68   :  { %5060 = vrot.lane.b32.xlu1 %v11953_v27, %s11058_s0 }
0x2ad6   :  { %v4894_v28 = vpop.permute.xlu1 %4893  ;;  %v5059_v37 = vpop.permute.xlu0 %5058 }
0x2ad7   :  { %10127 = vmatpush3.xpose.msk.msra.mxu1 %vm440_vm3, %v4894_v28 }
0x2ad8   :  { %10136 = vmatprep.subr.mxu1 %v11054_v19 }
0x2ada   :  { %10129 = vmatmul.mubr.msk.f32.vlgmr.msra.gmra.mrb[54].mxu1 %vm440_vm3, %v11953_v27  ;;  %v5061_v29 = vpop.permute.xlu1 %5060 }
0x2adb   :  { %10137 = vmatpush3.xpose.msk.msra.mxu1 %vm440_vm3, %v5061_v29  ;;  %10138 = vmatprep.mubr.msk.f32.mxu1 %vm11055_vm2, %v11054_v19 }
0x2adc   :  { %10146 = vmatprep.subr.mxu1 %v11054_v19 }
0x2ade   :  { %10139 = vmatmul.mubr.msk.f32.vlgmr.msra.gmra.mrb[56].mxu1 %vm440_vm3, %v5059_v37 }
0x2adf   :  { %10148 = vmatprep.mubr.msk.f32.mxu1 %vm11055_vm2, %v11054_v19  ;;  %10147 = vmatpush3.msra.mxu1 %v11989_v56 }
0x2ae0   :  { %10156 = vmatprep.subr.mxu1 %v11054_v19 }
0x2bad   :  { %v4965_v41 = vpop.f32.mrb[54].mxu1 }
0x2bae   :  { %v4969_v38 = vmul.f32 0.35355338, %v4965_v41  ;;  %v10130_v44 = vpop.f32.mrb[55].mxu1 }
0x2bb0   :  { %v4970_v22 = vadd.f32 %v4969_v38, %v11421_v36 }
0x2bb1   :  { %v5132_v45 = vpop.f32.mrb[56].mxu1 }
0x2bb2   :  { %v5136_v46 = vmul.f32 0.35355338, %v5132_v45  ;;  %v10140_v47 = vpop.f32.mrb[57].mxu1  ;;  %v4971_v43 = vsel %vm440_vm3, %v4970_v22, -inf }
0x2bb3   :  { %4972 = vmax.xlane.f32.xlu1 %v4971_v43 }
0x2bb4   :  { %v5137_v42 = vadd.f32 %v5136_v46, %v11421_v36 }
0x2bb6   :  { %v5138_v48 = vsel %vm440_vm3, %v5137_v42, -inf }
0x2bb7   :  { %5139 = vmax.xlane.f32.xlu0 %v5138_v48 }
0x2bcd   :  { %5149 = vrot.lane.b32.xlu0 %v11953_v27, %s11059_s22 }
0x2c40   :  { %v4973_v8 = vpop.xlane.xlu1 %4972 }
0x2c41   :  { %v4974_v2 = vsub.f32 %v4970_v22, %v4973_v8  ;;  %v12040_v22 = vld [vmem:[%s12478_s10 + $0x30] sm:$0xff] }
0x2c43   :  { %v4975_v50 = vmul.f32 1.442695, %v4974_v2 }
0x2c44   :  { %v5140_v51 = vpop.xlane.xlu0 %5139 }
0x2c45   :  { %10661 = vpow2.f32 %v4975_v50  ;;  %v5141_v52 = vsub.f32 %v5137_v42, %v5140_v51 }
0x2c47   :  { %v5142_v53 = vmul.f32 1.442695, %v5141_v52 }
0x2c48   :  { %v5150_v62 = vpop.permute.xlu0 %5149 }
0x2c49   :  { %10663 = vpow2.f32 %v5142_v53 }
0x2c4f   :  { %v10662_v18 = vpop.eup %10661 }
0x2c50   :  { %v4977_v24 = vsel %vm440_vm3, %v10662_v18, 0.0 }
0x2c51   :  { %4978 = vadd.xlane.f32.xlu1 %v4977_v24 }
0x2c53   :  { %v10664_v10 = vpop.eup %10663 }
0x2c54   :  { %v5144_v55 = vsel %vm440_vm3, %v10664_v10, 0.0 }
0x2c55   :  { %5145 = vadd.xlane.f32.xlu1 %v5144_v55 }
0x2c66   :  { %4982 = vrot.lane.b32.xlu1 %v11953_v27, %s11060_s11 }
0x2c6a   :  { %5373 = vrot.lane.b32.xlu1 %v11953_v27, %s11061_s3 }
0x2c6e   :  { %5371 = vrot.lane.b32.xlu1 %v11953_v27, %s11062_s28 }
0x2cde   :  { %v4979_v58 = vpop.xlane.xlu1 %4978 }
0x2cdf   :  { %10665 = vrcp.f32 %v4979_v58 }
0x2ce2   :  { %v5146_v59 = vpop.xlane.xlu1 %5145 }
0x2ce3   :  { %10667 = vrcp.f32 %v5146_v59 }
0x2ce6   :  { %v4983_v61 = vpop.permute.xlu1 %4982 }
0x2ce7   :  { %10132 = vmatpush3.msra.mxu0 %v4983_v61 }
0x2ce8   :  { %10141 = vmatprep.subr.mxu0 %v11054_v19 }
0x2ce9   :  { %v10666_v33 = vpop.eup %10665 }
0x2cea   :  { %v4981_v39 = vmul.f32 %v10666_v33, %v10662_v18  ;;  %v5374_v17 = vpop.permute.xlu1 %5373 }
0x2cec   :  { %10134 = vmatmul.mubr.msk.f32.vlgmr.msra.gmra.mrb[56].mxu0 %vm440_vm3, %v4981_v39  ;;  %v12080_v39 = vld [vmem:[%s12478_s10 + $0x38] sm:$0xff] }
0x2ced   :  { %v10668_v31 = vpop.eup %10667  ;;  %10142 = vmatpush3.msra.mxu0 %v5150_v62  ;;  %10143 = vmatprep.mubr.msk.f32.mxu0 %vm11055_vm2, %v11054_v19 }
0x2cee   :  { %v5148_v57 = vmul.f32 %v10668_v31, %v10664_v10  ;;  %10151 = vmatprep.subr.mxu0 %v11054_v19  ;;  %v5372_v9 = vpop.permute.xlu1 %5371 }
0x2cf0   :  { %10144 = vmatmul.mubr.msk.f32.vlgmr.msra.gmra.mrb[58].mxu0 %vm440_vm3, %v5148_v57 }
0x2cf1   :  { %10153 = vmatprep.mubr.msk.f32.mxu0 %vm11055_vm2, %v11054_v19  ;;  %10152 = vmatpush3.msra.mxu0 %v12004_v49 }
0x2cf2   :  { %10161 = vmatprep.subr.mxu0 %v11054_v19 }
0x2dbf   :  { %v5054_v1 = vpop.f32.mrb[56].mxu0 }
0x2dc0   :  { %v10135_v5 = vpop.f32.mrb[57].mxu0  ;;  %10154 = vmatmul.mubr.msk.f32.vlgmr.msra.gmra.mrb[60].mxu0 %vm440_vm3, %v5054_v1 }
0x2dc1   :  { %10163 = vmatprep.mubr.msk.f32.mxu0 %vm11055_vm2, %v11054_v19 }
0x2dc3   :  { %v5221_v34 = vpop.f32.mrb[58].mxu0 }
0x2dc4   :  { %v10145_v7 = vpop.f32.mrb[59].mxu0  ;;  %10149 = vmatmul.mubr.msk.f32.vlgmr.msra.gmra.mrb[58].mxu1 %vm440_vm3, %v5221_v34 }
0x2dc5   :  { %10157 = vmatpush3.xpose.msk.msra.mxu1 %vm440_vm3, %v5374_v17  ;;  %10158 = vmatprep.mubr.msk.f32.mxu1 %vm11055_vm2, %v11054_v19 }
0x2dc6   :  { %10166 = vmatprep.subr.mxu1 %v11054_v19 }
0x2dc8   :  { %10159 = vmatmul.mubr.msk.f32.vlgmr.msra.gmra.mrb[60].mxu1 %vm440_vm3, %v5372_v9 }
0x2dc9   :  { %10168 = vmatprep.mubr.msk.f32.mxu1 %vm11055_vm2, %v11054_v19  ;;  %10167 = vmatpush3.msra.mxu1 %v12040_v22 }
0x2dca   :  { %10176 = vmatprep.subr.mxu1 %v11054_v19 }
0x2e93   :  { %v5367_v11 = vpop.f32.mrb[60].mxu0 }
0x2e94   :  { %v10155_v3 = vpop.f32.mrb[61].mxu0 }
0x2e97   :  { %v5294_v54 = vpop.f32.mrb[58].mxu1 }
0x2e98   :  { %v5368_v12 = vadd.f32 %v5367_v11, %v5294_v54  ;;  %v10150_v35 = vpop.f32.mrb[59].mxu1 }
0x2e9b   :  { %v5445_v14 = vpop.f32.mrb[60].mxu1 }
0x2e9c   :  { %v5449_v63 = vmul.f32 0.35355338, %v5445_v14  ;;  %v10160_v15 = vpop.f32.mrb[61].mxu1 }
0x2e9e   :  { %v5450_v16 = vadd.f32 %v5449_v63, %v11421_v36 }
0x2ea0   :  { %v5451_v6 = vsel %vm440_vm3, %v5450_v16, -inf }
0x2ea1   :  { %5452 = vmax.xlane.f32.xlu1 %v5451_v6 }
0x2eb2   :  { %5614 = vrot.lane.b32.xlu1 %v11953_v27, %s11063_s19 }
0x2eb6   :  { %5612 = vrot.lane.b32.xlu1 %v11953_v27, %s11064_s17 }
0x2f2e   :  { %v5453_v20 = vpop.xlane.xlu1 %5452 }
0x2f2f   :  { %v5454_v23 = vsub.f32 %v5450_v16, %v5453_v20 }
0x2f31   :  { %v5455_v30 = vmul.f32 1.442695, %v5454_v23 }
0x2f32   :  { %v5615_v41 = vpop.permute.xlu1 %5614 }
0x2f33   :  { %10669 = vpow2.f32 %v5455_v30 }
0x2f36   :  { %v5613_v44 = vpop.permute.xlu1 %5612 }
0x2f3d   :  { %v10670_v40 = vpop.eup %10669 }
0x2f3e   :  { %v5457_v26 = vsel %vm440_vm3, %v10670_v40, 0.0 }
0x2f3f   :  { %5458 = vadd.xlane.f32.xlu0 %v5457_v26 }
0x2f55   :  { %5462 = vrot.lane.b32.xlu0 %v11953_v27, %s11065_s25 }
0x2fcc   :  { %v5459_v28 = vpop.xlane.xlu0 %5458 }
0x2fcd   :  { %10671 = vrcp.f32 %v5459_v28 }
0x2fd0   :  { %v5463_v29 = vpop.permute.xlu0 %5462 }
0x2fd1   :  { %10162 = vmatpush3.msra.mxu0 %v5463_v29 }
0x2fd2   :  { %10171 = vmatprep.subr.mxu0 %v11054_v19 }
0x2fd7   :  { %v10672_v37 = vpop.eup %10671 }
0x2fd8   :  { %v5461_v38 = vmul.f32 %v10672_v37, %v10670_v40 }
0x2fda   :  { %10164 = vmatmul.mubr.msk.f32.vlgmr.msra.gmra.mrb[62].mxu0 %vm440_vm3, %v5461_v38 }
0x2fdb   :  { %10172 = vmatpush3.xpose.msk.msra.mxu0 %vm440_vm3, %v5615_v41  ;;  %10173 = vmatprep.mubr.msk.f32.mxu0 %vm11055_vm2, %v11054_v19 }
0x2fdc   :  { %10181 = vmatprep.subr.mxu0 %v11054_v19 }
0x2fde   :  { %10174 = vmatmul.mubr.msk.f32.vlgmr.msra.gmra.mrb[64].mxu0 %vm440_vm3, %v5613_v44 }
0x2fdf   :  { %10183 = vmatprep.mubr.msk.f32.mxu0 %vm11055_vm2, %v11054_v19  ;;  %10182 = vmatpush3.msra.mxu0 %v12080_v39 }
0x2fe0   :  { %10191 = vmatprep.subr.mxu0 %v11054_v19 }
0x30ad   :  { %v5534_v45 = vpop.f32.mrb[62].mxu0 }
0x30ae   :  { %v10165_v46 = vpop.f32.mrb[63].mxu0  ;;  %10169 = vmatmul.mubr.msk.f32.vlgmr.msra.gmra.mrb[62].mxu1 %vm440_vm3, %v5534_v45 }
0x30af   :  { %10178 = vmatprep.mubr.msk.f32.mxu1 %vm11055_vm2, %v11054_v19 }
0x30b1   :  { %v5686_v47 = vpop.f32.mrb[64].mxu0 }
0x30b2   :  { %v5690_v43 = vmul.f32 0.35355338, %v5686_v47  ;;  %v10175_v42 = vpop.f32.mrb[65].mxu0 }
0x30b4   :  { %v5691_v48 = vadd.f32 %v5690_v43, %v11421_v36 }
0x30b6   :  { %v5692_v8 = vsel %vm440_vm3, %v5691_v48, -inf }
0x30b7   :  { %5693 = vmax.xlane.f32.xlu1 %v5692_v8 }
0x30c8   :  { %5854 = vrot.lane.b32.xlu1 %v11951_v60, %s11057_s6 }
0x30cc   :  { %6021 = vrot.lane.b32.xlu1 %v11951_v60, %s11058_s0 }
0x3144   :  { %v5694_v2 = vpop.xlane.xlu1 %5693 }
0x3145   :  { %v5695_v50 = vsub.f32 %v5691_v48, %v5694_v2 }
0x3147   :  { %v5696_v51 = vmul.f32 1.442695, %v5695_v50 }
0x3148   :  { %v5855_v59 = vpop.permute.xlu1 %5854 }
0x3149   :  { %10673 = vpow2.f32 %v5696_v51 }
0x3153   :  { %v10674_v52 = vpop.eup %10673 }
0x3154   :  { %v5698_v53 = vsel %vm440_vm3, %v10674_v52, 0.0 }
0x3155   :  { %5699 = vadd.xlane.f32.xlu0 %v5698_v53 }
0x316b   :  { %5703 = vrot.lane.b32.xlu0 %v11953_v27, %s11066_s7  ;;  %v6022_v27 = vpop.permute.xlu1 %6021 }
0x316f   :  { %6019 = vrot.lane.b32.xlu0 %v11951_v60, %s11056_s30 }
0x3181   :  { %v5607_v36 = vpop.f32.mrb[62].mxu1 }
0x3182   :  { %v12058_v18 = vadd.f32 %v5607_v36, %v5368_v12  ;;  %v10170_v24 = vpop.f32.mrb[63].mxu1 }
0x31e2   :  { %v5700_v10 = vpop.xlane.xlu0 %5699 }
0x31e3   :  { %10675 = vrcp.f32 %v5700_v10 }
0x31e6   :  { %v5704_v55 = vpop.permute.xlu0 %5703 }
0x31e7   :  { %10177 = vmatpush3.msra.mxu1 %v5704_v55 }
0x31e8   :  { %10186 = vmatprep.subr.mxu1 %v11054_v19 }
0x31ea   :  { %v6020_v33 = vpop.permute.xlu0 %6019 }
0x31ed   :  { %v10676_v58 = vpop.eup %10675 }
0x31ee   :  { %v5702_v61 = vmul.f32 %v10676_v58, %v10674_v52 }
0x31f0   :  { %10179 = vmatmul.mubr.msk.f32.vlgmr.msra.gmra.mrb[64].mxu1 %vm440_vm3, %v5702_v61 }
0x31f1   :  { %10187 = vmatpush3.xpose.msk.msra.mxu1 %vm440_vm3, %v5855_v59  ;;  %10188 = vmatprep.mubr.msk.f32.mxu1 %vm11055_vm2, %v11054_v19 }
0x31f2   :  { %10196 = vmatprep.subr.mxu1 %v11054_v19 }
0x31f4   :  { %10189 = vmatmul.mubr.msk.f32.vlgmr.msra.gmra.mrb[66].mxu1 %vm440_vm3, %v11951_v60 }
0x31f5   :  { %10197 = vmatpush3.xpose.msk.msra.mxu1 %vm440_vm3, %v6022_v27  ;;  %10198 = vmatprep.mubr.msk.f32.mxu1 %vm11055_vm2, %v11054_v19 }
0x31f6   :  { %10206 = vmatprep.subr.mxu1 %v11054_v19 }
0x31f8   :  { %10199 = vmatmul.mubr.msk.f32.vlgmr.msra.gmra.mrb[68].mxu1 %vm440_vm3, %v6020_v33 }
0x31f9   :  { %10207 = vmatpush3.msra.mxu1 %v11989_v56  ;;  %10208 = vmatprep.mubr.msk.f32.mxu1 %vm11055_vm2, %v11054_v19 }
0x31fa   :  { %10216 = vmatprep.subr.mxu1 %v11054_v19 }
0x32c3   :  { %v5775_v62 = vpop.f32.mrb[64].mxu1 }
0x32c4   :  { %v10180_v31 = vpop.f32.mrb[65].mxu1  ;;  %10184 = vmatmul.mubr.msk.f32.vlgmr.msra.gmra.mrb[66].mxu0 %vm440_vm3, %v5775_v62 }
0x32c5   :  { %10193 = vmatprep.mubr.msk.f32.mxu0 %vm11055_vm2, %v11054_v19 }
0x32c7   :  { %v5926_v56 = vpop.f32.mrb[66].mxu1 }
0x32c8   :  { %v5930_v57 = vmul.f32 0.35355338, %v5926_v56  ;;  %v10190_v1 = vpop.f32.mrb[67].mxu1 }
0x32ca   :  { %v5931_v5 = vadd.f32 %v5930_v57, %v11547_v4 }
0x32cb   :  { %v6093_v17 = vpop.f32.mrb[68].mxu1 }
0x32cc   :  { %v6097_v34 = vmul.f32 0.35355338, %v6093_v17  ;;  %v10200_v7 = vpop.f32.mrb[69].mxu1  ;;  %v5932_v9 = vsel %vm440_vm3, %v5931_v5, -inf }
0x32cd   :  { %5933 = vmax.xlane.f32.xlu1 %v5932_v9 }
0x32ce   :  { %v6098_v11 = vadd.f32 %v6097_v34, %v11547_v4 }
0x32d0   :  { %v6099_v3 = vsel %vm440_vm3, %v6098_v11, -inf }
0x32d1   :  { %6100 = vmax.xlane.f32.xlu0 %v6099_v3 }
0x32de   :  { %5943 = vrot.lane.b32.xlu1 %v11951_v60, %s11060_s11 }
0x32e2   :  { %6334 = vrot.lane.b32.xlu1 %v11951_v60, %s11061_s3 }
0x32e6   :  { %6332 = vrot.lane.b32.xlu1 %v11951_v60, %s11062_s28 }
0x335a   :  { %v5934_v54 = vpop.xlane.xlu1 %5933 }
0x335b   :  { %v5935_v12 = vsub.f32 %v5931_v5, %v5934_v54 }
0x335d   :  { %v5936_v35 = vmul.f32 1.442695, %v5935_v12 }
0x335e   :  { %v5944_v14 = vpop.permute.xlu1 %5943  ;;  %v6101_v63 = vpop.xlane.xlu0 %6100 }
0x335f   :  { %10677 = vpow2.f32 %v5936_v35  ;;  %v6102_v15 = vsub.f32 %v6098_v11, %v6101_v63  ;;  %10192 = vmatpush3.msra.mxu0 %v5944_v14  ;;  %v9473_v14 = vld [vmem:[#allocation12 + $0x1] ss:$0 sm:$0xff] }
0x3360   :  { %10201 = vmatprep.subr.mxu0 %v11054_v19 }
0x3361   :  { %v6103_v16 = vmul.f32 1.442695, %v6102_v15 }
0x3362   :  { %v6335_v42 = vpop.permute.xlu1 %6334 }
0x3363   :  { %10679 = vpow2.f32 %v6103_v16 }
0x3369   :  { %v10678_v6 = vpop.eup %10677 }
0x336a   :  { %v5938_v20 = vsel %vm440_vm3, %v10678_v6, 0.0 }
0x336b   :  { %5939 = vadd.xlane.f32.xlu0 %v5938_v20 }
0x336d   :  { %v10680_v23 = vpop.eup %10679 }
0x336e   :  { %v6105_v30 = vsel %vm440_vm3, %v10680_v23, 0.0 }
0x336f   :  { %6106 = vadd.xlane.f32.xlu0 %v6105_v30 }
0x3385   :  { %6110 = vrot.lane.b32.xlu0 %v11951_v60, %s11059_s22 }
0x3397   :  { %v5848_v40 = vpop.f32.mrb[66].mxu0 }
0x3398   :  { %v12103_v26 = vadd.f32 %v5848_v40, %v12058_v18  ;;  %v10185_v28 = vpop.f32.mrb[67].mxu0 }
0x339a   :  { %v6818_v63 = vadd.f32 %v9473_v14, %v12103_v26 }
0x33f8   :  { %v5940_v29 = vpop.xlane.xlu0 %5939 }
0x33f9   :  { %10681 = vrcp.f32 %v5940_v29 }
0x33fc   :  { %v6107_v37 = vpop.xlane.xlu0 %6106 }
0x33fd   :  { %10683 = vrcp.f32 %v6107_v37 }
0x3400   :  { %v6111_v44 = vpop.permute.xlu0 %6110 }
0x3403   :  { %v10682_v41 = vpop.eup %10681 }
0x3404   :  { %v5942_v38 = vmul.f32 %v10682_v41, %v10678_v6 }
0x3406   :  { %10194 = vmatmul.mubr.msk.f32.vlgmr.msra.gmra.mrb[68].mxu0 %vm440_vm3, %v5942_v38 }
0x3407   :  { %v10684_v45 = vpop.eup %10683  ;;  %10202 = vmatpush3.msra.mxu0 %v6111_v44  ;;  %10203 = vmatprep.mubr.msk.f32.mxu0 %vm11055_vm2, %v11054_v19 }
0x3408   :  { %v6109_v46 = vmul.f32 %v10684_v45, %v10680_v23  ;;  %10211 = vmatprep.subr.mxu0 %v11054_v19 }
0x340a   :  { %10204 = vmatmul.mubr.msk.f32.vlgmr.msra.gmra.mrb[70].mxu0 %vm440_vm3, %v6109_v46 }
0x340b   :  { %10212 = vmatpush3.msra.mxu0 %v12004_v49  ;;  %10213 = vmatprep.mubr.msk.f32.mxu0 %vm11055_vm2, %v11054_v19  ;;  %v6333_v49 = vpop.permute.xlu1 %6332 }
0x340c   :  { %10221 = vmatprep.subr.mxu0 %v11054_v19 }
0x34d9   :  { %v6015_v47 = vpop.f32.mrb[68].mxu0 }
0x34da   :  { %v10195_v43 = vpop.f32.mrb[69].mxu0  ;;  %10214 = vmatmul.mubr.msk.f32.vlgmr.msra.gmra.mrb[72].mxu0 %vm440_vm3, %v6015_v47 }
0x34db   :  { %10223 = vmatprep.mubr.msk.f32.mxu0 %vm11055_vm2, %v11054_v19 }
0x34dd   :  { %v6182_v48 = vpop.f32.mrb[70].mxu0 }
0x34de   :  { %v10205_v8 = vpop.f32.mrb[71].mxu0  ;;  %10209 = vmatmul.mubr.msk.f32.vlgmr.msra.gmra.mrb[70].mxu1 %vm440_vm3, %v6182_v48 }
0x34df   :  { %10217 = vmatpush3.xpose.msk.msra.mxu1 %vm440_vm3, %v6335_v42  ;;  %10218 = vmatprep.mubr.msk.f32.mxu1 %vm11055_vm2, %v11054_v19 }
0x34e0   :  { %10226 = vmatprep.subr.mxu1 %v11054_v19 }
0x34e2   :  { %10219 = vmatmul.mubr.msk.f32.vlgmr.msra.gmra.mrb[72].mxu1 %vm440_vm3, %v6333_v49  ;;  %v9476_v49 = vld [vmem:[%s12480_s12 + $0x20] sm:$0xff] }
0x34e3   :  { %10227 = vmatpush3.msra.mxu1 %v12040_v22  ;;  %10228 = vmatprep.mubr.msk.f32.mxu1 %vm11055_vm2, %v11054_v19 }
0x34e4   :  { %10236 = vmatprep.subr.mxu1 %v11054_v19 }
0x35ad   :  { %v6328_v2 = vpop.f32.mrb[72].mxu0 }
0x35ae   :  { %v10215_v50 = vpop.f32.mrb[73].mxu0 }
0x35b1   :  { %v6255_v51 = vpop.f32.mrb[70].mxu1 }
0x35b2   :  { %v6329_v52 = vadd.f32 %v6328_v2, %v6255_v51  ;;  %v10210_v53 = vpop.f32.mrb[71].mxu1  ;;  %v9477_v2 = vld [vmem:[%s12480_s12 + $0x28] sm:$0xff] }
0x35b3   :  { %v10575_v50 = vpack.i.bf16 %v9477_v2, %v9476_v49 }
0x35b5   :  { %v6406_v36 = vpop.f32.mrb[72].mxu1 }
0x35b6   :  { %v6410_v18 = vmul.f32 0.35355338, %v6406_v36  ;;  %v10220_v24 = vpop.f32.mrb[73].mxu1 }
0x35b8   :  { %v6411_v10 = vadd.f32 %v6410_v18, %v11547_v4 }
0x35ba   :  { %v6412_v55 = vsel %vm440_vm3, %v6411_v10, -inf }
0x35bb   :  { %6413 = vmax.xlane.f32.xlu1 %v6412_v55  ;;  %v12177_v55 = vld [vmem:[%s12488_s20 + $0x4] sm:$0x7] }
0x35cc   :  { %6575 = vrot.lane.b32.xlu1 %v11951_v60, %s11063_s19 }
0x35d0   :  { %6573 = vrot.lane.b32.xlu1 %v11951_v60, %s11064_s17 }
0x3648   :  { %v6414_v22 = vpop.xlane.xlu1 %6413 }
0x3649   :  { %v6415_v58 = vsub.f32 %v6411_v10, %v6414_v22  ;;  %v12182_v22 = vld [vmem:[%s12489_s21 + $0x4] sm:$0x7] }
0x364b   :  { %v6416_v59 = vmul.f32 1.442695, %v6415_v58  ;;  %v6855_v58 = vrot.slane %v12177_v55, %v11409_v32 }
0x364c   :  { %v6576_v56 = vpop.permute.xlu1 %6575 }
0x364d   :  { %10685 = vpow2.f32 %v6416_v59  ;;  %v9478_v59 = vld [vmem:[%s12480_s12 + $0x30] sm:$0xff] }
0x3650   :  { %v6574_v1 = vpop.permute.xlu1 %6573 }
0x3657   :  { %v10686_v61 = vpop.eup %10685 }
0x3658   :  { %v6418_v27 = vsel %vm440_vm3, %v10686_v61, 0.0 }
0x3659   :  { %6419 = vadd.xlane.f32.xlu0 %v6418_v27 }
0x366f   :  { %6423 = vrot.lane.b32.xlu0 %v11951_v60, %s11065_s25  ;;  %s12513_s25 = sld [smem:[#allocation36_spill]] }
0x36e6   :  { %v6420_v33 = vpop.xlane.xlu0 %6419 }
0x36e7   :  { %10687 = vrcp.f32 %v6420_v33 }
0x36ea   :  { %v6424_v62 = vpop.permute.xlu0 %6423 }
0x36eb   :  { %10222 = vmatpush3.msra.mxu0 %v6424_v62  ;;  %v6861_v62 = vrot.slane %v12182_v22, %v11409_v32  ;;  %v12200_v32 = vld [vmem:[#allocation13 + $0x1] ss:$0 sm:$0xff] }
0x36ec   :  { %10231 = vmatprep.subr.mxu0 %v11054_v19 }
0x36f1   :  { %v10688_v31 = vpop.eup %10687 }
0x36f2   :  { %v6422_v57 = vmul.f32 %v10688_v31, %v10686_v61  ;;  %v9479_v61 = vld [vmem:[%s12480_s12 + $0x38] sm:$0xff] }
0x36f3   :  { %v10580_v31 = vpack.i.bf16 %v9479_v61, %v9478_v59 }
0x36f4   :  { %10224 = vmatmul.mubr.msk.f32.vlgmr.msra.gmra.mrb[74].mxu0 %vm440_vm3, %v6422_v57 }
0x36f5   :  { %10232 = vmatpush3.xpose.msk.msra.mxu0 %vm440_vm3, %v6576_v56  ;;  %10233 = vmatprep.mubr.msk.f32.mxu0 %vm11055_vm2, %v11054_v19 }
0x36f6   :  { %10241 = vmatprep.subr.mxu0 %v11054_v19 }
0x36f8   :  { %10234 = vmatmul.mubr.msk.f32.vlgmr.msra.gmra.mrb[76].mxu0 %vm440_vm3, %v6574_v1 }
0x36f9   :  { %10242 = vmatpush3.msra.mxu0 %v12080_v39  ;;  %10243 = vmatprep.mubr.msk.f32.mxu0 %vm11055_vm2, %v11054_v19 }
0x37c7   :  { %v6495_v5 = vpop.f32.mrb[74].mxu0 }
0x37c8   :  { %v10225_v17 = vpop.f32.mrb[75].mxu0  ;;  %10229 = vmatmul.mubr.msk.f32.vlgmr.msra.gmra.mrb[74].mxu1 %vm440_vm3, %v6495_v5 }
0x37c9   :  { %10238 = vmatprep.mubr.msk.f32.mxu1 %vm11055_vm2, %v11054_v19 }
0x37cb   :  { %v6647_v34 = vpop.f32.mrb[76].mxu0 }
0x37cc   :  { %v6651_v7 = vmul.f32 0.35355338, %v6647_v34  ;;  %v10235_v9 = vpop.f32.mrb[77].mxu0 }
0x37cd   :  { %v10493_v9 = vpack.c.bf16 %v9479_v61, %v9478_v59 }
0x37ce   :  { %v6652_v11 = vadd.f32 %v6651_v7, %v11547_v4  ;;  %v6820_v4 = vadd.f32 %v6818_v63, %v11941_v21  ;;  %v10737_v21 = vld [vmem:[%s12512_s5] sm:$0xff]  ;;  %v10489_v7 = vpack.c.bf16 %v9477_v2, %v9476_v49  ;;  %v10738_v63 = vld [vmem:[%s12512_s5 + $0x8] sm:$0xff] }
0x37d0   :  { %v6653_v3 = vsel %vm440_vm3, %v6652_v11, -inf  ;;  %v6826_v6 = vsel %vm348_vm1, %v6820_v4, 0.0 }
0x37d1   :  { %6654 = vmax.xlane.f32.xlu0 %v6653_v3 }
0x37e7   :  { %6664 = vrot.lane.b32.xlu0 %v11951_v60, %s11066_s7 }
0x37eb   :  { %10576 = vrot.lane.b32.xlu0 %v10575_v50, %s11057_s6 }
0x37ef   :  { %6978 = vrot.lane.b32.xlu0 %v12200_v32, %s11057_s6 }
0x385e   :  { %v6655_v39 = vpop.xlane.xlu0 %6654 }
0x385f   :  { %v6656_v54 = vsub.f32 %v6652_v11, %v6655_v39 }
0x3861   :  { %v6657_v12 = vmul.f32 1.442695, %v6656_v54 }
0x3862   :  { %v6665_v35 = vpop.permute.xlu0 %6664 }
0x3863   :  { %10689 = vpow2.f32 %v6657_v12  ;;  %10237 = vmatpush3.msra.mxu1 %v6665_v35 }
0x3864   :  { %10490 = vmatprep.subr.bf16.mxu1 %v10489_v7 }
0x3866   :  { %v10577_v1 = vpop.permute.xlu0 %10576 }
0x3867   :  { %v10579_v5 = vunpack.i.h.bf16 %v10577_v1  ;;  %v10578_v17 = vunpack.i.l.bf16 %v10577_v1 }
0x3869   :  { %v10497_v34 = vpack.c.bf16 %v10579_v5, %v10578_v17 }
0x386b   :  { %10498 = vmatprep.subr.bf16.mxu0 %v10497_v34 }
0x386d   :  { %v10690_v15 = vpop.eup %10689 }
0x386e   :  { %v6659_v16 = vsel %vm440_vm3, %v10690_v15, 0.0 }
0x386f   :  { %6660 = vadd.xlane.f32.xlu1 %v6659_v16 }
0x3873   :  { %6827 = vadd.xlane.f32.xlu1 %v6826_v6 }
0x389b   :  { %v6568_v20 = vpop.f32.mrb[74].mxu1 }
0x389c   :  { %v6572_v60 = vadd.f32 %v6568_v20, %v6329_v52  ;;  %v10230_v23 = vpop.f32.mrb[75].mxu1  ;;  %v12217_v20 = vpop.permute.xlu0 %6978 }
0x38fc   :  { %v6661_v30 = vpop.xlane.xlu1 %6660 }
0x38fd   :  { %10691 = vrcp.f32 %v6661_v30 }
0x3900   :  { %v6828_v37 = vpop.xlane.xlu1 %6827 }
0x3901   :  { %v6832_v41 = vmul.f32 0.03125, %v6828_v37 }
0x3903   :  { %v6834_v46 = vsub.f32 %v6820_v4, %v6832_v41 }
0x3905   :  { %v6836_v48 = vmul.f32 %v6834_v46, %v6834_v46 }
0x3907   :  { %v10692_v40 = vpop.eup %10691  ;;  %v6838_v8 = vsel %vm348_vm1, %v6836_v48, 0.0 }
0x3908   :  { %v6663_v28 = vmul.f32 %v10692_v40, %v10690_v15 }
0x390a   :  { %10239 = vmatmul.mubr.msk.f32.vlgmr.msra.gmra.mrb[76].mxu1 %vm440_vm3, %v6663_v28 }
0x390b   :  { %10492 = vmatpush3.bf16.msra.mxu1 %v10489_v7 }
0x390c   :  { %10494 = vmatprep.subr.bf16.mxu1 %v10493_v9 }
0x390f   :  { %10496 = vmatpush3.bf16.msra.mxu1 %v10493_v9 }
0x3910   :  { %10268 = vmatprep.subr.mxu1 %v11054_v19 }
0x39dd   :  { %v6736_v29 = vpop.f32.mrb[76].mxu1 }
0x39de   :  { %v10240_v26 = vpop.f32.mrb[77].mxu1  ;;  %10244 = vmatmul.mubr.msk.f32.vlgmr.msra.gmra.mrb[78].mxu0 %vm440_vm3, %v6736_v29 }
0x39df   :  { %10265 = vmatprep.mubr.msk.f32.mxu0 %vm348_vm1, %v10737_v21  ;;  %10500 = vmatpush3.bf16.msra.mxu0 %v10497_v34 }
0x3ab1   :  { %v6809_v38 = vpop.f32.mrb[78].mxu0 }
0x3ab2   :  { %v6813_v44 = vadd.f32 %v6809_v38, %v6572_v60  ;;  %v10245_v45 = vpop.f32.mrb[79].mxu0 }
0x3ab4   :  { %v6819_v47 = vadd.f32 %v9473_v14, %v6813_v44 }
0x3ab6   :  { %v6821_v43 = vadd.f32 %v6819_v47, %v11945_v25 }
0x3ab8   :  { %v6829_v42 = vsel %vm348_vm1, %v6821_v43, 0.0 }
0x3ab9   :  { %6830 = vadd.xlane.f32.xlu1 %v6829_v42 }
0x3abd   :  { %6839 = vadd.xlane.f32.xlu1 %v6838_v8 }
0x3b46   :  { %v6831_v51 = vpop.xlane.xlu1 %6830 }
0x3b47   :  { %v6833_v25 = vmul.f32 0.03125, %v6831_v51 }
0x3b49   :  { %v6835_v52 = vsub.f32 %v6821_v43, %v6833_v25 }
0x3b4a   :  { %v6840_v53 = vpop.xlane.xlu1 %6839 }
0x3b4b   :  { %v6844_v36 = vmul.f32 0.03125, %v6840_v53  ;;  %v6837_v18 = vmul.f32 %v6835_v52, %v6835_v52 }
0x3b4d   :  { %v6846_v24 = vadd.f32 1e-05, %v6844_v36  ;;  %v6841_v10 = vsel %vm348_vm1, %v6837_v18, 0.0 }
0x3b4e   :  { %6842 = vadd.xlane.f32.xlu1 %v6841_v10 }
0x3b4f   :  { %10693 = vrsqrt.f32 %v6846_v24 }
0x3b59   :  { %v10694_v27 = vpop.eup %10693 }
0x3b5a   :  { %v6850_v33 = vmul.f32 %v10694_v27, %v6834_v46 }
0x3b5c   :  { %v6856_v56 = vmul.f32 %v6855_v58, %v6850_v33  ;;  %v12265_v33 = vld [vmem:[#allocation15 + $0x20] sm:$0xff] }
0x3b5e   :  { %v12194_v57 = vadd.f32 %v6861_v62, %v6856_v56 }
0x3b5f   :  { %10581 = vrot.lane.b32.xlu1 %v10580_v31, %s11057_s6 }
0x3b60   :  { %10254 = vmatprep.mubr.msk.f32.mxu1 %vm348_vm1, %v12194_v57 }
0x3bdb   :  { %v6843_v11 = vpop.xlane.xlu1 %6842 }
0x3bdc   :  { %v6845_v3 = vmul.f32 0.03125, %v6843_v11 }
0x3bde   :  { %v6847_v39 = vadd.f32 1e-05, %v6845_v3 }
0x3bdf   :  { %v10582_v54 = vpop.permute.xlu1 %10581 }
0x3be0   :  { %10695 = vrsqrt.f32 %v6847_v39  ;;  %v10584_v12 = vunpack.i.h.bf16 %v10582_v54  ;;  %v10583_v35 = vunpack.i.l.bf16 %v10582_v54 }
0x3be2   :  { %v10501_v14 = vpack.c.bf16 %v10584_v12, %v10583_v35 }
0x3be4   :  { %10502 = vmatprep.subr.bf16.mxu0 %v10501_v14 }
0x3be5   :  { %10504 = vmatpush3.bf16.msra.mxu0 %v10501_v14 }
0x3be6   :  { %10273 = vmatprep.subr.mxu0 %v11054_v19 }
0x3be8   :  { %10266 = vmatmul.mubr.msk.f32.vlgmr.msra.gmra.mrb[80].mxu0 %vm348_vm1, %v10738_v63 }
0x3be9   :  { %10275 = vmatprep.mubr.msk.f32.mxu0 %vm11055_vm2, %v11054_v19 }
0x3bea   :  { %v10696_v15 = vpop.eup %10695 }
0x3beb   :  { %v6851_v16 = vmul.f32 %v10696_v15, %v6835_v52 }
0x3bed   :  { %v6857_v4 = vmul.f32 %v6855_v58, %v6851_v16 }
0x3bef   :  { %v12211_v6 = vadd.f32 %v6861_v62, %v6857_v4  ;;  %v12268_v62 = vld [vmem:[#allocation15 + $0x28] sm:$0xff] }
0x3bf1   :  { %10255 = vmatmul.mubr.msk.f32.vlgmr.msra.gmra.mrb[78].mxu1 %vm348_vm1, %v12211_v6 }
0x3bf2   :  { %10270 = vmatprep.mubr.msk.f32.mxu1 %vm11055_vm2, %v11054_v19 }
0x3cbb   :  { %v12219_v60 = vpop.f32.mrb[80].mxu0 }
0x3cbc   :  { %v7047_v23 = vpop.f32.mrb[81].mxu0 }
0x3cbd   :  { %v12222_v30 = vadd.f32 %v7047_v23, %v12217_v20 }
0x3cbf   :  { %7222 = vrot.lane.b32.xlu0 %v12222_v30, %s11056_s30  ;;  %10269 = vmatpush3.xpose.msk.msra.mxu1 %vm440_vm3, %v12222_v30 }
0x3cc0   :  { %10278 = vmatprep.subr.mxu1 %v11054_v19 }
0x3cc4   :  { %v12229_v40 = vpop.f32.mrb[78].mxu1 }
0x3cc5   :  { %v6952_v28 = vpop.f32.mrb[79].mxu1 }
0x3cc6   :  { %v12232_v29 = vadd.f32 %v12200_v32, %v6952_v28 }
0x3cc8   :  { %7220 = vrot.lane.b32.xlu0 %v12232_v29, %s11056_s30  ;;  %10271 = vmatmul.mubr.msk.f32.vlgmr.msra.gmra.mrb[80].mxu1 %vm440_vm3, %v12232_v29 }
0x3cc9   :  { %10280 = vmatprep.mubr.msk.f32.mxu1 %vm11055_vm2, %v11054_v19 }
0x3d31   :  { %v7223_v26 = vpop.permute.xlu0 %7222 }
0x3d32   :  { %10279 = vmatpush3.xpose.msk.msra.mxu1 %vm440_vm3, %v7223_v26 }
0x3d33   :  { %10288 = vmatprep.subr.mxu1 %v11054_v19 }
0x3d3a   :  { %v7221_v21 = vpop.permute.xlu0 %7220 }
0x3d3b   :  { %10281 = vmatmul.mubr.msk.f32.vlgmr.msra.gmra.mrb[82].mxu1 %vm440_vm3, %v7221_v21 }
0x3d3c   :  { %10290 = vmatprep.mubr.msk.f32.mxu1 %vm11055_vm2, %v11054_v19  ;;  %10289 = vmatpush3.msra.mxu1 %v12268_v62 }
0x3d3d   :  { %10298 = vmatprep.subr.mxu1 %v11054_v19 }
0x3d9b   :  { %v7128_v37 = vpop.f32.mrb[80].mxu1 }
0x3d9c   :  { %v7132_v41 = vmul.f32 0.35355338, %v7128_v37  ;;  %v10272_v38 = vpop.f32.mrb[81].mxu1 }
0x3d9d   :  { %v12301_v38 = vld [vmem:[#allocation15 + $0x30] sm:$0xff] }
0x3d9e   :  { %v7133_v44 = vsel %vm440_vm3, %v7132_v41, -inf }
0x3d9f   :  { %7134 = vmax.xlane.f32.xlu0 %v7133_v44 }
0x3e0e   :  { %v7294_v45 = vpop.f32.mrb[82].mxu1 }
0x3e0f   :  { %v7298_v46 = vmul.f32 0.35355338, %v7294_v45  ;;  %v10282_v47 = vpop.f32.mrb[83].mxu1 }
0x3e11   :  { %v7299_v43 = vsel %vm440_vm3, %v7298_v46, -inf }
0x3e12   :  { %7300 = vmax.xlane.f32.xlu1 %v7299_v43 }
0x3e23   :  { %7310 = vrot.lane.b32.xlu1 %v12222_v30, %s11058_s0 }
0x3e27   :  { %7534 = vrot.lane.b32.xlu1 %v12222_v30, %s11062_s28 }
0x3e2b   :  { %7532 = vrot.lane.b32.xlu1 %v12232_v29, %s11062_s28 }
0x3e2c   :  { %v7135_v42 = vpop.xlane.xlu0 %7134 }
0x3e2d   :  { %v7136_v48 = vsub.f32 %v7132_v41, %v7135_v42 }
0x3e2f   :  { %v7137_v8 = vmul.f32 1.442695, %v7136_v48  ;;  %v12311_v48 = vadd.f32 %v12219_v60, %v12217_v20 }
0x3e31   :  { %10697 = vpow2.f32 %v7137_v8  ;;  %v12317_v8 = vadd.f32 %v12229_v40, %v12200_v32 }
0x3e3b   :  { %v10698_v49 = vpop.eup %10697 }
0x3e3c   :  { %v7139_v2 = vsel %vm440_vm3, %v10698_v49, 0.0 }
0x3e3d   :  { %7140 = vadd.xlane.f32.xlu0 %v7139_v2 }
0x3e9f   :  { %v7301_v50 = vpop.xlane.xlu1 %7300 }
0x3ea0   :  { %v7302_v51 = vsub.f32 %v7298_v46, %v7301_v50 }
0x3ea2   :  { %v7303_v25 = vmul.f32 1.442695, %v7302_v51 }
0x3ea3   :  { %v7311_v59 = vpop.permute.xlu1 %7310 }
0x3ea4   :  { %10699 = vpow2.f32 %v7303_v25 }
0x3ea7   :  { %v7535_v1 = vpop.permute.xlu1 %7534 }
0x3eab   :  { %v7533_v34 = vpop.permute.xlu1 %7532 }
0x3eae   :  { %v10700_v52 = vpop.eup %10699 }
0x3eaf   :  { %v7305_v53 = vsel %vm440_vm3, %v10700_v52, 0.0 }
0x3eb0   :  { %7306 = vadd.xlane.f32.xlu0 %v7305_v53 }
0x3ec6   :  { %7144 = vrot.lane.b32.xlu0 %v12222_v30, %s11057_s6 }
0x3eca   :  { %v7141_v36 = vpop.xlane.xlu0 %7140 }
0x3ecb   :  { %10701 = vrcp.f32 %v7141_v36 }
0x3ed5   :  { %v10702_v24 = vpop.eup %10701 }
0x3ed6   :  { %v7143_v10 = vmul.f32 %v10702_v24, %v10698_v49  ;;  %v12342_v24 = vld [vmem:[#allocation15 + $0x38] sm:$0xff] }
0x3f3d   :  { %v7307_v18 = vpop.xlane.xlu0 %7306 }
0x3f3e   :  { %10703 = vrcp.f32 %v7307_v18 }
0x3f41   :  { %v7145_v58 = vpop.permute.xlu0 %7144 }
0x3f42   :  { %10274 = vmatpush3.msra.mxu0 %v7145_v58 }
0x3f43   :  { %10276 = vmatmul.mubr.msk.f32.vlgmr.msra.gmra.mrb[82].mxu0 %vm440_vm3, %v7143_v10  ;;  %10283 = vmatprep.subr.mxu0 %v11054_v19 }
0x3f44   :  { %10284 = vmatpush3.msra.mxu0 %v7311_v59  ;;  %10285 = vmatprep.mubr.msk.f32.mxu0 %vm11055_vm2, %v11054_v19 }
0x3f45   :  { %10293 = vmatprep.subr.mxu0 %v11054_v19 }
0x3f48   :  { %v10704_v61 = vpop.eup %10703 }
0x3f49   :  { %v7309_v27 = vmul.f32 %v10704_v61, %v10700_v52 }
0x3f4b   :  { %10286 = vmatmul.mubr.msk.f32.vlgmr.msra.gmra.mrb[84].mxu0 %vm440_vm3, %v7309_v27 }
0x3f4c   :  { %10295 = vmatprep.mubr.msk.f32.mxu0 %vm11055_vm2, %v11054_v19  ;;  %10294 = vmatpush3.msra.mxu0 %v12265_v33 }
0x3f4d   :  { %10303 = vmatprep.subr.mxu0 %v11054_v19 }
0x4016   :  { %v7216_v31 = vpop.f32.mrb[82].mxu0 }
0x4017   :  { %v10277_v56 = vpop.f32.mrb[83].mxu0  ;;  %10296 = vmatmul.mubr.msk.f32.vlgmr.msra.gmra.mrb[86].mxu0 %vm440_vm3, %v7216_v31 }
0x4018   :  { %10305 = vmatprep.mubr.msk.f32.mxu0 %vm11055_vm2, %v11054_v19 }
0x401e   :  { %v7382_v5 = vpop.f32.mrb[84].mxu0 }
0x401f   :  { %v10287_v17 = vpop.f32.mrb[85].mxu0  ;;  %10291 = vmatmul.mubr.msk.f32.vlgmr.msra.gmra.mrb[84].mxu1 %vm440_vm3, %v7382_v5 }
0x4020   :  { %10299 = vmatpush3.xpose.msk.msra.mxu1 %vm440_vm3, %v7535_v1  ;;  %10300 = vmatprep.mubr.msk.f32.mxu1 %vm11055_vm2, %v11054_v19 }
0x4021   :  { %10308 = vmatprep.subr.mxu1 %v11054_v19 }
0x4023   :  { %10301 = vmatmul.mubr.msk.f32.vlgmr.msra.gmra.mrb[86].mxu1 %vm440_vm3, %v7533_v34 }
0x4024   :  { %10310 = vmatprep.mubr.msk.f32.mxu1 %vm11055_vm2, %v11054_v19  ;;  %10309 = vmatpush3.msra.mxu1 %v12301_v38 }
0x4025   :  { %10318 = vmatprep.subr.mxu1 %v11054_v19 }
0x40ea   :  { %v7528_v7 = vpop.f32.mrb[86].mxu0 }
0x40eb   :  { %v10297_v9 = vpop.f32.mrb[87].mxu0 }
0x40f2   :  { %v7455_v11 = vpop.f32.mrb[84].mxu1 }
0x40f3   :  { %v7529_v3 = vadd.f32 %v7528_v7, %v7455_v11  ;;  %v10292_v39 = vpop.f32.mrb[85].mxu1 }
0x40f6   :  { %v7606_v54 = vpop.f32.mrb[86].mxu1 }
0x40f7   :  { %v7610_v12 = vmul.f32 0.35355338, %v7606_v54  ;;  %v10302_v35 = vpop.f32.mrb[87].mxu1 }
0x40f9   :  { %v7611_v14 = vsel %vm440_vm3, %v7610_v12, -inf }
0x40fa   :  { %7612 = vmax.xlane.f32.xlu0 %v7611_v14 }
0x4110   :  { %7622 = vrot.lane.b32.xlu0 %v12222_v30, %s11061_s3 }
0x4114   :  { %7772 = vrot.lane.b32.xlu0 %v12232_v29, %s11064_s17 }
0x4187   :  { %v7613_v63 = vpop.xlane.xlu0 %7612 }
0x4188   :  { %v7614_v15 = vsub.f32 %v7610_v12, %v7613_v63 }
0x418a   :  { %v7615_v16 = vmul.f32 1.442695, %v7614_v15 }
0x418b   :  { %v7623_v4 = vpop.permute.xlu0 %7622 }
0x418c   :  { %10705 = vpow2.f32 %v7615_v16  ;;  %10304 = vmatpush3.msra.mxu0 %v7623_v4 }
0x418d   :  { %10313 = vmatprep.subr.mxu0 %v11054_v19 }
0x418f   :  { %v7773_v41 = vpop.permute.xlu0 %7772 }
0x4196   :  { %v10706_v23 = vpop.eup %10705 }
0x4197   :  { %v7617_v28 = vsel %vm440_vm3, %v10706_v23, 0.0 }
0x4198   :  { %7618 = vadd.xlane.f32.xlu1 %v7617_v28 }
0x41a9   :  { %7774 = vrot.lane.b32.xlu1 %v12222_v30, %s11064_s17 }
0x4225   :  { %v7619_v26 = vpop.xlane.xlu1 %7618 }
0x4226   :  { %10707 = vrcp.f32 %v7619_v26 }
0x4229   :  { %v7775_v29 = vpop.permute.xlu1 %7774 }
0x4230   :  { %v10708_v21 = vpop.eup %10707 }
0x4231   :  { %v7621_v37 = vmul.f32 %v10708_v21, %v10706_v23 }
0x4233   :  { %10306 = vmatmul.mubr.msk.f32.vlgmr.msra.gmra.mrb[88].mxu0 %vm440_vm3, %v7621_v37 }
0x4234   :  { %10314 = vmatpush3.xpose.msk.msra.mxu0 %vm440_vm3, %v7775_v29  ;;  %10315 = vmatprep.mubr.msk.f32.mxu0 %vm11055_vm2, %v11054_v19 }
0x4235   :  { %10323 = vmatprep.subr.mxu0 %v11054_v19 }
0x4237   :  { %10316 = vmatmul.mubr.msk.f32.vlgmr.msra.gmra.mrb[90].mxu0 %vm440_vm3, %v7773_v41 }
0x4238   :  { %10325 = vmatprep.mubr.msk.f32.mxu0 %vm11055_vm2, %v11054_v19  ;;  %10324 = vmatpush3.msra.mxu0 %v12342_v24 }
0x4239   :  { %10333 = vmatprep.subr.mxu0 %v11054_v19 }
0x4306   :  { %v7694_v44 = vpop.f32.mrb[88].mxu0 }
0x4307   :  { %v10307_v45 = vpop.f32.mrb[89].mxu0  ;;  %10311 = vmatmul.mubr.msk.f32.vlgmr.msra.gmra.mrb[88].mxu1 %vm440_vm3, %v7694_v44 }
0x4308   :  { %10320 = vmatprep.mubr.msk.f32.mxu1 %vm11055_vm2, %v11054_v19 }
0x430a   :  { %v7846_v46 = vpop.f32.mrb[90].mxu0 }
0x430b   :  { %v7850_v47 = vmul.f32 0.35355338, %v7846_v46  ;;  %v10317_v43 = vpop.f32.mrb[91].mxu0 }
0x430d   :  { %v7851_v42 = vsel %vm440_vm3, %v7850_v47, -inf }
0x430e   :  { %7852 = vmax.xlane.f32.xlu1 %v7851_v42 }
0x431f   :  { %8178 = vrot.lane.b32.xlu1 %v12311_v48, %s11056_s30 }
0x4323   :  { %8176 = vrot.lane.b32.xlu1 %v12317_v8, %s11056_s30 }
0x439b   :  { %v7853_v49 = vpop.xlane.xlu1 %7852 }
0x439c   :  { %v7854_v2 = vsub.f32 %v7850_v47, %v7853_v49 }
0x439e   :  { %v7855_v50 = vmul.f32 1.442695, %v7854_v2 }
0x439f   :  { %v8179_v18 = vpop.permute.xlu1 %8178 }
0x43a0   :  { %10709 = vpow2.f32 %v7855_v50 }
0x43aa   :  { %v10710_v51 = vpop.eup %10709 }
0x43ab   :  { %v7857_v25 = vsel %vm440_vm3, %v10710_v51, 0.0 }
0x43ac   :  { %7858 = vadd.xlane.f32.xlu0 %v7857_v25 }
0x43c2   :  { %7862 = vrot.lane.b32.xlu0 %v12222_v30, %s11063_s19  ;;  %v8177_v30 = vpop.permute.xlu1 %8176 }
0x43da   :  { %v7767_v20 = vpop.f32.mrb[88].mxu1 }
0x43db   :  { %v7771_v60 = vadd.f32 %v7767_v20, %v7529_v3  ;;  %v10312_v52 = vpop.f32.mrb[89].mxu1 }
0x4439   :  { %v7859_v53 = vpop.xlane.xlu0 %7858 }
0x443a   :  { %10711 = vrcp.f32 %v7859_v53 }
0x443d   :  { %v7863_v32 = vpop.permute.xlu0 %7862 }
0x443e   :  { %10319 = vmatpush3.msra.mxu1 %v7863_v32 }
0x443f   :  { %10328 = vmatprep.subr.mxu1 %v11054_v19 }
0x4444   :  { %v10712_v40 = vpop.eup %10711 }
0x4445   :  { %v7861_v36 = vmul.f32 %v10712_v40, %v10710_v51 }
0x4447   :  { %10321 = vmatmul.mubr.msk.f32.vlgmr.msra.gmra.mrb[90].mxu1 %vm440_vm3, %v7861_v36 }
0x4448   :  { %10329 = vmatpush3.xpose.msk.msra.mxu1 %vm440_vm3, %v12311_v48  ;;  %10330 = vmatprep.mubr.msk.f32.mxu1 %vm11055_vm2, %v11054_v19 }
0x4449   :  { %10338 = vmatprep.subr.mxu1 %v11054_v19 }
0x444b   :  { %10331 = vmatmul.mubr.msk.f32.vlgmr.msra.gmra.mrb[92].mxu1 %vm440_vm3, %v12317_v8 }
0x444c   :  { %10339 = vmatpush3.xpose.msk.msra.mxu1 %vm440_vm3, %v8179_v18  ;;  %10340 = vmatprep.mubr.msk.f32.mxu1 %vm11055_vm2, %v11054_v19 }
0x444d   :  { %10348 = vmatprep.subr.mxu1 %v11054_v19 }
0x444f   :  { %10341 = vmatmul.mubr.msk.f32.vlgmr.msra.gmra.mrb[94].mxu1 %vm440_vm3, %v8177_v30 }
0x4450   :  { %10349 = vmatpush3.msra.mxu1 %v12268_v62  ;;  %10350 = vmatprep.mubr.msk.f32.mxu1 %vm11055_vm2, %v11054_v19 }
0x4451   :  { %10358 = vmatprep.subr.mxu1 %v11054_v19 }
0x451a   :  { %v7934_v10 = vpop.f32.mrb[90].mxu1 }
0x451b   :  { %v10322_v58 = vpop.f32.mrb[91].mxu1  ;;  %10326 = vmatmul.mubr.msk.f32.vlgmr.msra.gmra.mrb[92].mxu0 %vm440_vm3, %v7934_v10 }
0x451c   :  { %10335 = vmatprep.mubr.msk.f32.mxu0 %vm11055_vm2, %v11054_v19 }
0x451e   :  { %v8084_v59 = vpop.f32.mrb[92].mxu1 }
0x451f   :  { %v8088_v61 = vmul.f32 0.35355338, %v8084_v59  ;;  %v10332_v27 = vpop.f32.mrb[93].mxu1  ;;  %v9517_v59 = vld [vmem:[#allocation16 + $0x1] ss:$0 sm:$0xff] }
0x4521   :  { %v8089_v62 = vsel %vm440_vm3, %v8088_v61, -inf }
0x4522   :  { %8090 = vmax.xlane.f32.xlu0 %v8089_v62  ;;  %v8250_v31 = vpop.f32.mrb[94].mxu1 }
0x4523   :  { %v8254_v56 = vmul.f32 0.35355338, %v8250_v31  ;;  %v10342_v1 = vpop.f32.mrb[95].mxu1 }
0x4525   :  { %v8255_v5 = vsel %vm440_vm3, %v8254_v56, -inf }
0x4526   :  { %8256 = vmax.xlane.f32.xlu1 %v8255_v5 }
0x4537   :  { %8266 = vrot.lane.b32.xlu1 %v12311_v48, %s11058_s0 }
0x453b   :  { %8490 = vrot.lane.b32.xlu1 %v12311_v48, %s11062_s28 }
0x453f   :  { %8488 = vrot.lane.b32.xlu1 %v12317_v8, %s11062_s28 }
0x45af   :  { %v8091_v17 = vpop.xlane.xlu0 %8090 }
0x45b0   :  { %v8092_v34 = vsub.f32 %v8088_v61, %v8091_v17 }
0x45b2   :  { %v8093_v7 = vmul.f32 1.442695, %v8092_v34 }
0x45b3   :  { %v8257_v9 = vpop.xlane.xlu1 %8256 }
0x45b4   :  { %10713 = vpow2.f32 %v8093_v7  ;;  %v8258_v11 = vsub.f32 %v8254_v56, %v8257_v9 }
0x45b6   :  { %v8259_v3 = vmul.f32 1.442695, %v8258_v11 }
0x45b7   :  { %v8267_v21 = vpop.permute.xlu1 %8266 }
0x45b8   :  { %10715 = vpow2.f32 %v8259_v3 }
0x45bb   :  { %v8491_v45 = vpop.permute.xlu1 %8490 }
0x45be   :  { %v10714_v39 = vpop.eup %10713 }
0x45bf   :  { %v8095_v54 = vsel %vm440_vm3, %v10714_v39, 0.0 }
0x45c0   :  { %8096 = vadd.xlane.f32.xlu0 %v8095_v54 }
0x45c2   :  { %v10716_v12 = vpop.eup %10715 }
0x45c3   :  { %v8261_v35 = vsel %vm440_vm3, %v10716_v12, 0.0 }
0x45c4   :  { %8262 = vadd.xlane.f32.xlu0 %v8261_v35 }
0x45da   :  { %8100 = vrot.lane.b32.xlu0 %v12311_v48, %s11057_s6 }
0x45ee   :  { %v8007_v14 = vpop.f32.mrb[92].mxu0 }
0x45ef   :  { %v12361_v63 = vadd.f32 %v8007_v14, %v7771_v60  ;;  %v10327_v15 = vpop.f32.mrb[93].mxu0 }
0x45f1   :  { %v8972_v62 = vadd.f32 %v9517_v59, %v12361_v63 }
0x464d   :  { %v8097_v16 = vpop.xlane.xlu0 %8096 }
0x464e   :  { %10717 = vrcp.f32 %v8097_v16 }
0x4651   :  { %v8263_v4 = vpop.xlane.xlu0 %8262 }
0x4652   :  { %10719 = vrcp.f32 %v8263_v4 }
0x4655   :  { %v8101_v23 = vpop.permute.xlu0 %8100 }
0x4656   :  { %10334 = vmatpush3.msra.mxu0 %v8101_v23 }
0x4657   :  { %10343 = vmatprep.subr.mxu0 %v11054_v19 }
0x4658   :  { %v10718_v28 = vpop.eup %10717 }
0x4659   :  { %v8099_v26 = vmul.f32 %v10718_v28, %v10714_v39 }
0x465b   :  { %10336 = vmatmul.mubr.msk.f32.vlgmr.msra.gmra.mrb[94].mxu0 %vm440_vm3, %v8099_v26 }
0x465c   :  { %v10720_v37 = vpop.eup %10719  ;;  %10344 = vmatpush3.msra.mxu0 %v8267_v21  ;;  %10345 = vmatprep.mubr.msk.f32.mxu0 %vm11055_vm2, %v11054_v19 }
0x465d   :  { %v8265_v29 = vmul.f32 %v10720_v37, %v10716_v12  ;;  %10353 = vmatprep.subr.mxu0 %v11054_v19 }
0x465f   :  { %10346 = vmatmul.mubr.msk.f32.vlgmr.msra.gmra.mrb[96].mxu0 %vm440_vm3, %v8265_v29 }
0x4660   :  { %10354 = vmatpush3.msra.mxu0 %v12265_v33  ;;  %10355 = vmatprep.mubr.msk.f32.mxu0 %vm11055_vm2, %v11054_v19  ;;  %v8489_v33 = vpop.permute.xlu1 %8488 }
0x4661   :  { %10363 = vmatprep.subr.mxu0 %v11054_v19 }
0x472e   :  { %v8172_v41 = vpop.f32.mrb[94].mxu0 }
0x472f   :  { %v10337_v44 = vpop.f32.mrb[95].mxu0  ;;  %10356 = vmatmul.mubr.msk.f32.vlgmr.msra.gmra.mrb[98].mxu0 %vm440_vm3, %v8172_v41 }
0x4730   :  { %10365 = vmatprep.mubr.msk.f32.mxu0 %vm11055_vm2, %v11054_v19 }
0x4732   :  { %v8338_v46 = vpop.f32.mrb[96].mxu0 }
0x4733   :  { %v10347_v47 = vpop.f32.mrb[97].mxu0  ;;  %10351 = vmatmul.mubr.msk.f32.vlgmr.msra.gmra.mrb[96].mxu1 %vm440_vm3, %v8338_v46 }
0x4734   :  { %10359 = vmatpush3.xpose.msk.msra.mxu1 %vm440_vm3, %v8491_v45  ;;  %10360 = vmatprep.mubr.msk.f32.mxu1 %vm11055_vm2, %v11054_v19 }
0x4735   :  { %10368 = vmatprep.subr.mxu1 %v11054_v19 }
0x4737   :  { %10361 = vmatmul.mubr.msk.f32.vlgmr.msra.gmra.mrb[98].mxu1 %vm440_vm3, %v8489_v33 }
0x4738   :  { %10369 = vmatpush3.msra.mxu1 %v12301_v38  ;;  %10370 = vmatprep.mubr.msk.f32.mxu1 %vm11055_vm2, %v11054_v19 }
0x4739   :  { %10378 = vmatprep.subr.mxu1 %v11054_v19 }
0x4802   :  { %v8484_v43 = vpop.f32.mrb[98].mxu0 }
0x4803   :  { %v10357_v42 = vpop.f32.mrb[99].mxu0 }
0x4806   :  { %v8411_v49 = vpop.f32.mrb[96].mxu1 }
0x4807   :  { %v8485_v2 = vadd.f32 %v8484_v43, %v8411_v49  ;;  %v10352_v50 = vpop.f32.mrb[97].mxu1 }
0x480a   :  { %v8562_v51 = vpop.f32.mrb[98].mxu1 }
0x480b   :  { %v8566_v25 = vmul.f32 0.35355338, %v8562_v51  ;;  %v10362_v20 = vpop.f32.mrb[99].mxu1 }
0x480d   :  { %v8567_v60 = vsel %vm440_vm3, %v8566_v25, -inf }
0x480e   :  { %8568 = vmax.xlane.f32.xlu0 %v8567_v60 }
0x4824   :  { %8578 = vrot.lane.b32.xlu0 %v12311_v48, %s11061_s3 }
0x4828   :  { %8728 = vrot.lane.b32.xlu0 %v12317_v8, %s11064_s17 }
0x489b   :  { %v8569_v38 = vpop.xlane.xlu0 %8568 }
0x489c   :  { %v8570_v52 = vsub.f32 %v8566_v25, %v8569_v38  ;;  %v9011_v25 = vrot.slane %v12182_v22, %v11539_v0  ;;  %v9015_v38 = vld [vmem:[#allocation18 + $0x20] sm:$0xff] }
0x489e   :  { %v8571_v53 = vmul.f32 1.442695, %v8570_v52  ;;  %v9016_v52 = vld [vmem:[#allocation18 + $0x28] sm:$0xff] }
0x489f   :  { %v8579_v32 = vpop.permute.xlu0 %8578 }
0x48a0   :  { %10721 = vpow2.f32 %v8571_v53  ;;  %10364 = vmatpush3.msra.mxu0 %v8579_v32  ;;  %v10505_v53 = vpack.c.bf16 %v9016_v52, %v9015_v38  ;;  %v9017_v32 = vld [vmem:[#allocation18 + $0x30] sm:$0xff] }
0x48a1   :  { %10373 = vmatprep.subr.mxu0 %v11054_v19 }
0x48a3   :  { %v8729_v58 = vpop.permute.xlu0 %8728 }
0x48aa   :  { %v10722_v40 = vpop.eup %10721 }
0x48ab   :  { %v8573_v36 = vsel %vm440_vm3, %v10722_v40, 0.0 }
0x48ac   :  { %8574 = vadd.xlane.f32.xlu1 %v8573_v36 }
0x48bd   :  { %8730 = vrot.lane.b32.xlu1 %v12311_v48, %s11064_s17 }
0x4939   :  { %v8575_v18 = vpop.xlane.xlu1 %8574 }
0x493a   :  { %10723 = vrcp.f32 %v8575_v18  ;;  %v9521_v18 = vld [vmem:[%s12486_s18 + $0x40] sm:$0xff] }
0x493d   :  { %v8731_v8 = vpop.permute.xlu1 %8730 }
0x4944   :  { %v10724_v30 = vpop.eup %10723 }
0x4945   :  { %v8577_v10 = vmul.f32 %v10724_v30, %v10722_v40  ;;  %v9018_v40 = vld [vmem:[#allocation18 + $0x38] sm:$0xff]  ;;  %v9523_v30 = vld [vmem:[%s12486_s18 + $0x50] sm:$0xff] }
0x4946   :  { %v10509_v36 = vpack.c.bf16 %v9018_v40, %v9017_v32 }
0x4947   :  { %10366 = vmatmul.mubr.msk.f32.vlgmr.msra.gmra.mrb[100].mxu0 %vm440_vm3, %v8577_v10 }
0x4948   :  { %10374 = vmatpush3.xpose.msk.msra.mxu0 %vm440_vm3, %v8731_v8  ;;  %10375 = vmatprep.mubr.msk.f32.mxu0 %vm11055_vm2, %v11054_v19  ;;  %v9524_v8 = vld [vmem:[%s12486_s18 + $0x58] sm:$0xff] }
0x4949   :  { %10383 = vmatprep.subr.mxu0 %v11054_v19 }
0x494b   :  { %10376 = vmatmul.mubr.msk.f32.vlgmr.msra.gmra.mrb[102].mxu0 %vm440_vm3, %v8729_v58  ;;  %v10517_v58 = vpack.c.bf16 %v9524_v8, %v9523_v30 }
0x494c   :  { %10384 = vmatpush3.msra.mxu0 %v12342_v24  ;;  %10385 = vmatprep.mubr.msk.f32.mxu0 %vm11055_vm2, %v11054_v19  ;;  %v8974_v24 = vadd.f32 %v8972_v62, %v12194_v57 }
0x494e   :  { %v8976_v17 = vsel %vm348_vm1, %v8974_v24, 0.0 }
0x4a1a   :  { %v8650_v61 = vpop.f32.mrb[100].mxu0 }
0x4a1b   :  { %v10367_v27 = vpop.f32.mrb[101].mxu0  ;;  %10371 = vmatmul.mubr.msk.f32.vlgmr.msra.gmra.mrb[100].mxu1 %vm440_vm3, %v8650_v61  ;;  %v9526_v61 = vld [vmem:[%s12486_s18 + $0x68] sm:$0xff] }
0x4a1c   :  { %10380 = vmatprep.mubr.msk.f32.mxu1 %vm11055_vm2, %v11054_v19 }
0x4a1e   :  { %v8802_v31 = vpop.f32.mrb[102].mxu0 }
0x4a1f   :  { %v8806_v56 = vmul.f32 0.35355338, %v8802_v31  ;;  %v10377_v1 = vpop.f32.mrb[103].mxu0 }
0x4a21   :  { %v8807_v5 = vsel %vm440_vm3, %v8806_v56, -inf }
0x4a22   :  { %8808 = vmax.xlane.f32.xlu1 %v8807_v5 }
0x4a26   :  { %8977 = vadd.xlane.f32.xlu1 %v8976_v17 }
0x4aaf   :  { %v8809_v34 = vpop.xlane.xlu1 %8808 }
0x4ab0   :  { %v8810_v7 = vsub.f32 %v8806_v56, %v8809_v34  ;;  %v9527_v34 = vld [vmem:[%s12486_s18 + $0x70] sm:$0xff] }
0x4ab2   :  { %v8811_v9 = vmul.f32 1.442695, %v8810_v7  ;;  %v9528_v7 = vld [vmem:[%s12486_s18 + $0x78] sm:$0xff] }
0x4ab3   :  { %v8978_v16 = vpop.xlane.xlu1 %8977 }
0x4ab4   :  { %10725 = vpow2.f32 %v8811_v9  ;;  %v8982_v4 = vmul.f32 0.03125, %v8978_v16  ;;  %v10525_v9 = vpack.c.bf16 %v9528_v7, %v9527_v34 }
0x4ab6   :  { %v8984_v26 = vsub.f32 %v8974_v24, %v8982_v4 }
0x4ab8   :  { %v8986_v41 = vmul.f32 %v8984_v26, %v8984_v26 }
0x4aba   :  { %v8988_v44 = vsel %vm348_vm1, %v8986_v41, 0.0 }
0x4abe   :  { %v10726_v11 = vpop.eup %10725 }
0x4abf   :  { %v8813_v19 = vsel %vm440_vm3, %v10726_v11, 0.0 }
0x4ac0   :  { %8814 = vadd.xlane.f32.xlu0 %v8813_v19 }
0x4ad6   :  { %8818 = vrot.lane.b32.xlu0 %v12311_v48, %s11063_s19 }
0x4aee   :  { %v8723_v3 = vpop.f32.mrb[100].mxu1 }
0x4aef   :  { %v8727_v39 = vadd.f32 %v8723_v3, %v8485_v2  ;;  %v10372_v54 = vpop.f32.mrb[101].mxu1 }
0x4b4d   :  { %v8815_v12 = vpop.xlane.xlu0 %8814 }
0x4b4e   :  { %10727 = vrcp.f32 %v8815_v12 }
0x4b51   :  { %v8819_v57 = vpop.permute.xlu0 %8818 }
0x4b52   :  { %10379 = vmatpush3.msra.mxu1 %v8819_v57 }
0x4b53   :  { %10506 = vmatprep.subr.bf16.mxu1 %v10505_v53 }
0x4b58   :  { %v10728_v35 = vpop.eup %10727 }
0x4b59   :  { %v8817_v14 = vmul.f32 %v10728_v35, %v10726_v11  ;;  %v9518_v11 = vld [vmem:[#allocation19 + $0x1] ss:$0 sm:$0xff]  ;;  %v9529_v35 = vld [vmem:[#allocation21 + $0x1] ss:$0 sm:$0xff] }
0x4b5b   :  { %10381 = vmatmul.mubr.msk.f32.vlgmr.msra.gmra.mrb[102].mxu1 %vm440_vm3, %v8817_v14 }
0x4b5c   :  { %10508 = vmatpush3.bf16.msra.mxu1 %v10505_v53  ;;  %v9233_v53 = vrot.slane %v12177_v55, %v11935_v13 }
0x4b5d   :  { %10510 = vmatprep.subr.bf16.mxu1 %v10509_v36 }
0x4b60   :  { %10512 = vmatpush3.bf16.msra.mxu1 %v10509_v36  ;;  %v9239_v36 = vrot.slane %v12182_v22, %v11935_v13 }
0x4c2e   :  { %v8890_v63 = vpop.f32.mrb[102].mxu1 }
0x4c2f   :  { %v10382_v15 = vpop.f32.mrb[103].mxu1  ;;  %10386 = vmatmul.mubr.msk.f32.vlgmr.msra.gmra.mrb[104].mxu0 %vm440_vm3, %v8890_v63 }
0x4d02   :  { %v8963_v23 = vpop.f32.mrb[104].mxu0 }
0x4d03   :  { %v8967_v28 = vadd.f32 %v8963_v23, %v8727_v39  ;;  %v10387_v48 = vpop.f32.mrb[105].mxu0 }
0x4d05   :  { %v8973_v21 = vadd.f32 %v9517_v59, %v8967_v28  ;;  %v9525_v59 = vld [vmem:[%s12486_s18 + $0x60] sm:$0xff] }
0x4d06   :  { %v10521_v27 = vpack.c.bf16 %v9526_v61, %v9525_v59  ;;  %v9532_v59 = vld [vmem:[#allocation9] ss:$0 sm:$0xff] }
0x4d07   :  { %v8975_v37 = vadd.f32 %v8973_v21, %v12211_v6  ;;  %v9005_v6 = vrot.slane %v12177_v55, %v11539_v0  ;;  %v9522_v0 = vld [vmem:[%s12486_s18 + $0x48] sm:$0xff] }
0x4d08   :  { %v10513_v10 = vpack.c.bf16 %v9522_v0, %v9521_v18 }
0x4d09   :  { %v8979_v29 = vsel %vm348_vm1, %v8975_v37, 0.0 }
0x4d0a   :  { %8980 = vadd.xlane.f32.xlu1 %v8979_v29  ;;  %10514 = vmatprep.subr.bf16.mxu0 %v10513_v10 }
0x4d0b   :  { %10516 = vmatpush3.bf16.msra.mxu0 %v10513_v10 }
0x4d0c   :  { %10518 = vmatprep.subr.bf16.mxu0 %v10517_v58 }
0x4d0e   :  { %8989 = vadd.xlane.f32.xlu1 %v8988_v44 }
0x4d0f   :  { %10520 = vmatpush3.bf16.msra.mxu0 %v10517_v58 }
0x4d10   :  { %10522 = vmatprep.subr.bf16.mxu0 %v10521_v27 }
0x4d13   :  { %10524 = vmatpush3.bf16.msra.mxu0 %v10521_v27 }
0x4d14   :  { %10526 = vmatprep.subr.bf16.mxu0 %v10525_v9 }
0x4d17   :  { %10528 = vmatpush3.bf16.msra.mxu0 %v10525_v9 }
0x4d97   :  { %v8981_v45 = vpop.xlane.xlu1 %8980 }
0x4d98   :  { %v8983_v46 = vmul.f32 0.03125, %v8981_v45 }
0x4d9a   :  { %v8985_v47 = vsub.f32 %v8975_v37, %v8983_v46 }
0x4d9b   :  { %v8990_v33 = vpop.xlane.xlu1 %8989 }
0x4d9c   :  { %v8994_v43 = vmul.f32 0.03125, %v8990_v33  ;;  %v8987_v42 = vmul.f32 %v8985_v47, %v8985_v47 }
0x4d9e   :  { %v8996_v49 = vadd.f32 1e-05, %v8994_v43  ;;  %v8991_v2 = vsel %vm348_vm1, %v8987_v42, 0.0  ;;  %v9242_v43 = vld [vmem:[#allocation7] sm:$0xff]  ;;  %v9243_v42 = vld [vmem:[#allocation7 + $0x8] sm:$0xff] }
0x4d9f   :  { %8992 = vadd.xlane.f32.xlu1 %v8991_v2  ;;  %v9244_v2 = vld [vmem:[#allocation7 + $0x10] sm:$0xff] }
0x4da0   :  { %10729 = vrsqrt.f32 %v8996_v49  ;;  %v10529_v49 = vpack.c.bf16 %v9243_v42, %v9242_v43 }
0x4da2   :  { %10530 = vmatprep.subr.bf16.mxu1 %v10529_v49 }
0x4daa   :  { %v10730_v50 = vpop.eup %10729 }
0x4dab   :  { %v9000_v51 = vmul.f32 %v10730_v50, %v8984_v26 }
0x4dad   :  { %v9006_v20 = vmul.f32 %v9005_v6, %v9000_v51 }
0x4daf   :  { %v9012_v60 = vadd.f32 %v9011_v25, %v9006_v20 }
0x4db1   :  { %10396 = vmatprep.mubr.msk.f32.mxu1 %vm348_vm1, %v9012_v60 }
0x4e2c   :  { %v8993_v62 = vpop.xlane.xlu1 %8992 }
0x4e2d   :  { %v8995_v31 = vmul.f32 0.03125, %v8993_v62 }
0x4e2f   :  { %v8997_v56 = vadd.f32 1e-05, %v8995_v31 }
0x4e31   :  { %10731 = vrsqrt.f32 %v8997_v56 }
0x4e3b   :  { %v10732_v1 = vpop.eup %10731 }
0x4e3c   :  { %v9001_v5 = vmul.f32 %v10732_v1, %v8985_v47 }
0x4e3e   :  { %v9007_v24 = vmul.f32 %v9005_v6, %v9001_v5  ;;  %v9245_v6 = vld [vmem:[#allocation7 + $0x18] sm:$0xff] }
0x4e3f   :  { %v10533_v50 = vpack.c.bf16 %v9245_v6, %v9244_v2 }
0x4e40   :  { %v9013_v17 = vadd.f32 %v9011_v25, %v9007_v24 }
0x4e42   :  { %10397 = vmatmul.mubr.msk.f32.vlgmr.msra.gmra.mrb[104].mxu1 %vm348_vm1, %v9013_v17 }
0x4e43   :  { %10532 = vmatpush3.bf16.msra.mxu1 %v10529_v49 }
0x4e44   :  { %10534 = vmatprep.subr.bf16.mxu1 %v10533_v50 }
0x4e47   :  { %10536 = vmatpush3.bf16.msra.mxu1 %v10533_v50 }
0x4f15   :  { %v10398_v19 = vpop.f32.mrb[104].mxu1 }
0x4f16   :  { %v9102_v3 = vadd.f32 %v10398_v19, %v9518_v11  ;;  %v9096_v39 = vpop.f32.mrb[105].mxu1 }
0x4f17   :  { %v9097_v54 = vadd.f32 %v9518_v11, %v9096_v39 }
0x4f18   :  { %v9106_v57 = vmax.f32 %v9102_v3, 0.0 }
0x4f19   :  { %v9105_v12 = vmax.f32 %v9097_v54, 0.0 }
0x4f1b   :  { %10415 = vmatprep.mubr.msk.f32.mxu0 %vm4673_vm6, %v9105_v12 }
0x4f1c   :  { %10416 = vmatmul.mubr.msk.f32.vlgmr.msra.gmra.mrb[106].mxu0 %vm4673_vm6, %v9106_v57 }
0x4fef   :  { %v10417_v14 = vpop.f32.mrb[106].mxu0 }
0x4ff0   :  { %v9199_v63 = vadd.f32 %v10417_v14, %v9529_v35  ;;  %v9193_v15 = vpop.f32.mrb[107].mxu0 }
0x4ff1   :  { %v9194_v16 = vadd.f32 %v9529_v35, %v9193_v15 }
0x4ff2   :  { %v9203_v4 = vadd.f32 %v9199_v63, %v9013_v17 }
0x4ff3   :  { %v9202_v23 = vadd.f32 %v9194_v16, %v9012_v60 }
0x4ff4   :  { %v9207_v28 = vsel %vm348_vm1, %v9203_v4, 0.0 }
0x4ff5   :  { %9208 = vadd.xlane.f32.xlu0 %v9207_v28  ;;  %v9204_v48 = vsel %vm348_vm1, %v9202_v23, 0.0 }
0x4ff6   :  { %9205 = vadd.xlane.f32.xlu1 %v9204_v48 }
0x5082   :  { %v9209_v26 = vpop.xlane.xlu0 %9208 }
0x5083   :  { %v9211_v21 = vmul.f32 0.03125, %v9209_v26  ;;  %v9206_v37 = vpop.xlane.xlu1 %9205 }
0x5084   :  { %v9210_v29 = vmul.f32 0.03125, %v9206_v37 }
0x5085   :  { %v9213_v41 = vsub.f32 %v9203_v4, %v9211_v21 }
0x5086   :  { %v9212_v44 = vsub.f32 %v9202_v23, %v9210_v29 }
0x5087   :  { %v9215_v47 = vmul.f32 %v9213_v41, %v9213_v41 }
0x5088   :  { %v9214_v45 = vmul.f32 %v9212_v44, %v9212_v44 }
0x5089   :  { %v9219_v33 = vsel %vm348_vm1, %v9215_v47, 0.0 }
0x508a   :  { %v9216_v46 = vsel %vm348_vm1, %v9214_v45, 0.0 }
0x508b   :  { %9217 = vadd.xlane.f32.xlu1 %v9216_v46 }
0x508f   :  { %9220 = vadd.xlane.f32.xlu1 %v9219_v33 }
0x5118   :  { %v9218_v51 = vpop.xlane.xlu1 %9217 }
0x5119   :  { %v9222_v25 = vmul.f32 0.03125, %v9218_v51 }
0x511b   :  { %v9224_v20 = vadd.f32 1e-05, %v9222_v25 }
0x511c   :  { %v9221_v60 = vpop.xlane.xlu1 %9220 }
0x511d   :  { %10733 = vrsqrt.f32 %v9224_v20  ;;  %v9223_v38 = vmul.f32 0.03125, %v9221_v60 }
0x511f   :  { %v9225_v52 = vadd.f32 1e-05, %v9223_v38 }
0x5121   :  { %10735 = vrsqrt.f32 %v9225_v52 }
0x5127   :  { %v10734_v32 = vpop.eup %10733 }
0x5128   :  { %v9228_v40 = vmul.f32 %v10734_v32, %v9212_v44 }
0x512a   :  { %v9234_v18 = vmul.f32 %v9233_v53, %v9228_v40 }
0x512b   :  { %v10736_v0 = vpop.eup %10735 }
0x512c   :  { %v9229_v30 = vmul.f32 %v10736_v0, %v9213_v41  ;;  %v9240_v10 = vadd.f32 %v9239_v36, %v9234_v18 }
0x512e   :  { %v9235_v8 = vmul.f32 %v9233_v53, %v9229_v30  ;;  %10426 = vmatprep.mubr.msk.f32.mxu1 %vm348_vm1, %v9240_v10 }
0x5130   :  { %v9241_v58 = vadd.f32 %v9239_v36, %v9235_v8 }
0x5132   :  { %10427 = vmatmul.mubr.msk.f32.vlgmr.msra.gmra.mrb[106].mxu1 %vm348_vm1, %v9241_v58 }
0x5205   :  { %v10428_v61 = vpop.f32.mrb[106].mxu1 }
0x5206   :  { %v9331_v27 = vadd.f32 %v10428_v61, %v9532_v59  ;;  %v9325_v62 = vpop.f32.mrb[107].mxu1 }
0x5207   :  { %v9326_v55 = vadd.f32 %v9532_v59, %v9325_v62 }
0x5208   :  { %9335 = vst [vmem:[%s12513_s25 + $0x8] sm:$0xff] %v9331_v27 }
0x5209   :  { %9334 = vst [vmem:[%s12513_s25] sm:$0xff] %v9326_v55 }
0x520a   :  { %9340 = vsyncpa [#allocation3], 1 }
0x520b   :  { %9341 = vsyncpa [#allocation5], 1 }
0x520c   :  { %9342 = vsyncpa [#allocation8], 1 }
0x520d   :  { %9343 = vsyncpa [#allocation11], 1 }
0x520e   :  { %9344 = vsyncpa [#allocation14], 1 }
0x520f   :  { %9345 = vsyncpa [#allocation17], 1 }
0x5210   :  { %9346 = vsyncpa [#allocation20], 1 }

</bundles_post_ra>
